<compile_context>
chip_gen: v7x
topology: tpu7x:2x2x1
jax: 0.10.0
libtpu: 0.0.40
codegen_flags: <defaults>
</compile_context>

<pallas_src>
import functools
import math

import jax
import jax.numpy as jnp
from jax.experimental import pallas as pl
from jax.experimental.pallas import tpu as pltpu


CFG = dict(hidden=128, heads=4, layers=2, intermediate=512,
           vocab=512, max_pos=32, type_vocab=1, pad_id=1, num_labels=4,
           ln_eps=1e-5, lane_pad=128)


# ----------------------------------------------------------------------------
# In-kernel helpers (fp32 LN/softmax, bf16 MXU matmuls)
# ----------------------------------------------------------------------------
def _layernorm(x, g, b, eps):
    mean = jnp.mean(x, axis=-1, keepdims=True)
    xc = x - mean
    var = jnp.mean(xc * xc, axis=-1, keepdims=True)
    return xc * jax.lax.rsqrt(var + eps) * g + b


def _gelu(x):
    # TODO(synk): HF RoBERTa uses exact erf-GELU; tanh approximation used here.
    return 0.5 * x * (1.0 + jnp.tanh(0.7978845608028654 * (x + 0.044715 * x * x * x)))


# ----------------------------------------------------------------------------
# Fused whole-model kernel: one grid step = one batch block of BB sequences,
# flattened to M = BB*S rows for every matmul.
# ----------------------------------------------------------------------------
def _roberta_fused_kernel(emb_ref, mask_ref,
                          eg_ref, eb_ref,
                          qkvw_ref, qkvb_ref,
                          aow_ref, aob_ref, aolg_ref, aolb_ref,
                          iw_ref, ib_ref, ow_ref, ob_ref, olg_ref, olb_ref,
                          prew_ref, preb_ref, clsw_ref, clsb_ref,
                          out_ref, *, n_layers, n_heads, n_seq, seq_len, eps):
    x = emb_ref[0].astype(jnp.float32)          # (M, H) summed embeddings (pre-LN)
    addmask = mask_ref[0]                       # (M, M) block-diag + key-padding mask
    M, H = x.shape
    Dh = H // n_heads
    scale = 1.0 / math.sqrt(Dh)

    # embedding LayerNorm (embedding dropout is identity in eval mode)
    x = _layernorm(x, eg_ref[...], eb_ref[...], eps)
    x_bf = x.astype(jnp.bfloat16)               # single bf16 shadow feeds the next matmul

    # TODO(synk): for L>=12 (real roberta-base) switch to lax.fori_loop / a layer grid
    # axis with streamed per-layer weights; static unroll + whole-model VMEM residency is
    # only valid at this toy scale.
    for l in range(n_layers):
        # ---- fused QKV projection: one (H, 3H) matmul, one bf16 cast of the slab ----
        qkv = jnp.dot(x_bf, qkvw_ref[l],
                      preferred_element_type=jnp.float32) + qkvb_ref[l]   # (M, 3H) fp32
        qkv = qkv.astype(jnp.bfloat16)
        q = qkv[:, 0:H]                          # 128-lane aligned slices
        k = qkv[:, H:2 * H]
        v = qkv[:, 2 * H:3 * H]

        # ---- head-batched attention: one score matmul, one softmax, one ctx matmul ----
        qh = jnp.stack([q[:, h * Dh:(h + 1) * Dh] for h in range(n_heads)], axis=0)
        kh = jnp.stack([k[:, h * Dh:(h + 1) * Dh] for h in range(n_heads)], axis=0)
        vh = jnp.stack([v[:, h * Dh:(h + 1) * Dh] for h in range(n_heads)], axis=0)
        s = jnp.einsum('hqd,hkd->hqk', qh, kh,
                       preferred_element_type=jnp.float32) * scale       # (nH, M, M)
        s = s + addmask                                                   # bcast over heads
        s = s - jnp.max(s, axis=-1, keepdims=True)
        p = jnp.exp(s)
        p = p * pl.reciprocal(jnp.sum(p, axis=-1, keepdims=True), approx=True)
        ctx = jnp.einsum('hqk,hkd->hqd', p.astype(jnp.bfloat16), vh,
                         preferred_element_type=jnp.float32)              # (nH, M, Dh)

        # concat heads back to (M, H): single K=128 output projection (v5e MXU depth)
        ctx = jnp.concatenate([ctx[h] for h in range(n_heads)], axis=-1)  # (M, H)
        attn = jnp.dot(ctx.astype(jnp.bfloat16), aow_ref[l],
                       preferred_element_type=jnp.float32) + aob_ref[l]
        x = _layernorm(attn + x, aolg_ref[l], aolb_ref[l], eps)           # residual + LN
        x_bf = x.astype(jnp.bfloat16)

        # ---- FFN: GELU intermediate + output projection + residual LN ----
        inter = _gelu(jnp.dot(x_bf, iw_ref[l],
                              preferred_element_type=jnp.float32) + ib_ref[l])   # (M, I)
        out = jnp.dot(inter.astype(jnp.bfloat16), ow_ref[l],
                      preferred_element_type=jnp.float32) + ob_ref[l]            # (M, H)
        x = _layernorm(out + x, olg_ref[l], olb_ref[l], eps)
        x_bf = x.astype(jnp.bfloat16)

    # ---- classification head: pool FIRST (CLS row of each sequence), then project ----
    cls = jnp.concatenate([x_bf[b * seq_len:b * seq_len + 1, :] for b in range(n_seq)],
                          axis=0)                                          # (BB, H) bf16
    pre = jnp.maximum(jnp.dot(cls, prew_ref[...],
                              preferred_element_type=jnp.float32) + preb_ref[...], 0.0)
    # TODO(synk): nn.Dropout(0.3) is identity in eval mode; training RNG not implemented.
    logits = jnp.dot(pre.astype(jnp.bfloat16), clsw_ref[...],
                     preferred_element_type=jnp.float32) + clsb_ref[...]   # (BB, 128)
    out_ref[0] = logits                                                    # lane-dense store


# ----------------------------------------------------------------------------
# Params (stacked per-layer, matmul weights in bf16)
# ----------------------------------------------------------------------------
def init_params(key, cfg):
    H, I, L = cfg["hidden"], cfg["intermediate"], cfg["layers"]
    nlab, P, pad_id = cfg["num_labels"], cfg["lane_pad"], cfg["pad_id"]
    ks = iter(jax.random.split(key, 16))

    def w(k, *shape):
        return 0.02 * jax.random.normal(k, shape, jnp.float32)

    # nn.Embedding(padding_idx=pad_id): zero the padding rows (word & position tables)
    word_emb = w(next(ks), cfg["vocab"], H).at[pad_id].set(0.0)
    pos_emb = w(next(ks), cfg["max_pos"], H).at[pad_id].set(0.0)

    p = {
        "word_emb": word_emb,
        "pos_emb": pos_emb,
        "type_emb": w(next(ks), cfg["type_vocab"], H),
        "emb_ln_g": jnp.ones((1, H), jnp.float32),
        "emb_ln_b": jnp.zeros((1, H), jnp.float32),
        # fused QKV weight == concat of q/k/v nn.Linear weights (stored transposed)
        "qkv_w": w(next(ks), L, H, 3 * H).astype(jnp.bfloat16),
        "qkv_b": jnp.zeros((L, 1, 3 * H), jnp.float32),
        "ao_w": w(next(ks), L, H, H).astype(jnp.bfloat16),
        "ao_b": jnp.zeros((L, 1, H), jnp.float32),
        "ao_ln_g": jnp.ones((L, 1, H), jnp.float32),
        "ao_ln_b": jnp.zeros((L, 1, H), jnp.float32),
        "i_w": w(next(ks), L, H, I).astype(jnp.bfloat16),
        "i_b": jnp.zeros((L, 1, I), jnp.float32),
        "o_w": w(next(ks), L, I, H).astype(jnp.bfloat16),
        "o_b": jnp.zeros((L, 1, H), jnp.float32),
        "o_ln_g": jnp.ones((L, 1, H), jnp.float32),
        "o_ln_b": jnp.zeros((L, 1, H), jnp.float32),
        "pre_w": w(next(ks), H, H).astype(jnp.bfloat16),
        "pre_b": jnp.zeros((1, H), jnp.float32),
    }
    # classifier weight lane-padded num_labels -> 128 so the output store is unmasked
    cls_w = w(next(ks), H, nlab)
    p["cls_w"] = jnp.pad(cls_w, ((0, 0), (0, P - nlab))).astype(jnp.bfloat16)
    p["cls_b"] = jnp.zeros((1, P), jnp.float32)
    return p


# ----------------------------------------------------------------------------
# Forward pass: embedding gathers in plain JAX, everything else in one pallas_call
# ----------------------------------------------------------------------------
def roberta_classifier_forward(params, input_ids, attention_mask, token_type_ids, cfg):
    B, S = input_ids.shape
    H, L = cfg["hidden"], cfg["layers"]
    nlab, P = cfg["num_labels"], cfg["lane_pad"]
    pad_id = cfg["pad_id"]

    # Two batch blocks keep both v7x TensorCores busy; on v5e/v6e (single TC) the larger
    # per-step M is the win (fewer serial grid steps, better MXU sublane fill).
    NB = 2 if (B % 2 == 0 and B >= 2) else 1
    BB = B // NB
    M = BB * S

    # --- embeddings (data-dependent gathers stay as plain-JAX glue) ---
    # TODO(synk): max_pos=32 supports S <= max_pos - pad_id - 1 with RoBERTa position ids.
    not_pad = (input_ids != pad_id).astype(jnp.int32)
    position_ids = jnp.cumsum(not_pad, axis=1) * not_pad + pad_id
    emb = (params["word_emb"][input_ids]
           + params["pos_emb"][position_ids]
           + params["type_emb"][token_type_ids]).astype(jnp.float32)     # (B, S, H)
    emb = emb.reshape(NB, M, H)                                          # fold batch block

    # Block-diagonal additive mask: -1e9 for cross-sequence pairs and padded keys, so the
    # folded (M, M) attention stays per-sequence.
    am = attention_mask.astype(jnp.float32).reshape(NB, BB, S)
    same_seq = jnp.eye(BB, dtype=jnp.float32)
    valid = same_seq[None, :, :, None] * am[:, None, :, :]               # (NB, BBq, BBk, S)
    valid = jnp.broadcast_to(valid[:, :, None, :, :],
                             (NB, BB, S, BB, S)).reshape(NB, M, M)
    addmask = (1.0 - valid) * -1e9                                       # (NB, M, M)

    weight_arrays = [
        params["emb_ln_g"], params["emb_ln_b"],
        params["qkv_w"], params["qkv_b"],
        params["ao_w"], params["ao_b"], params["ao_ln_g"], params["ao_ln_b"],
        params["i_w"], params["i_b"], params["o_w"], params["o_b"],
        params["o_ln_g"], params["o_ln_b"],
        params["pre_w"], params["pre_b"], params["cls_w"], params["cls_b"],
    ]

    def _const_map(ndim):
        return lambda g: (0,) * ndim

    in_specs = [
        pl.BlockSpec((1, M, H), lambda g: (g, 0, 0)),   # per-block folded embeddings
        pl.BlockSpec((1, M, M), lambda g: (g, 0, 0)),   # per-block additive mask
    ]
    # weights: full-array blocks, constant block index -> fetched once, VMEM-resident
    # (at real roberta-base scale these would be streamed via a layer grid axis instead)
    in_specs += [pl.BlockSpec(w.shape, _const_map(w.ndim)) for w in weight_arrays]

    logits_pad = pl.pallas_call(
        functools.partial(_roberta_fused_kernel, n_layers=L, n_heads=cfg["heads"],
                          n_seq=BB, seq_len=S, eps=cfg["ln_eps"]),
        out_shape=jax.ShapeDtypeStruct((NB, BB, P), jnp.float32),
        grid=(NB,),
        in_specs=in_specs,
        out_specs=pl.BlockSpec((1, BB, P), lambda g: (g, 0, 0)),
        compiler_params=pltpu.CompilerParams(
            dimension_semantics=("parallel",)),   # shards batch blocks across TCs on v7x
    )(emb, addmask, *weight_arrays)

    return logits_pad.reshape(B, P)[:, :nlab]                            # (B, num_labels)


# ----------------------------------------------------------------------------
if __name__ == "__main__":
    B, S = 4, 16
    root = jax.random.PRNGKey(0)
    k_param, k_ids = jax.random.split(root)

    params = init_params(k_param, CFG)

    input_ids = jax.random.randint(k_ids, (B, S), 3, CFG["vocab"], dtype=jnp.int32)
    attention_mask = jnp.ones((B, S), jnp.int32)
    # pad the tail of the second sequence to exercise masking
    attention_mask = attention_mask.at[1, -3:].set(0)
    input_ids = input_ids.at[1, -3:].set(CFG["pad_id"])
    token_type_ids = jnp.zeros((B, S), jnp.int32)

    fwd = jax.jit(functools.partial(roberta_classifier_forward, cfg=CFG))
    logits = fwd(params, input_ids, attention_mask, token_type_ids)
    logits = jax.block_until_ready(logits)
    assert logits.shape == (B, CFG["num_labels"])
    assert bool(jnp.all(jnp.isfinite(logits)))
    print("KERNEL_OK")
</pallas_src>

<mosaic_0001>
module attributes {stable_mosaic.version = 11 : i64} {
  func.func @_roberta_fused_kernel(%arg0: i32, %arg1: memref<1x32x128xf32, #tpu.memory_space<vmem>>, %arg2: memref<1x32x32xf32, #tpu.memory_space<vmem>>, %arg3: memref<1x128xf32, #tpu.memory_space<vmem>>, %arg4: memref<1x128xf32, #tpu.memory_space<vmem>>, %arg5: memref<2x128x384xbf16, #tpu.memory_space<vmem>>, %arg6: memref<2x1x384xf32, #tpu.memory_space<vmem>>, %arg7: memref<2x128x128xbf16, #tpu.memory_space<vmem>>, %arg8: memref<2x1x128xf32, #tpu.memory_space<vmem>>, %arg9: memref<2x1x128xf32, #tpu.memory_space<vmem>>, %arg10: memref<2x1x128xf32, #tpu.memory_space<vmem>>, %arg11: memref<2x128x512xbf16, #tpu.memory_space<vmem>>, %arg12: memref<2x1x512xf32, #tpu.memory_space<vmem>>, %arg13: memref<2x512x128xbf16, #tpu.memory_space<vmem>>, %arg14: memref<2x1x128xf32, #tpu.memory_space<vmem>>, %arg15: memref<2x1x128xf32, #tpu.memory_space<vmem>>, %arg16: memref<2x1x128xf32, #tpu.memory_space<vmem>>, %arg17: memref<128x128xbf16, #tpu.memory_space<vmem>>, %arg18: memref<1x128xf32, #tpu.memory_space<vmem>>, %arg19: memref<128x128xbf16, #tpu.memory_space<vmem>>, %arg20: memref<1x128xf32, #tpu.memory_space<vmem>>, %arg21: memref<1x2x128xf32, #tpu.memory_space<vmem>>) attributes {dimension_semantics = [#tpu.dimension_semantics<parallel>], iteration_bounds = array<i64: 2>, scalar_prefetch = 0 : i64, scratch_operands = 0 : i64, tpu.core_type = #tpu.core_type<tc>, window_params = [{transform_indices = @transform_0, window_bounds = array<i64: 1, 32, 128>}, {transform_indices = @transform_1, window_bounds = array<i64: 1, 32, 32>}, {pipeline_mode = #tpu.pipeline_mode<synchronous>, transform_indices = @transform_2, window_bounds = array<i64: 1, 128>}, {pipeline_mode = #tpu.pipeline_mode<synchronous>, transform_indices = @transform_3, window_bounds = array<i64: 1, 128>}, {pipeline_mode = #tpu.pipeline_mode<synchronous>, transform_indices = @transform_4, window_bounds = array<i64: 2, 128, 384>}, {pipeline_mode = #tpu.pipeline_mode<synchronous>, transform_indices = @transform_5, window_bounds = array<i64: 2, 1, 384>}, {pipeline_mode = #tpu.pipeline_mode<synchronous>, transform_indices = @transform_6, window_bounds = array<i64: 2, 128, 128>}, {pipeline_mode = #tpu.pipeline_mode<synchronous>, transform_indices = @transform_7, window_bounds = array<i64: 2, 1, 128>}, {pipeline_mode = #tpu.pipeline_mode<synchronous>, transform_indices = @transform_8, window_bounds = array<i64: 2, 1, 128>}, {pipeline_mode = #tpu.pipeline_mode<synchronous>, transform_indices = @transform_9, window_bounds = array<i64: 2, 1, 128>}, {pipeline_mode = #tpu.pipeline_mode<synchronous>, transform_indices = @transform_10, window_bounds = array<i64: 2, 128, 512>}, {pipeline_mode = #tpu.pipeline_mode<synchronous>, transform_indices = @transform_11, window_bounds = array<i64: 2, 1, 512>}, {pipeline_mode = #tpu.pipeline_mode<synchronous>, transform_indices = @transform_12, window_bounds = array<i64: 2, 512, 128>}, {pipeline_mode = #tpu.pipeline_mode<synchronous>, transform_indices = @transform_13, window_bounds = array<i64: 2, 1, 128>}, {pipeline_mode = #tpu.pipeline_mode<synchronous>, transform_indices = @transform_14, window_bounds = array<i64: 2, 1, 128>}, {pipeline_mode = #tpu.pipeline_mode<synchronous>, transform_indices = @transform_15, window_bounds = array<i64: 2, 1, 128>}, {pipeline_mode = #tpu.pipeline_mode<synchronous>, transform_indices = @transform_16, window_bounds = array<i64: 128, 128>}, {pipeline_mode = #tpu.pipeline_mode<synchronous>, transform_indices = @transform_17, window_bounds = array<i64: 1, 128>}, {pipeline_mode = #tpu.pipeline_mode<synchronous>, transform_indices = @transform_18, window_bounds = array<i64: 128, 128>}, {pipeline_mode = #tpu.pipeline_mode<synchronous>, transform_indices = @transform_19, window_bounds = array<i64: 1, 128>}, {transform_indices = @transform_20, window_bounds = array<i64: 1, 2, 128>}]} {
    %c0 = arith.constant 0 : index
    %c0_0 = arith.constant 0 : index
    %c0_1 = arith.constant 0 : index
    %0 = vector.load %arg1[%c0, %c0_0, %c0_1] : memref<1x32x128xf32, #tpu.memory_space<vmem>>, vector<1x32x128xf32>
    %1 = vector.shape_cast %0 : vector<1x32x128xf32> to vector<32x128xf32>
    %c0_2 = arith.constant 0 : index
    %c0_3 = arith.constant 0 : index
    %c0_4 = arith.constant 0 : index
    %2 = vector.load %arg2[%c0_2, %c0_3, %c0_4] : memref<1x32x32xf32, #tpu.memory_space<vmem>>, vector<1x32x32xf32>
    %3 = vector.shape_cast %2 : vector<1x32x32xf32> to vector<32x32xf32>
    %c0_5 = arith.constant 0 : index
    %c0_6 = arith.constant 0 : index
    %4 = vector.load %arg3[%c0_5, %c0_6] : memref<1x128xf32, #tpu.memory_space<vmem>>, vector<1x128xf32>
    %c0_7 = arith.constant 0 : index
    %c0_8 = arith.constant 0 : index
    %5 = vector.load %arg4[%c0_7, %c0_8] : memref<1x128xf32, #tpu.memory_space<vmem>>, vector<1x128xf32>
    %cst = arith.constant dense<0.000000e+00> : vector<32xf32>
    %6 = vector.multi_reduction <add>, %1, %cst [1] : vector<32x128xf32> to vector<32xf32>
    %7 = vector.shape_cast %6 : vector<32xf32> to vector<32x1xf32>
    %cst_9 = arith.constant 1.280000e+02 : f32
    %8 = vector.broadcast %cst_9 : f32 to vector<32x1xf32>
    %9 = arith.divf %7, %8 : vector<32x1xf32>
    %10 = vector.broadcast %9 : vector<32x1xf32> to vector<32x128xf32>
    %11 = arith.subf %1, %10 : vector<32x128xf32>
    %12 = arith.mulf %11, %11 : vector<32x128xf32>
    %cst_10 = arith.constant dense<0.000000e+00> : vector<32xf32>
    %13 = vector.multi_reduction <add>, %12, %cst_10 [1] : vector<32x128xf32> to vector<32xf32>
    %14 = vector.shape_cast %13 : vector<32xf32> to vector<32x1xf32>
    %cst_11 = arith.constant 1.280000e+02 : f32
    %15 = vector.broadcast %cst_11 : f32 to vector<32x1xf32>
    %16 = arith.divf %14, %15 : vector<32x1xf32>
    %cst_12 = arith.constant 9.99999974E-6 : f32
    %17 = vector.broadcast %cst_12 : f32 to vector<32x1xf32>
    %18 = arith.addf %16, %17 : vector<32x1xf32>
    %19 = math.rsqrt %18 : vector<32x1xf32>
    %20 = vector.broadcast %19 : vector<32x1xf32> to vector<32x128xf32>
    %21 = arith.mulf %11, %20 : vector<32x128xf32>
    %22 = vector.broadcast %4 : vector<1x128xf32> to vector<32x128xf32>
    %23 = arith.mulf %21, %22 : vector<32x128xf32>
    %24 = vector.broadcast %5 : vector<1x128xf32> to vector<32x128xf32>
    %25 = arith.addf %23, %24 : vector<32x128xf32>
    %26 = arith.truncf %25 : vector<32x128xf32> to vector<32x128xbf16>
    %c0_13 = arith.constant 0 : index
    %c0_14 = arith.constant 0 : index
    %c0_15 = arith.constant 0 : index
    %27 = vector.load %arg5[%c0_13, %c0_14, %c0_15] : memref<2x128x384xbf16, #tpu.memory_space<vmem>>, vector<1x128x384xbf16>
    %28 = vector.shape_cast %27 : vector<1x128x384xbf16> to vector<128x384xbf16>
    %cst_16 = arith.constant dense<0.000000e+00> : vector<32x384xf32>
    %29 = tpu.matmul %26, %28, %cst_16 {dimension_numbers = #tpu.dot_dimension_numbers<[1], [0], [0], [1], [0, 0, 1, 1], [], []>} : vector<32x128xbf16>, vector<128x384xbf16>, vector<32x384xf32> -> vector<32x384xf32>
    %c0_17 = arith.constant 0 : index
    %c0_18 = arith.constant 0 : index
    %c0_19 = arith.constant 0 : index
    %30 = vector.load %arg6[%c0_17, %c0_18, %c0_19] : memref<2x1x384xf32, #tpu.memory_space<vmem>>, vector<1x1x384xf32>
    %31 = vector.shape_cast %30 : vector<1x1x384xf32> to vector<1x384xf32>
    %32 = vector.broadcast %31 : vector<1x384xf32> to vector<32x384xf32>
    %33 = arith.addf %29, %32 : vector<32x384xf32>
    %34 = arith.truncf %33 : vector<32x384xf32> to vector<32x384xbf16>
    %35 = vector.extract_strided_slice %34 {offsets = [0, 0], sizes = [32, 128], strides = [1, 1]} : vector<32x384xbf16> to vector<32x128xbf16>
    %36 = vector.extract_strided_slice %34 {offsets = [0, 128], sizes = [32, 128], strides = [1, 1]} : vector<32x384xbf16> to vector<32x128xbf16>
    %37 = vector.extract_strided_slice %34 {offsets = [0, 256], sizes = [32, 128], strides = [1, 1]} : vector<32x384xbf16> to vector<32x128xbf16>
    %38 = vector.extract_strided_slice %35 {offsets = [0, 0], sizes = [32, 32], strides = [1, 1]} : vector<32x128xbf16> to vector<32x32xbf16>
    %39 = vector.extract_strided_slice %35 {offsets = [0, 32], sizes = [32, 32], strides = [1, 1]} : vector<32x128xbf16> to vector<32x32xbf16>
    %40 = vector.extract_strided_slice %35 {offsets = [0, 64], sizes = [32, 32], strides = [1, 1]} : vector<32x128xbf16> to vector<32x32xbf16>
    %41 = vector.extract_strided_slice %35 {offsets = [0, 96], sizes = [32, 32], strides = [1, 1]} : vector<32x128xbf16> to vector<32x32xbf16>
    %42 = vector.shape_cast %38 : vector<32x32xbf16> to vector<1x32x32xbf16>
    %43 = vector.shape_cast %39 : vector<32x32xbf16> to vector<1x32x32xbf16>
    %44 = vector.shape_cast %40 : vector<32x32xbf16> to vector<1x32x32xbf16>
    %45 = vector.shape_cast %41 : vector<32x32xbf16> to vector<1x32x32xbf16>
    %46 = tpu.concatenate %42, %43, %44, %45 in 0 : vector<1x32x32xbf16>, vector<1x32x32xbf16>, vector<1x32x32xbf16>, vector<1x32x32xbf16> -> vector<4x32x32xbf16>
    %47 = vector.extract_strided_slice %36 {offsets = [0, 0], sizes = [32, 32], strides = [1, 1]} : vector<32x128xbf16> to vector<32x32xbf16>
    %48 = vector.extract_strided_slice %36 {offsets = [0, 32], sizes = [32, 32], strides = [1, 1]} : vector<32x128xbf16> to vector<32x32xbf16>
    %49 = vector.extract_strided_slice %36 {offsets = [0, 64], sizes = [32, 32], strides = [1, 1]} : vector<32x128xbf16> to vector<32x32xbf16>
    %50 = vector.extract_strided_slice %36 {offsets = [0, 96], sizes = [32, 32], strides = [1, 1]} : vector<32x128xbf16> to vector<32x32xbf16>
    %51 = vector.shape_cast %47 : vector<32x32xbf16> to vector<1x32x32xbf16>
    %52 = vector.shape_cast %48 : vector<32x32xbf16> to vector<1x32x32xbf16>
    %53 = vector.shape_cast %49 : vector<32x32xbf16> to vector<1x32x32xbf16>
    %54 = vector.shape_cast %50 : vector<32x32xbf16> to vector<1x32x32xbf16>
    %55 = tpu.concatenate %51, %52, %53, %54 in 0 : vector<1x32x32xbf16>, vector<1x32x32xbf16>, vector<1x32x32xbf16>, vector<1x32x32xbf16> -> vector<4x32x32xbf16>
    %56 = vector.extract_strided_slice %37 {offsets = [0, 0], sizes = [32, 32], strides = [1, 1]} : vector<32x128xbf16> to vector<32x32xbf16>
    %57 = vector.extract_strided_slice %37 {offsets = [0, 32], sizes = [32, 32], strides = [1, 1]} : vector<32x128xbf16> to vector<32x32xbf16>
    %58 = vector.extract_strided_slice %37 {offsets = [0, 64], sizes = [32, 32], strides = [1, 1]} : vector<32x128xbf16> to vector<32x32xbf16>
    %59 = vector.extract_strided_slice %37 {offsets = [0, 96], sizes = [32, 32], strides = [1, 1]} : vector<32x128xbf16> to vector<32x32xbf16>
    %60 = vector.shape_cast %56 : vector<32x32xbf16> to vector<1x32x32xbf16>
    %61 = vector.shape_cast %57 : vector<32x32xbf16> to vector<1x32x32xbf16>
    %62 = vector.shape_cast %58 : vector<32x32xbf16> to vector<1x32x32xbf16>
    %63 = vector.shape_cast %59 : vector<32x32xbf16> to vector<1x32x32xbf16>
    %64 = tpu.concatenate %60, %61, %62, %63 in 0 : vector<1x32x32xbf16>, vector<1x32x32xbf16>, vector<1x32x32xbf16>, vector<1x32x32xbf16> -> vector<4x32x32xbf16>
    "tpu.trace_start"() <{level = 10 : i32, message = "hqd,hkd->hqk"}> : () -> ()
    %cst_20 = arith.constant dense<0.000000e+00> : vector<4x32x32xf32>
    %65 = tpu.matmul %46, %55, %cst_20 {dimension_numbers = #tpu.dot_dimension_numbers<[2], [2], [1], [1], [0, 0, 0, 1, 1, 1], [0], [0]>} : vector<4x32x32xbf16>, vector<4x32x32xbf16>, vector<4x32x32xf32> -> vector<4x32x32xf32>
    "tpu.trace_stop"() : () -> ()
    %cst_21 = arith.constant 0.176776692 : f32
    %66 = vector.broadcast %cst_21 : f32 to vector<4x32x32xf32>
    %67 = arith.mulf %65, %66 : vector<4x32x32xf32>
    %68 = vector.shape_cast %3 : vector<32x32xf32> to vector<1x32x32xf32>
    %69 = vector.broadcast %68 : vector<1x32x32xf32> to vector<4x32x32xf32>
    %70 = arith.addf %67, %69 : vector<4x32x32xf32>
    %cst_22 = arith.constant dense<0xFF800000> : vector<4x32xf32>
    %71 = vector.multi_reduction <maximumf>, %70, %cst_22 [2] : vector<4x32x32xf32> to vector<4x32xf32>
    %72 = vector.shape_cast %71 : vector<4x32xf32> to vector<4x32x1xf32>
    %73 = vector.broadcast %72 : vector<4x32x1xf32> to vector<4x32x32xf32>
    %74 = arith.subf %70, %73 : vector<4x32x32xf32>
    %75 = math.exp %74 : vector<4x32x32xf32>
    %cst_23 = arith.constant dense<0.000000e+00> : vector<4x32xf32>
    %76 = vector.multi_reduction <add>, %75, %cst_23 [2] : vector<4x32x32xf32> to vector<4x32xf32>
    %77 = vector.shape_cast %76 : vector<4x32xf32> to vector<4x32x1xf32>
    %78 = tpu.reciprocal %77 {approx = true} : vector<4x32x1xf32> -> vector<4x32x1xf32>
    %79 = vector.broadcast %78 : vector<4x32x1xf32> to vector<4x32x32xf32>
    %80 = arith.mulf %75, %79 : vector<4x32x32xf32>
    %81 = arith.truncf %80 : vector<4x32x32xf32> to vector<4x32x32xbf16>
    "tpu.trace_start"() <{level = 10 : i32, message = "hqk,hkd->hqd"}> : () -> ()
    %cst_24 = arith.constant dense<0.000000e+00> : vector<4x32x32xf32>
    %82 = tpu.matmul %81, %64, %cst_24 {dimension_numbers = #tpu.dot_dimension_numbers<[2], [1], [1], [2], [0, 0, 0, 1, 1, 2], [0], [0]>} : vector<4x32x32xbf16>, vector<4x32x32xbf16>, vector<4x32x32xf32> -> vector<4x32x32xf32>
    "tpu.trace_stop"() : () -> ()
    %83 = vector.extract_strided_slice %82 {offsets = [0, 0, 0], sizes = [1, 32, 32], strides = [1, 1, 1]} : vector<4x32x32xf32> to vector<1x32x32xf32>
    %84 = vector.shape_cast %83 : vector<1x32x32xf32> to vector<32x32xf32>
    %85 = vector.extract_strided_slice %82 {offsets = [1, 0, 0], sizes = [1, 32, 32], strides = [1, 1, 1]} : vector<4x32x32xf32> to vector<1x32x32xf32>
    %86 = vector.shape_cast %85 : vector<1x32x32xf32> to vector<32x32xf32>
    %87 = vector.extract_strided_slice %82 {offsets = [2, 0, 0], sizes = [1, 32, 32], strides = [1, 1, 1]} : vector<4x32x32xf32> to vector<1x32x32xf32>
    %88 = vector.shape_cast %87 : vector<1x32x32xf32> to vector<32x32xf32>
    %89 = vector.extract_strided_slice %82 {offsets = [3, 0, 0], sizes = [1, 32, 32], strides = [1, 1, 1]} : vector<4x32x32xf32> to vector<1x32x32xf32>
    %90 = vector.shape_cast %89 : vector<1x32x32xf32> to vector<32x32xf32>
    %91 = tpu.concatenate %84, %86, %88, %90 in 1 : vector<32x32xf32>, vector<32x32xf32>, vector<32x32xf32>, vector<32x32xf32> -> vector<32x128xf32>
    %92 = arith.truncf %91 : vector<32x128xf32> to vector<32x128xbf16>
    %c0_25 = arith.constant 0 : index
    %c0_26 = arith.constant 0 : index
    %c0_27 = arith.constant 0 : index
    %93 = vector.load %arg7[%c0_25, %c0_26, %c0_27] : memref<2x128x128xbf16, #tpu.memory_space<vmem>>, vector<1x128x128xbf16>
    %94 = vector.shape_cast %93 : vector<1x128x128xbf16> to vector<128x128xbf16>
    %cst_28 = arith.constant dense<0.000000e+00> : vector<32x128xf32>
    %95 = tpu.matmul %92, %94, %cst_28 {dimension_numbers = #tpu.dot_dimension_numbers<[1], [0], [0], [1], [0, 0, 1, 1], [], []>} : vector<32x128xbf16>, vector<128x128xbf16>, vector<32x128xf32> -> vector<32x128xf32>
    %c0_29 = arith.constant 0 : index
    %c0_30 = arith.constant 0 : index
    %c0_31 = arith.constant 0 : index
    %96 = vector.load %arg8[%c0_29, %c0_30, %c0_31] : memref<2x1x128xf32, #tpu.memory_space<vmem>>, vector<1x1x128xf32>
    %97 = vector.shape_cast %96 : vector<1x1x128xf32> to vector<1x128xf32>
    %98 = vector.broadcast %97 : vector<1x128xf32> to vector<32x128xf32>
    %99 = arith.addf %95, %98 : vector<32x128xf32>
    %100 = arith.addf %99, %25 : vector<32x128xf32>
    %c0_32 = arith.constant 0 : index
    %c0_33 = arith.constant 0 : index
    %c0_34 = arith.constant 0 : index
    %101 = vector.load %arg9[%c0_32, %c0_33, %c0_34] : memref<2x1x128xf32, #tpu.memory_space<vmem>>, vector<1x1x128xf32>
    %102 = vector.shape_cast %101 : vector<1x1x128xf32> to vector<1x128xf32>
    %c0_35 = arith.constant 0 : index
    %c0_36 = arith.constant 0 : index
    %c0_37 = arith.constant 0 : index
    %103 = vector.load %arg10[%c0_35, %c0_36, %c0_37] : memref<2x1x128xf32, #tpu.memory_space<vmem>>, vector<1x1x128xf32>
    %104 = vector.shape_cast %103 : vector<1x1x128xf32> to vector<1x128xf32>
    %cst_38 = arith.constant dense<0.000000e+00> : vector<32xf32>
    %105 = vector.multi_reduction <add>, %100, %cst_38 [1] : vector<32x128xf32> to vector<32xf32>
    %106 = vector.shape_cast %105 : vector<32xf32> to vector<32x1xf32>
    %cst_39 = arith.constant 1.280000e+02 : f32
    %107 = vector.broadcast %cst_39 : f32 to vector<32x1xf32>
    %108 = arith.divf %106, %107 : vector<32x1xf32>
    %109 = vector.broadcast %108 : vector<32x1xf32> to vector<32x128xf32>
    %110 = arith.subf %100, %109 : vector<32x128xf32>
    %111 = arith.mulf %110, %110 : vector<32x128xf32>
    %cst_40 = arith.constant dense<0.000000e+00> : vector<32xf32>
    %112 = vector.multi_reduction <add>, %111, %cst_40 [1] : vector<32x128xf32> to vector<32xf32>
    %113 = vector.shape_cast %112 : vector<32xf32> to vector<32x1xf32>
    %cst_41 = arith.constant 1.280000e+02 : f32
    %114 = vector.broadcast %cst_41 : f32 to vector<32x1xf32>
    %115 = arith.divf %113, %114 : vector<32x1xf32>
    %cst_42 = arith.constant 9.99999974E-6 : f32
    %116 = vector.broadcast %cst_42 : f32 to vector<32x1xf32>
    %117 = arith.addf %115, %116 : vector<32x1xf32>
    %118 = math.rsqrt %117 : vector<32x1xf32>
    %119 = vector.broadcast %118 : vector<32x1xf32> to vector<32x128xf32>
    %120 = arith.mulf %110, %119 : vector<32x128xf32>
    %121 = vector.broadcast %102 : vector<1x128xf32> to vector<32x128xf32>
    %122 = arith.mulf %120, %121 : vector<32x128xf32>
    %123 = vector.broadcast %104 : vector<1x128xf32> to vector<32x128xf32>
    %124 = arith.addf %122, %123 : vector<32x128xf32>
    %125 = arith.truncf %124 : vector<32x128xf32> to vector<32x128xbf16>
    %c0_43 = arith.constant 0 : index
    %c0_44 = arith.constant 0 : index
    %c0_45 = arith.constant 0 : index
    %126 = vector.load %arg11[%c0_43, %c0_44, %c0_45] : memref<2x128x512xbf16, #tpu.memory_space<vmem>>, vector<1x128x512xbf16>
    %127 = vector.shape_cast %126 : vector<1x128x512xbf16> to vector<128x512xbf16>
    %cst_46 = arith.constant dense<0.000000e+00> : vector<32x512xf32>
    %128 = tpu.matmul %125, %127, %cst_46 {dimension_numbers = #tpu.dot_dimension_numbers<[1], [0], [0], [1], [0, 0, 1, 1], [], []>} : vector<32x128xbf16>, vector<128x512xbf16>, vector<32x512xf32> -> vector<32x512xf32>
    %c0_47 = arith.constant 0 : index
    %c0_48 = arith.constant 0 : index
    %c0_49 = arith.constant 0 : index
    %129 = vector.load %arg12[%c0_47, %c0_48, %c0_49] : memref<2x1x512xf32, #tpu.memory_space<vmem>>, vector<1x1x512xf32>
    %130 = vector.shape_cast %129 : vector<1x1x512xf32> to vector<1x512xf32>
    %131 = vector.broadcast %130 : vector<1x512xf32> to vector<32x512xf32>
    %132 = arith.addf %128, %131 : vector<32x512xf32>
    %cst_50 = arith.constant 5.000000e-01 : f32
    %133 = vector.broadcast %cst_50 : f32 to vector<32x512xf32>
    %134 = arith.mulf %133, %132 : vector<32x512xf32>
    %cst_51 = arith.constant 4.471500e-02 : f32
    %135 = vector.broadcast %cst_51 : f32 to vector<32x512xf32>
    %136 = arith.mulf %135, %132 : vector<32x512xf32>
    %137 = arith.mulf %136, %132 : vector<32x512xf32>
    %138 = arith.mulf %137, %132 : vector<32x512xf32>
    %139 = arith.addf %132, %138 : vector<32x512xf32>
    %cst_52 = arith.constant 0.797884583 : f32
    %140 = vector.broadcast %cst_52 : f32 to vector<32x512xf32>
    %141 = arith.mulf %140, %139 : vector<32x512xf32>
    %142 = math.tanh %141 : vector<32x512xf32>
    %cst_53 = arith.constant 1.000000e+00 : f32
    %143 = vector.broadcast %cst_53 : f32 to vector<32x512xf32>
    %144 = arith.addf %143, %142 : vector<32x512xf32>
    %145 = arith.mulf %134, %144 : vector<32x512xf32>
    %146 = arith.truncf %145 : vector<32x512xf32> to vector<32x512xbf16>
    %c0_54 = arith.constant 0 : index
    %c0_55 = arith.constant 0 : index
    %c0_56 = arith.constant 0 : index
    %147 = vector.load %arg13[%c0_54, %c0_55, %c0_56] : memref<2x512x128xbf16, #tpu.memory_space<vmem>>, vector<1x512x128xbf16>
    %148 = vector.shape_cast %147 : vector<1x512x128xbf16> to vector<512x128xbf16>
    %cst_57 = arith.constant dense<0.000000e+00> : vector<32x128xf32>
    %149 = tpu.matmul %146, %148, %cst_57 {dimension_numbers = #tpu.dot_dimension_numbers<[1], [0], [0], [1], [0, 0, 1, 1], [], []>} : vector<32x512xbf16>, vector<512x128xbf16>, vector<32x128xf32> -> vector<32x128xf32>
    %c0_58 = arith.constant 0 : index
    %c0_59 = arith.constant 0 : index
    %c0_60 = arith.constant 0 : index
    %150 = vector.load %arg14[%c0_58, %c0_59, %c0_60] : memref<2x1x128xf32, #tpu.memory_space<vmem>>, vector<1x1x128xf32>
    %151 = vector.shape_cast %150 : vector<1x1x128xf32> to vector<1x128xf32>
    %152 = vector.broadcast %151 : vector<1x128xf32> to vector<32x128xf32>
    %153 = arith.addf %149, %152 : vector<32x128xf32>
    %154 = arith.addf %153, %124 : vector<32x128xf32>
    %c0_61 = arith.constant 0 : index
    %c0_62 = arith.constant 0 : index
    %c0_63 = arith.constant 0 : index
    %155 = vector.load %arg15[%c0_61, %c0_62, %c0_63] : memref<2x1x128xf32, #tpu.memory_space<vmem>>, vector<1x1x128xf32>
    %156 = vector.shape_cast %155 : vector<1x1x128xf32> to vector<1x128xf32>
    %c0_64 = arith.constant 0 : index
    %c0_65 = arith.constant 0 : index
    %c0_66 = arith.constant 0 : index
    %157 = vector.load %arg16[%c0_64, %c0_65, %c0_66] : memref<2x1x128xf32, #tpu.memory_space<vmem>>, vector<1x1x128xf32>
    %158 = vector.shape_cast %157 : vector<1x1x128xf32> to vector<1x128xf32>
    %cst_67 = arith.constant dense<0.000000e+00> : vector<32xf32>
    %159 = vector.multi_reduction <add>, %154, %cst_67 [1] : vector<32x128xf32> to vector<32xf32>
    %160 = vector.shape_cast %159 : vector<32xf32> to vector<32x1xf32>
    %cst_68 = arith.constant 1.280000e+02 : f32
    %161 = vector.broadcast %cst_68 : f32 to vector<32x1xf32>
    %162 = arith.divf %160, %161 : vector<32x1xf32>
    %163 = vector.broadcast %162 : vector<32x1xf32> to vector<32x128xf32>
    %164 = arith.subf %154, %163 : vector<32x128xf32>
    %165 = arith.mulf %164, %164 : vector<32x128xf32>
    %cst_69 = arith.constant dense<0.000000e+00> : vector<32xf32>
    %166 = vector.multi_reduction <add>, %165, %cst_69 [1] : vector<32x128xf32> to vector<32xf32>
    %167 = vector.shape_cast %166 : vector<32xf32> to vector<32x1xf32>
    %cst_70 = arith.constant 1.280000e+02 : f32
    %168 = vector.broadcast %cst_70 : f32 to vector<32x1xf32>
    %169 = arith.divf %167, %168 : vector<32x1xf32>
    %cst_71 = arith.constant 9.99999974E-6 : f32
    %170 = vector.broadcast %cst_71 : f32 to vector<32x1xf32>
    %171 = arith.addf %169, %170 : vector<32x1xf32>
    %172 = math.rsqrt %171 : vector<32x1xf32>
    %173 = vector.broadcast %172 : vector<32x1xf32> to vector<32x128xf32>
    %174 = arith.mulf %164, %173 : vector<32x128xf32>
    %175 = vector.broadcast %156 : vector<1x128xf32> to vector<32x128xf32>
    %176 = arith.mulf %174, %175 : vector<32x128xf32>
    %177 = vector.broadcast %158 : vector<1x128xf32> to vector<32x128xf32>
    %178 = arith.addf %176, %177 : vector<32x128xf32>
    %179 = arith.truncf %178 : vector<32x128xf32> to vector<32x128xbf16>
    %c1 = arith.constant 1 : index
    %c0_72 = arith.constant 0 : index
    %c0_73 = arith.constant 0 : index
    %180 = vector.load %arg5[%c1, %c0_72, %c0_73] : memref<2x128x384xbf16, #tpu.memory_space<vmem>>, vector<1x128x384xbf16>
    %181 = vector.shape_cast %180 : vector<1x128x384xbf16> to vector<128x384xbf16>
    %cst_74 = arith.constant dense<0.000000e+00> : vector<32x384xf32>
    %182 = tpu.matmul %179, %181, %cst_74 {dimension_numbers = #tpu.dot_dimension_numbers<[1], [0], [0], [1], [0, 0, 1, 1], [], []>} : vector<32x128xbf16>, vector<128x384xbf16>, vector<32x384xf32> -> vector<32x384xf32>
    %c1_75 = arith.constant 1 : index
    %c0_76 = arith.constant 0 : index
    %c0_77 = arith.constant 0 : index
    %183 = vector.load %arg6[%c1_75, %c0_76, %c0_77] : memref<2x1x384xf32, #tpu.memory_space<vmem>>, vector<1x1x384xf32>
    %184 = vector.shape_cast %183 : vector<1x1x384xf32> to vector<1x384xf32>
    %185 = vector.broadcast %184 : vector<1x384xf32> to vector<32x384xf32>
    %186 = arith.addf %182, %185 : vector<32x384xf32>
    %187 = arith.truncf %186 : vector<32x384xf32> to vector<32x384xbf16>
    %188 = vector.extract_strided_slice %187 {offsets = [0, 0], sizes = [32, 128], strides = [1, 1]} : vector<32x384xbf16> to vector<32x128xbf16>
    %189 = vector.extract_strided_slice %187 {offsets = [0, 128], sizes = [32, 128], strides = [1, 1]} : vector<32x384xbf16> to vector<32x128xbf16>
    %190 = vector.extract_strided_slice %187 {offsets = [0, 256], sizes = [32, 128], strides = [1, 1]} : vector<32x384xbf16> to vector<32x128xbf16>
    %191 = vector.extract_strided_slice %188 {offsets = [0, 0], sizes = [32, 32], strides = [1, 1]} : vector<32x128xbf16> to vector<32x32xbf16>
    %192 = vector.extract_strided_slice %188 {offsets = [0, 32], sizes = [32, 32], strides = [1, 1]} : vector<32x128xbf16> to vector<32x32xbf16>
    %193 = vector.extract_strided_slice %188 {offsets = [0, 64], sizes = [32, 32], strides = [1, 1]} : vector<32x128xbf16> to vector<32x32xbf16>
    %194 = vector.extract_strided_slice %188 {offsets = [0, 96], sizes = [32, 32], strides = [1, 1]} : vector<32x128xbf16> to vector<32x32xbf16>
    %195 = vector.shape_cast %191 : vector<32x32xbf16> to vector<1x32x32xbf16>
    %196 = vector.shape_cast %192 : vector<32x32xbf16> to vector<1x32x32xbf16>
    %197 = vector.shape_cast %193 : vector<32x32xbf16> to vector<1x32x32xbf16>
    %198 = vector.shape_cast %194 : vector<32x32xbf16> to vector<1x32x32xbf16>
    %199 = tpu.concatenate %195, %196, %197, %198 in 0 : vector<1x32x32xbf16>, vector<1x32x32xbf16>, vector<1x32x32xbf16>, vector<1x32x32xbf16> -> vector<4x32x32xbf16>
    %200 = vector.extract_strided_slice %189 {offsets = [0, 0], sizes = [32, 32], strides = [1, 1]} : vector<32x128xbf16> to vector<32x32xbf16>
    %201 = vector.extract_strided_slice %189 {offsets = [0, 32], sizes = [32, 32], strides = [1, 1]} : vector<32x128xbf16> to vector<32x32xbf16>
    %202 = vector.extract_strided_slice %189 {offsets = [0, 64], sizes = [32, 32], strides = [1, 1]} : vector<32x128xbf16> to vector<32x32xbf16>
    %203 = vector.extract_strided_slice %189 {offsets = [0, 96], sizes = [32, 32], strides = [1, 1]} : vector<32x128xbf16> to vector<32x32xbf16>
    %204 = vector.shape_cast %200 : vector<32x32xbf16> to vector<1x32x32xbf16>
    %205 = vector.shape_cast %201 : vector<32x32xbf16> to vector<1x32x32xbf16>
    %206 = vector.shape_cast %202 : vector<32x32xbf16> to vector<1x32x32xbf16>
    %207 = vector.shape_cast %203 : vector<32x32xbf16> to vector<1x32x32xbf16>
    %208 = tpu.concatenate %204, %205, %206, %207 in 0 : vector<1x32x32xbf16>, vector<1x32x32xbf16>, vector<1x32x32xbf16>, vector<1x32x32xbf16> -> vector<4x32x32xbf16>
    %209 = vector.extract_strided_slice %190 {offsets = [0, 0], sizes = [32, 32], strides = [1, 1]} : vector<32x128xbf16> to vector<32x32xbf16>
    %210 = vector.extract_strided_slice %190 {offsets = [0, 32], sizes = [32, 32], strides = [1, 1]} : vector<32x128xbf16> to vector<32x32xbf16>
    %211 = vector.extract_strided_slice %190 {offsets = [0, 64], sizes = [32, 32], strides = [1, 1]} : vector<32x128xbf16> to vector<32x32xbf16>
    %212 = vector.extract_strided_slice %190 {offsets = [0, 96], sizes = [32, 32], strides = [1, 1]} : vector<32x128xbf16> to vector<32x32xbf16>
    %213 = vector.shape_cast %209 : vector<32x32xbf16> to vector<1x32x32xbf16>
    %214 = vector.shape_cast %210 : vector<32x32xbf16> to vector<1x32x32xbf16>
    %215 = vector.shape_cast %211 : vector<32x32xbf16> to vector<1x32x32xbf16>
    %216 = vector.shape_cast %212 : vector<32x32xbf16> to vector<1x32x32xbf16>
    %217 = tpu.concatenate %213, %214, %215, %216 in 0 : vector<1x32x32xbf16>, vector<1x32x32xbf16>, vector<1x32x32xbf16>, vector<1x32x32xbf16> -> vector<4x32x32xbf16>
    "tpu.trace_start"() <{level = 10 : i32, message = "hqd,hkd->hqk"}> : () -> ()
    %cst_78 = arith.constant dense<0.000000e+00> : vector<4x32x32xf32>
    %218 = tpu.matmul %199, %208, %cst_78 {dimension_numbers = #tpu.dot_dimension_numbers<[2], [2], [1], [1], [0, 0, 0, 1, 1, 1], [0], [0]>} : vector<4x32x32xbf16>, vector<4x32x32xbf16>, vector<4x32x32xf32> -> vector<4x32x32xf32>
    "tpu.trace_stop"() : () -> ()
    %cst_79 = arith.constant 0.176776692 : f32
    %219 = vector.broadcast %cst_79 : f32 to vector<4x32x32xf32>
    %220 = arith.mulf %218, %219 : vector<4x32x32xf32>
    %221 = vector.shape_cast %3 : vector<32x32xf32> to vector<1x32x32xf32>
    %222 = vector.broadcast %221 : vector<1x32x32xf32> to vector<4x32x32xf32>
    %223 = arith.addf %220, %222 : vector<4x32x32xf32>
    %cst_80 = arith.constant dense<0xFF800000> : vector<4x32xf32>
    %224 = vector.multi_reduction <maximumf>, %223, %cst_80 [2] : vector<4x32x32xf32> to vector<4x32xf32>
    %225 = vector.shape_cast %224 : vector<4x32xf32> to vector<4x32x1xf32>
    %226 = vector.broadcast %225 : vector<4x32x1xf32> to vector<4x32x32xf32>
    %227 = arith.subf %223, %226 : vector<4x32x32xf32>
    %228 = math.exp %227 : vector<4x32x32xf32>
    %cst_81 = arith.constant dense<0.000000e+00> : vector<4x32xf32>
    %229 = vector.multi_reduction <add>, %228, %cst_81 [2] : vector<4x32x32xf32> to vector<4x32xf32>
    %230 = vector.shape_cast %229 : vector<4x32xf32> to vector<4x32x1xf32>
    %231 = tpu.reciprocal %230 {approx = true} : vector<4x32x1xf32> -> vector<4x32x1xf32>
    %232 = vector.broadcast %231 : vector<4x32x1xf32> to vector<4x32x32xf32>
    %233 = arith.mulf %228, %232 : vector<4x32x32xf32>
    %234 = arith.truncf %233 : vector<4x32x32xf32> to vector<4x32x32xbf16>
    "tpu.trace_start"() <{level = 10 : i32, message = "hqk,hkd->hqd"}> : () -> ()
    %cst_82 = arith.constant dense<0.000000e+00> : vector<4x32x32xf32>
    %235 = tpu.matmul %234, %217, %cst_82 {dimension_numbers = #tpu.dot_dimension_numbers<[2], [1], [1], [2], [0, 0, 0, 1, 1, 2], [0], [0]>} : vector<4x32x32xbf16>, vector<4x32x32xbf16>, vector<4x32x32xf32> -> vector<4x32x32xf32>
    "tpu.trace_stop"() : () -> ()
    %236 = vector.extract_strided_slice %235 {offsets = [0, 0, 0], sizes = [1, 32, 32], strides = [1, 1, 1]} : vector<4x32x32xf32> to vector<1x32x32xf32>
    %237 = vector.shape_cast %236 : vector<1x32x32xf32> to vector<32x32xf32>
    %238 = vector.extract_strided_slice %235 {offsets = [1, 0, 0], sizes = [1, 32, 32], strides = [1, 1, 1]} : vector<4x32x32xf32> to vector<1x32x32xf32>
    %239 = vector.shape_cast %238 : vector<1x32x32xf32> to vector<32x32xf32>
    %240 = vector.extract_strided_slice %235 {offsets = [2, 0, 0], sizes = [1, 32, 32], strides = [1, 1, 1]} : vector<4x32x32xf32> to vector<1x32x32xf32>
    %241 = vector.shape_cast %240 : vector<1x32x32xf32> to vector<32x32xf32>
    %242 = vector.extract_strided_slice %235 {offsets = [3, 0, 0], sizes = [1, 32, 32], strides = [1, 1, 1]} : vector<4x32x32xf32> to vector<1x32x32xf32>
    %243 = vector.shape_cast %242 : vector<1x32x32xf32> to vector<32x32xf32>
    %244 = tpu.concatenate %237, %239, %241, %243 in 1 : vector<32x32xf32>, vector<32x32xf32>, vector<32x32xf32>, vector<32x32xf32> -> vector<32x128xf32>
    %245 = arith.truncf %244 : vector<32x128xf32> to vector<32x128xbf16>
    %c1_83 = arith.constant 1 : index
    %c0_84 = arith.constant 0 : index
    %c0_85 = arith.constant 0 : index
    %246 = vector.load %arg7[%c1_83, %c0_84, %c0_85] : memref<2x128x128xbf16, #tpu.memory_space<vmem>>, vector<1x128x128xbf16>
    %247 = vector.shape_cast %246 : vector<1x128x128xbf16> to vector<128x128xbf16>
    %cst_86 = arith.constant dense<0.000000e+00> : vector<32x128xf32>
    %248 = tpu.matmul %245, %247, %cst_86 {dimension_numbers = #tpu.dot_dimension_numbers<[1], [0], [0], [1], [0, 0, 1, 1], [], []>} : vector<32x128xbf16>, vector<128x128xbf16>, vector<32x128xf32> -> vector<32x128xf32>
    %c1_87 = arith.constant 1 : index
    %c0_88 = arith.constant 0 : index
    %c0_89 = arith.constant 0 : index
    %249 = vector.load %arg8[%c1_87, %c0_88, %c0_89] : memref<2x1x128xf32, #tpu.memory_space<vmem>>, vector<1x1x128xf32>
    %250 = vector.shape_cast %249 : vector<1x1x128xf32> to vector<1x128xf32>
    %251 = vector.broadcast %250 : vector<1x128xf32> to vector<32x128xf32>
    %252 = arith.addf %248, %251 : vector<32x128xf32>
    %253 = arith.addf %252, %178 : vector<32x128xf32>
    %c1_90 = arith.constant 1 : index
    %c0_91 = arith.constant 0 : index
    %c0_92 = arith.constant 0 : index
    %254 = vector.load %arg9[%c1_90, %c0_91, %c0_92] : memref<2x1x128xf32, #tpu.memory_space<vmem>>, vector<1x1x128xf32>
    %255 = vector.shape_cast %254 : vector<1x1x128xf32> to vector<1x128xf32>
    %c1_93 = arith.constant 1 : index
    %c0_94 = arith.constant 0 : index
    %c0_95 = arith.constant 0 : index
    %256 = vector.load %arg10[%c1_93, %c0_94, %c0_95] : memref<2x1x128xf32, #tpu.memory_space<vmem>>, vector<1x1x128xf32>
    %257 = vector.shape_cast %256 : vector<1x1x128xf32> to vector<1x128xf32>
    %cst_96 = arith.constant dense<0.000000e+00> : vector<32xf32>
    %258 = vector.multi_reduction <add>, %253, %cst_96 [1] : vector<32x128xf32> to vector<32xf32>
    %259 = vector.shape_cast %258 : vector<32xf32> to vector<32x1xf32>
    %cst_97 = arith.constant 1.280000e+02 : f32
    %260 = vector.broadcast %cst_97 : f32 to vector<32x1xf32>
    %261 = arith.divf %259, %260 : vector<32x1xf32>
    %262 = vector.broadcast %261 : vector<32x1xf32> to vector<32x128xf32>
    %263 = arith.subf %253, %262 : vector<32x128xf32>
    %264 = arith.mulf %263, %263 : vector<32x128xf32>
    %cst_98 = arith.constant dense<0.000000e+00> : vector<32xf32>
    %265 = vector.multi_reduction <add>, %264, %cst_98 [1] : vector<32x128xf32> to vector<32xf32>
    %266 = vector.shape_cast %265 : vector<32xf32> to vector<32x1xf32>
    %cst_99 = arith.constant 1.280000e+02 : f32
    %267 = vector.broadcast %cst_99 : f32 to vector<32x1xf32>
    %268 = arith.divf %266, %267 : vector<32x1xf32>
    %cst_100 = arith.constant 9.99999974E-6 : f32
    %269 = vector.broadcast %cst_100 : f32 to vector<32x1xf32>
    %270 = arith.addf %268, %269 : vector<32x1xf32>
    %271 = math.rsqrt %270 : vector<32x1xf32>
    %272 = vector.broadcast %271 : vector<32x1xf32> to vector<32x128xf32>
    %273 = arith.mulf %263, %272 : vector<32x128xf32>
    %274 = vector.broadcast %255 : vector<1x128xf32> to vector<32x128xf32>
    %275 = arith.mulf %273, %274 : vector<32x128xf32>
    %276 = vector.broadcast %257 : vector<1x128xf32> to vector<32x128xf32>
    %277 = arith.addf %275, %276 : vector<32x128xf32>
    %278 = arith.truncf %277 : vector<32x128xf32> to vector<32x128xbf16>
    %c1_101 = arith.constant 1 : index
    %c0_102 = arith.constant 0 : index
    %c0_103 = arith.constant 0 : index
    %279 = vector.load %arg11[%c1_101, %c0_102, %c0_103] : memref<2x128x512xbf16, #tpu.memory_space<vmem>>, vector<1x128x512xbf16>
    %280 = vector.shape_cast %279 : vector<1x128x512xbf16> to vector<128x512xbf16>
    %cst_104 = arith.constant dense<0.000000e+00> : vector<32x512xf32>
    %281 = tpu.matmul %278, %280, %cst_104 {dimension_numbers = #tpu.dot_dimension_numbers<[1], [0], [0], [1], [0, 0, 1, 1], [], []>} : vector<32x128xbf16>, vector<128x512xbf16>, vector<32x512xf32> -> vector<32x512xf32>
    %c1_105 = arith.constant 1 : index
    %c0_106 = arith.constant 0 : index
    %c0_107 = arith.constant 0 : index
    %282 = vector.load %arg12[%c1_105, %c0_106, %c0_107] : memref<2x1x512xf32, #tpu.memory_space<vmem>>, vector<1x1x512xf32>
    %283 = vector.shape_cast %282 : vector<1x1x512xf32> to vector<1x512xf32>
    %284 = vector.broadcast %283 : vector<1x512xf32> to vector<32x512xf32>
    %285 = arith.addf %281, %284 : vector<32x512xf32>
    %cst_108 = arith.constant 5.000000e-01 : f32
    %286 = vector.broadcast %cst_108 : f32 to vector<32x512xf32>
    %287 = arith.mulf %286, %285 : vector<32x512xf32>
    %cst_109 = arith.constant 4.471500e-02 : f32
    %288 = vector.broadcast %cst_109 : f32 to vector<32x512xf32>
    %289 = arith.mulf %288, %285 : vector<32x512xf32>
    %290 = arith.mulf %289, %285 : vector<32x512xf32>
    %291 = arith.mulf %290, %285 : vector<32x512xf32>
    %292 = arith.addf %285, %291 : vector<32x512xf32>
    %cst_110 = arith.constant 0.797884583 : f32
    %293 = vector.broadcast %cst_110 : f32 to vector<32x512xf32>
    %294 = arith.mulf %293, %292 : vector<32x512xf32>
    %295 = math.tanh %294 : vector<32x512xf32>
    %cst_111 = arith.constant 1.000000e+00 : f32
    %296 = vector.broadcast %cst_111 : f32 to vector<32x512xf32>
    %297 = arith.addf %296, %295 : vector<32x512xf32>
    %298 = arith.mulf %287, %297 : vector<32x512xf32>
    %299 = arith.truncf %298 : vector<32x512xf32> to vector<32x512xbf16>
    %c1_112 = arith.constant 1 : index
    %c0_113 = arith.constant 0 : index
    %c0_114 = arith.constant 0 : index
    %300 = vector.load %arg13[%c1_112, %c0_113, %c0_114] : memref<2x512x128xbf16, #tpu.memory_space<vmem>>, vector<1x512x128xbf16>
    %301 = vector.shape_cast %300 : vector<1x512x128xbf16> to vector<512x128xbf16>
    %cst_115 = arith.constant dense<0.000000e+00> : vector<32x128xf32>
    %302 = tpu.matmul %299, %301, %cst_115 {dimension_numbers = #tpu.dot_dimension_numbers<[1], [0], [0], [1], [0, 0, 1, 1], [], []>} : vector<32x512xbf16>, vector<512x128xbf16>, vector<32x128xf32> -> vector<32x128xf32>
    %c1_116 = arith.constant 1 : index
    %c0_117 = arith.constant 0 : index
    %c0_118 = arith.constant 0 : index
    %303 = vector.load %arg14[%c1_116, %c0_117, %c0_118] : memref<2x1x128xf32, #tpu.memory_space<vmem>>, vector<1x1x128xf32>
    %304 = vector.shape_cast %303 : vector<1x1x128xf32> to vector<1x128xf32>
    %305 = vector.broadcast %304 : vector<1x128xf32> to vector<32x128xf32>
    %306 = arith.addf %302, %305 : vector<32x128xf32>
    %307 = arith.addf %306, %277 : vector<32x128xf32>
    %c1_119 = arith.constant 1 : index
    %c0_120 = arith.constant 0 : index
    %c0_121 = arith.constant 0 : index
    %308 = vector.load %arg15[%c1_119, %c0_120, %c0_121] : memref<2x1x128xf32, #tpu.memory_space<vmem>>, vector<1x1x128xf32>
    %309 = vector.shape_cast %308 : vector<1x1x128xf32> to vector<1x128xf32>
    %c1_122 = arith.constant 1 : index
    %c0_123 = arith.constant 0 : index
    %c0_124 = arith.constant 0 : index
    %310 = vector.load %arg16[%c1_122, %c0_123, %c0_124] : memref<2x1x128xf32, #tpu.memory_space<vmem>>, vector<1x1x128xf32>
    %311 = vector.shape_cast %310 : vector<1x1x128xf32> to vector<1x128xf32>
    %cst_125 = arith.constant dense<0.000000e+00> : vector<32xf32>
    %312 = vector.multi_reduction <add>, %307, %cst_125 [1] : vector<32x128xf32> to vector<32xf32>
    %313 = vector.shape_cast %312 : vector<32xf32> to vector<32x1xf32>
    %cst_126 = arith.constant 1.280000e+02 : f32
    %314 = vector.broadcast %cst_126 : f32 to vector<32x1xf32>
    %315 = arith.divf %313, %314 : vector<32x1xf32>
    %316 = vector.broadcast %315 : vector<32x1xf32> to vector<32x128xf32>
    %317 = arith.subf %307, %316 : vector<32x128xf32>
    %318 = arith.mulf %317, %317 : vector<32x128xf32>
    %cst_127 = arith.constant dense<0.000000e+00> : vector<32xf32>
    %319 = vector.multi_reduction <add>, %318, %cst_127 [1] : vector<32x128xf32> to vector<32xf32>
    %320 = vector.shape_cast %319 : vector<32xf32> to vector<32x1xf32>
    %cst_128 = arith.constant 1.280000e+02 : f32
    %321 = vector.broadcast %cst_128 : f32 to vector<32x1xf32>
    %322 = arith.divf %320, %321 : vector<32x1xf32>
    %cst_129 = arith.constant 9.99999974E-6 : f32
    %323 = vector.broadcast %cst_129 : f32 to vector<32x1xf32>
    %324 = arith.addf %322, %323 : vector<32x1xf32>
    %325 = math.rsqrt %324 : vector<32x1xf32>
    %326 = vector.broadcast %325 : vector<32x1xf32> to vector<32x128xf32>
    %327 = arith.mulf %317, %326 : vector<32x128xf32>
    %328 = vector.broadcast %309 : vector<1x128xf32> to vector<32x128xf32>
    %329 = arith.mulf %327, %328 : vector<32x128xf32>
    %330 = vector.broadcast %311 : vector<1x128xf32> to vector<32x128xf32>
    %331 = arith.addf %329, %330 : vector<32x128xf32>
    %332 = arith.truncf %331 : vector<32x128xf32> to vector<32x128xbf16>
    %333 = vector.extract_strided_slice %332 {offsets = [0, 0], sizes = [1, 128], strides = [1, 1]} : vector<32x128xbf16> to vector<1x128xbf16>
    %334 = vector.extract_strided_slice %332 {offsets = [16, 0], sizes = [1, 128], strides = [1, 1]} : vector<32x128xbf16> to vector<1x128xbf16>
    %335 = tpu.concatenate %333, %334 in 0 : vector<1x128xbf16>, vector<1x128xbf16> -> vector<2x128xbf16>
    %c0_130 = arith.constant 0 : index
    %c0_131 = arith.constant 0 : index
    %336 = vector.load %arg17[%c0_130, %c0_131] : memref<128x128xbf16, #tpu.memory_space<vmem>>, vector<128x128xbf16>
    %cst_132 = arith.constant dense<0.000000e+00> : vector<2x128xf32>
    %337 = tpu.matmul %335, %336, %cst_132 {dimension_numbers = #tpu.dot_dimension_numbers<[1], [0], [0], [1], [0, 0, 1, 1], [], []>} : vector<2x128xbf16>, vector<128x128xbf16>, vector<2x128xf32> -> vector<2x128xf32>
    %c0_133 = arith.constant 0 : index
    %c0_134 = arith.constant 0 : index
    %338 = vector.load %arg18[%c0_133, %c0_134] : memref<1x128xf32, #tpu.memory_space<vmem>>, vector<1x128xf32>
    %339 = vector.broadcast %338 : vector<1x128xf32> to vector<2x128xf32>
    %340 = arith.addf %337, %339 : vector<2x128xf32>
    %cst_135 = arith.constant 0.000000e+00 : f32
    %341 = vector.broadcast %cst_135 : f32 to vector<2x128xf32>
    %342 = arith.maximumf %340, %341 : vector<2x128xf32>
    %343 = arith.truncf %342 : vector<2x128xf32> to vector<2x128xbf16>
    %c0_136 = arith.constant 0 : index
    %c0_137 = arith.constant 0 : index
    %344 = vector.load %arg19[%c0_136, %c0_137] : memref<128x128xbf16, #tpu.memory_space<vmem>>, vector<128x128xbf16>
    %cst_138 = arith.constant dense<0.000000e+00> : vector<2x128xf32>
    %345 = tpu.matmul %343, %344, %cst_138 {dimension_numbers = #tpu.dot_dimension_numbers<[1], [0], [0], [1], [0, 0, 1, 1], [], []>} : vector<2x128xbf16>, vector<128x128xbf16>, vector<2x128xf32> -> vector<2x128xf32>
    %c0_139 = arith.constant 0 : index
    %c0_140 = arith.constant 0 : index
    %346 = vector.load %arg20[%c0_139, %c0_140] : memref<1x128xf32, #tpu.memory_space<vmem>>, vector<1x128xf32>
    %347 = vector.broadcast %346 : vector<1x128xf32> to vector<2x128xf32>
    %348 = arith.addf %345, %347 : vector<2x128xf32>
    %c0_141 = arith.constant 0 : index
    %c0_142 = arith.constant 0 : index
    %c0_143 = arith.constant 0 : index
    %349 = vector.load %arg21[%c0_141, %c0_142, %c0_143] : memref<1x2x128xf32, #tpu.memory_space<vmem>>, vector<1x2x128xf32>
    %350 = vector.shape_cast %349 : vector<1x2x128xf32> to vector<2x128xf32>
    %351 = vector.shape_cast %348 : vector<2x128xf32> to vector<1x2x128xf32>
    tpu.vector_store %arg21[%c0_141, %c0_142, %c0_143], %351 {strides = array<i32>} : memref<1x2x128xf32, #tpu.memory_space<vmem>>, vector<1x2x128xf32>,
    return
  }
  func.func @transform_0(%arg0: i32) -> (i32, i32, i32) {
    %c0_i32 = arith.constant 0 : i32
    %c0_i32_0 = arith.constant 0 : i32
    %c0_i32_1 = arith.constant 0 : i32
    return %arg0, %c0_i32, %c0_i32_0 : i32, i32, i32
  }
  func.func @transform_1(%arg0: i32) -> (i32, i32, i32) {
    %c0_i32 = arith.constant 0 : i32
    %c0_i32_0 = arith.constant 0 : i32
    %c0_i32_1 = arith.constant 0 : i32
    return %arg0, %c0_i32, %c0_i32_0 : i32, i32, i32
  }
  func.func @transform_2(%arg0: i32) -> (i32, i32) {
    %c0_i32 = arith.constant 0 : i32
    %c0_i32_0 = arith.constant 0 : i32
    %c0_i32_1 = arith.constant 0 : i32
    return %c0_i32, %c0_i32_0 : i32, i32
  }
  func.func @transform_3(%arg0: i32) -> (i32, i32) {
    %c0_i32 = arith.constant 0 : i32
    %c0_i32_0 = arith.constant 0 : i32
    %c0_i32_1 = arith.constant 0 : i32
    return %c0_i32, %c0_i32_0 : i32, i32
  }
  func.func @transform_4(%arg0: i32) -> (i32, i32, i32) {
    %c0_i32 = arith.constant 0 : i32
    %c0_i32_0 = arith.constant 0 : i32
    %c0_i32_1 = arith.constant 0 : i32
    %c0_i32_2 = arith.constant 0 : i32
    return %c0_i32, %c0_i32_0, %c0_i32_1 : i32, i32, i32
  }
  func.func @transform_5(%arg0: i32) -> (i32, i32, i32) {
    %c0_i32 = arith.constant 0 : i32
    %c0_i32_0 = arith.constant 0 : i32
    %c0_i32_1 = arith.constant 0 : i32
    %c0_i32_2 = arith.constant 0 : i32
    return %c0_i32, %c0_i32_0, %c0_i32_1 : i32, i32, i32
  }
  func.func @transform_6(%arg0: i32) -> (i32, i32, i32) {
    %c0_i32 = arith.constant 0 : i32
    %c0_i32_0 = arith.constant 0 : i32
    %c0_i32_1 = arith.constant 0 : i32
    %c0_i32_2 = arith.constant 0 : i32
    return %c0_i32, %c0_i32_0, %c0_i32_1 : i32, i32, i32
  }
  func.func @transform_7(%arg0: i32) -> (i32, i32, i32) {
    %c0_i32 = arith.constant 0 : i32
    %c0_i32_0 = arith.constant 0 : i32
    %c0_i32_1 = arith.constant 0 : i32
    %c0_i32_2 = arith.constant 0 : i32
    return %c0_i32, %c0_i32_0, %c0_i32_1 : i32, i32, i32
  }
  func.func @transform_8(%arg0: i32) -> (i32, i32, i32) {
    %c0_i32 = arith.constant 0 : i32
    %c0_i32_0 = arith.constant 0 : i32
    %c0_i32_1 = arith.constant 0 : i32
    %c0_i32_2 = arith.constant 0 : i32
    return %c0_i32, %c0_i32_0, %c0_i32_1 : i32, i32, i32
  }
  func.func @transform_9(%arg0: i32) -> (i32, i32, i32) {
    %c0_i32 = arith.constant 0 : i32
    %c0_i32_0 = arith.constant 0 : i32
    %c0_i32_1 = arith.constant 0 : i32
    %c0_i32_2 = arith.constant 0 : i32
    return %c0_i32, %c0_i32_0, %c0_i32_1 : i32, i32, i32
  }
  func.func @transform_10(%arg0: i32) -> (i32, i32, i32) {
    %c0_i32 = arith.constant 0 : i32
    %c0_i32_0 = arith.constant 0 : i32
    %c0_i32_1 = arith.constant 0 : i32
    %c0_i32_2 = arith.constant 0 : i32
    return %c0_i32, %c0_i32_0, %c0_i32_1 : i32, i32, i32
  }
  func.func @transform_11(%arg0: i32) -> (i32, i32, i32) {
    %c0_i32 = arith.constant 0 : i32
    %c0_i32_0 = arith.constant 0 : i32
    %c0_i32_1 = arith.constant 0 : i32
    %c0_i32_2 = arith.constant 0 : i32
    return %c0_i32, %c0_i32_0, %c0_i32_1 : i32, i32, i32
  }
  func.func @transform_12(%arg0: i32) -> (i32, i32, i32) {
    %c0_i32 = arith.constant 0 : i32
    %c0_i32_0 = arith.constant 0 : i32
    %c0_i32_1 = arith.constant 0 : i32
    %c0_i32_2 = arith.constant 0 : i32
    return %c0_i32, %c0_i32_0, %c0_i32_1 : i32, i32, i32
  }
  func.func @transform_13(%arg0: i32) -> (i32, i32, i32) {
    %c0_i32 = arith.constant 0 : i32
    %c0_i32_0 = arith.constant 0 : i32
    %c0_i32_1 = arith.constant 0 : i32
    %c0_i32_2 = arith.constant 0 : i32
    return %c0_i32, %c0_i32_0, %c0_i32_1 : i32, i32, i32
  }
  func.func @transform_14(%arg0: i32) -> (i32, i32, i32) {
    %c0_i32 = arith.constant 0 : i32
    %c0_i32_0 = arith.constant 0 : i32
    %c0_i32_1 = arith.constant 0 : i32
    %c0_i32_2 = arith.constant 0 : i32
    return %c0_i32, %c0_i32_0, %c0_i32_1 : i32, i32, i32
  }
  func.func @transform_15(%arg0: i32) -> (i32, i32, i32) {
    %c0_i32 = arith.constant 0 : i32
    %c0_i32_0 = arith.constant 0 : i32
    %c0_i32_1 = arith.constant 0 : i32
    %c0_i32_2 = arith.constant 0 : i32
    return %c0_i32, %c0_i32_0, %c0_i32_1 : i32, i32, i32
  }
  func.func @transform_16(%arg0: i32) -> (i32, i32) {
    %c0_i32 = arith.constant 0 : i32
    %c0_i32_0 = arith.constant 0 : i32
    %c0_i32_1 = arith.constant 0 : i32
    return %c0_i32, %c0_i32_0 : i32, i32
  }
  func.func @transform_17(%arg0: i32) -> (i32, i32) {
    %c0_i32 = arith.constant 0 : i32
    %c0_i32_0 = arith.constant 0 : i32
    %c0_i32_1 = arith.constant 0 : i32
    return %c0_i32, %c0_i32_0 : i32, i32
  }
  func.func @transform_18(%arg0: i32) -> (i32, i32) {
    %c0_i32 = arith.constant 0 : i32
    %c0_i32_0 = arith.constant 0 : i32
    %c0_i32_1 = arith.constant 0 : i32
    return %c0_i32, %c0_i32_0 : i32, i32
  }
  func.func @transform_19(%arg0: i32) -> (i32, i32) {
    %c0_i32 = arith.constant 0 : i32
    %c0_i32_0 = arith.constant 0 : i32
    %c0_i32_1 = arith.constant 0 : i32
    return %c0_i32, %c0_i32_0 : i32, i32
  }
  func.func @transform_20(%arg0: i32) -> (i32, i32, i32) {
    %c0_i32 = arith.constant 0 : i32
    %c0_i32_0 = arith.constant 0 : i32
    %c0_i32_1 = arith.constant 0 : i32
    return %arg0, %c0_i32, %c0_i32_0 : i32, i32, i32
  }
}

</mosaic_0001>

<bundles_post_ra>
// kernel: roberta_classifier_forward.1
= control target key start
LH: loop header
LB: loop body
LE: loop exit
PB: predicated region body
PF: predicated region fallthrough
CT: control target
= control target key end

     0   :  { %s8931_s0 = inlined_call_operand.vmem [shape: f32[2,32,128], index: 0, kind: input, shape index: {}]   ;;  %s8932_s1 = inlined_call_operand.vmem [shape: f32[2,32,32], index: 1, kind: input, shape index: {}]   ;;  %s8933_s2 = inlined_call_operand.vmem [shape: f32[1,128], index: 2, kind: input, shape index: {}]   ;;  %s8934_s3 = inlined_call_operand.vmem [shape: f32[1,128], index: 3, kind: input, shape index: {}]   ;;  %s8935_s4 = inlined_call_operand.vmem [shape: bf16[2,128,384], index: 4, kind: input, shape index: {}]   ;;  %s8936_s5 = inlined_call_operand.vmem [shape: f32[2,1,384], index: 5, kind: input, shape index: {}]   ;;  %s8937_s6 = inlined_call_operand.vmem [shape: bf16[2,128,128], index: 6, kind: input, shape index: {}]   ;;  %s8938_s7 = inlined_call_operand.vmem [shape: f32[2,1,128], index: 7, kind: input, shape index: {}]   ;;  %s8939_s8 = inlined_call_operand.vmem [shape: f32[2,1,128], index: 8, kind: input, shape index: {}]   ;;  %s8940_s9 = inlined_call_operand.vmem [shape: f32[2,1,128], index: 9, kind: input, shape index: {}]   ;;  %s8941_s10 = inlined_call_operand.vmem [shape: bf16[2,128,512], index: 10, kind: input, shape index: {}]   ;;  %s8942_s11 = inlined_call_operand.vmem [shape: f32[2,1,512], index: 11, kind: input, shape index: {}]   ;;  %s8943_s12 = inlined_call_operand.vmem [shape: bf16[2,512,128], index: 12, kind: input, shape index: {}]   ;;  %s8944_s13 = inlined_call_operand.vmem [shape: f32[2,1,128], index: 13, kind: input, shape index: {}]   ;;  %s8945_s14 = inlined_call_operand.vmem [shape: f32[2,1,128], index: 14, kind: input, shape index: {}]   ;;  %s8946_s15 = inlined_call_operand.vmem [shape: f32[2,1,128], index: 15, kind: input, shape index: {}]   ;;  %s8947_s16 = inlined_call_operand.vmem [shape: bf16[128,128], index: 16, kind: input, shape index: {}]   ;;  %s8948_s17 = inlined_call_operand.vmem [shape: f32[1,128], index: 17, kind: input, shape index: {}]   ;;  %s8949_s18 = inlined_call_operand.vmem [shape: bf16[128,128], index: 18, kind: input, shape index: {}]   ;;  %s8950_s19 = inlined_call_operand.vmem [shape: f32[1,128], index: 19, kind: input, shape index: {}]   ;;  %s8951_s20 = inlined_call_operand.hbm [shape: f32[2,2,128], index: 20, kind: output, shape index: {}]  }
   0x1   :  { %8966 = sst [smem:[#allocation11_spill]] %s8931_s0 }
   0x2   :  { %8967 = sst [smem:[#allocation12_spill]] %s8932_s1 }
   0x3   :  { %8968 = sst [smem:[#allocation13_spill]] %s8933_s2 }
   0x4   :  { %8969 = sst [smem:[#allocation14_spill]] %s8934_s3 }
   0x5   :  { %8970 = sst [smem:[#allocation15_spill]] %s8935_s4 }
   0x6   :  { %8971 = sst [smem:[#allocation16_spill]] %s8951_s20 }
   0x7   :  { %25 = vsyncpa [#allocation3], 0 }
   0x8   :  { %27 = vsyncpa [#allocation3 + $0x1], 0  ;;  %s7097_s1 = smov 0   ;;  %s7099_s22 = smov 0  }
   0x9   :  { %s7101_s23 = smov 0   ;;  %s7103_s24 = smov 0  }
   0xa LB: > { %8972 = sst [smem:[#allocation5_spill]] %s6971_s1  ;;  %s7118_s2 = sadd.s32 4294967295, %s6983_s24   ;;  %s6983_s24 = sphi %s7103_s24, %s8993_s24   ;;  %s6979_s23 = sphi %s7101_s23, %s8995_s23   ;;  %s6975_s22 = sphi %s7099_s22, %s8997_s22   ;;  %s6971_s1 = sphi %s7097_s1, %s8996_s1  }
   0xb   : > { %8973 = sst [smem:[#allocation6_spill]] %s6979_s23  ;;  %s5403_s25 = sadd.s32 4294967294, %s6983_s24  }
   0xc   : > { %8974 = sst [smem:[#allocation7_spill]] %s6983_s24  ;;  %s7122_s3 = sadd.s32 1, %s6983_s24  }
   0xd   : > { %8975 = sst [smem:[#allocation8_spill]] %s7122_s3  ;;  %s470_s26 = sadd.s32 1, %s6979_s23 }
   0xe   : > { %s467_s27 = ssub.s32 %s6983_s24, %s7122_s3  ;;  %p480_p0 = scmp.ne.s32.totalorder %s6979_s23, %s6975_s22 }
   0xf   : > { %p468_p1 = scmp.eq.s32.totalorder %s467_s27, 0  ;;  %p481_p2 = scmp.eq.s32.totalorder %s7118_s2, 1 }
  0x10   : > { %p486_p3 = scmp.ne.s32.totalorder %s6975_s22, %s6971_s1  ;;  %p487_p4 = scmp.eq.s32.totalorder %s5403_s25, 1 }
  0x11   : > { %s7133_s28 = scalar_select %p468_p1, %s6979_s23, %s470_s26  }
  0x12   : > { %p7135_p5 = por %p481_p2, %p480_p0  ;;  %p7139_p6 = por %p487_p4, %p486_p3 }
  0x13   : > { %8976 = sst [smem:[#allocation9_spill]] %s7133_s28  ;;  %p5406_p7 = scmp.ge.s32.totalorder %s6983_s24, 1 }
  0x14   : > { %s8978_s29 = scalar_select %p7139_p6, 1, 0 }
  0x15   : > { %p575_p8 = scmp.lt.s32.totalorder %s6983_s24, 3 }
  0x16   : > { %8979 = sst [smem:[#allocation10_spill]] %s8978_s29 }
  0x17   : > { %p576_p9 = pnand %p5406_p7, %p575_p8 }
  0x18   : > { %p638_p10 = scmp.lt.s32.totalorder (!%p576_p9), %s7118_s2, 1  ;;  %s8980_s26 = sld [smem:[#allocation11_spill]] (!%p576_p9)  ;;  %v6985_v39 = vmov (!%p576_p9), 0   ;;  %vm1059_vm0 = vcmask (!%p576_p9), 261120   ;;  %vm1792_vm1 = vcmask (!%p576_p9), 523264   ;;  %vm1797_vm2 = vcmask (!%p576_p9), 785408  }
  0x19   : > { %579 = sbr.rel (%p576_p9) target bundleno = 6063 (0x17af), region = 100  ;;  %s8981_s3 = sld [smem:[#allocation15_spill]] (!%p576_p9)  ;;  %935 = vmatprep.mubr.bf16.mxu0 (!%p576_p9), %v6985_v39  ;;  %vm6990_vm3 = vmmov (!%p576_p9), 0   ;;  %vm5089_vm4 = vcmask (!%p576_p9), 1040384   ;;  %vm5090_vm5 = vsmask.f32 (!%p576_p9), 256 }
  0x1a   : > { %s8982_s23 = sld [smem:[#allocation13_spill]] (!%p576_p9)  ;;  %s8983_s29 = sld [smem:[#allocation14_spill]] (!%p576_p9)  ;;  %vm5091_vm6 = vmand (!%p576_p9), %vm5089_vm4, %vm5090_vm5 }
  0x1b   : > { %s8964_s21 = smov (!%p576_p9), 96   ;;  %s8962_s25 = smov (!%p576_p9), 32  }
  0x1c   : > { %s8960_s20 = smov (!%p576_p9), 64   ;;  %s8984_s24 = sld [smem:[#allocation12_spill]] (!%p576_p9) }
  0x1d   : > { %s8985_s1 = smov (!%p576_p9), 96  }
  0x1f   : > { %v6429_v4 = vld [vmem:[%s8981_s3 + $0x4] ss:$12 sps:$4 sm:$0xff] (!%p576_p9)   ;;  %v6431_v5 = vld [vmem:[%s8981_s3] ss:$12 sps:$4 sm:$0xff] (!%p576_p9)   ;;  %v6432_v6 = vld [vmem:[%s8981_s3 + $0x1c] ss:$12 sps:$4 sm:$0xff] (!%p576_p9)  }
  0x20   : > { %s7147_s30 = scalar_select %p638_p10, %s7118_s2, 1  ;;  %v6434_v7 = vld [vmem:[%s8981_s3 + $0x8] ss:$12 sps:$4 sm:$0xff]   ;;  %903 = vmatprep.subr.bf16.mxu0 %v6429_v4  ;;  %v6435_v24 = vld [vmem:[%s8981_s3 + $0x18] ss:$12 sps:$4 sm:$0xff]  }
  0x21   : > { %904 = vmatpush1.bf16.msra.mxu0 %v6431_v5  ;;  %6060 = vmatprep.subr.bf16.mxu1 %v6434_v7  ;;  %v6436_v25 = vld [vmem:[%s8981_s3 + $0x34] ss:$12 sps:$4 sm:$0xff]   ;;  %v6439_v27 = vld [vmem:[%s8981_s3 + $0x30] ss:$12 sps:$4 sm:$0xff]   ;;  %v6440_v28 = vld [vmem:[%s8981_s3 + $0x4c] ss:$12 sps:$4 sm:$0xff]  }
  0x22   : > { %s5824_s0 = sshll.u32 %s7147_s30, 5  ;;  %905 = vmatprep.subr.bf16.mxu0 %v6432_v6  ;;  %6061 = vmatpush3.bf16.msra.mxu1 %v6434_v7  ;;  %v6438_v26 = vld [vmem:[%s8981_s3 + $0x20] ss:$12 sps:$4 sm:$0xff]   ;;  %v6442_v29 = vld [vmem:[%s8981_s3 + $0x38] ss:$12 sps:$4 sm:$0xff]  }
  0x23   : > { %s642_s27 = scalar_lea.vmem %s8980_s26, %s5824_s0  ;;  %6062 = vmatprep.subr.bf16.mxu1 %v6438_v26  ;;  %v6443_v30 = vld [vmem:[%s8981_s3 + $0x48] ss:$12 sps:$4 sm:$0xff]   ;;  %v6444_v31 = vld [vmem:[%s8981_s3 + $0x64] ss:$12 sps:$4 sm:$0xff]   ;;  %v6447_v33 = vld [vmem:[%s8981_s3 + $0x60] ss:$12 sps:$4 sm:$0xff]   ;;  %s7333_s28 = scalar_lea.vmem %s8984_s24, %s5824_s0 }
  0x24   : > { %v649_v0 = vld [vmem:[%s642_s27] sm:$0xff]  ;;  %v651_v1 = vld [vmem:[%s642_s27 + $0x10] sm:$0xff]  ;;  %v650_v2 = vld [vmem:[%s642_s27 + $0x8] sm:$0xff] }
  0x25   : > { %659 = vadd.xlane.f32.xlu0 %v649_v0  ;;  %663 = vadd.xlane.f32.xlu1 %v651_v1  ;;  %v652_v3 = vld [vmem:[%s642_s27 + $0x18] sm:$0xff]  ;;  %v6450_v35 = vld [vmem:[%s8981_s3 + $0x68] ss:$12 sps:$4 sm:$0xff]   ;;  %v6454_v38 = vld [vmem:[%s8981_s3 + $0x80] ss:$12 sps:$4 sm:$0xff]  }
  0x26   : > { %906 = vmatpush1.bf16.msra.mxu0 %v6435_v24  ;;  %6063 = vmatpush3.bf16.msra.mxu1 %v6438_v26  ;;  %v6446_v32 = vld [vmem:[%s8981_s3 + $0x50] ss:$12 sps:$4 sm:$0xff]   ;;  %v6451_v36 = vld [vmem:[%s8981_s3 + $0x78] ss:$12 sps:$4 sm:$0xff]   ;;  %v6452_v37 = vld [vmem:[%s8981_s3 + $0x94] ss:$12 sps:$4 sm:$0xff]  }
  0x27   : > { %907 = vmatprep.subr.bf16.mxu0 %v6436_v25  ;;  %6064 = vmatprep.subr.bf16.mxu1 %v6442_v29  ;;  %v6448_v34 = vld [vmem:[%s8981_s3 + $0x7c] ss:$12 sps:$4 sm:$0xff]   ;;  %v6456_v41 = vld [vmem:[%s8981_s3 + $0xac] ss:$12 sps:$4 sm:$0xff]   ;;  %v5412_v59 = vld [vmem:[%s8982_s23] ss:$0 sm:$0xff] }
  0x28   : > { %v6455_v40 = vld [vmem:[%s8981_s3 + $0x90] ss:$12 sps:$4 sm:$0xff]   ;;  %v6458_v42 = vld [vmem:[%s8981_s3 + $0x98] ss:$12 sps:$4 sm:$0xff]   ;;  %v6459_v43 = vld [vmem:[%s8981_s3 + $0xa8] ss:$12 sps:$4 sm:$0xff]  }
  0x29   : > { %661 = vadd.xlane.f32.xlu0 %v650_v2  ;;  %665 = vadd.xlane.f32.xlu1 %v652_v3  ;;  %v6460_v44 = vld [vmem:[%s8981_s3 + $0xb0] ss:$12 sps:$4 sm:$0xff]   ;;  %s8986_s23 = smov 32  }
  0x2a   : > { %908 = vmatpush1.bf16.msra.mxu0 %v6439_v27  ;;  %6065 = vmatpush3.bf16.msra.mxu1 %v6442_v29 }
  0x2b   : > { %909 = vmatprep.subr.bf16.mxu0 %v6440_v28  ;;  %6066 = vmatprep.subr.bf16.mxu1 %v6446_v32 }
  0x2e   : > { %910 = vmatpush1.bf16.msra.mxu0 %v6443_v30  ;;  %6067 = vmatpush3.bf16.msra.mxu1 %v6446_v32 }
  0x2f   : > { %911 = vmatprep.subr.bf16.mxu0 %v6444_v31  ;;  %6068 = vmatprep.subr.bf16.mxu1 %v6450_v35 }
  0x32   : > { %912 = vmatpush1.bf16.msra.mxu0 %v6447_v33  ;;  %6069 = vmatpush3.bf16.msra.mxu1 %v6450_v35 }
  0x33   : > { %913 = vmatprep.subr.bf16.mxu0 %v6448_v34  ;;  %6070 = vmatprep.subr.bf16.mxu1 %v6454_v38 }
  0x36   : > { %914 = vmatpush1.bf16.msra.mxu0 %v6451_v36  ;;  %6071 = vmatpush3.bf16.msra.mxu1 %v6454_v38 }
  0x37   : > { %915 = vmatprep.subr.bf16.mxu0 %v6452_v37  ;;  %6072 = vmatprep.subr.bf16.mxu1 %v6458_v42 }
  0x3a   : > { %916 = vmatpush1.bf16.msra.mxu0 %v6455_v40  ;;  %6073 = vmatpush3.bf16.msra.mxu1 %v6458_v42 }
  0x3b   : > { %917 = vmatprep.subr.bf16.mxu0 %v6456_v41  ;;  %6074 = vmatprep.subr.bf16.mxu1 %v6460_v44 }
  0x3e   : > { %918 = vmatpush1.bf16.msra.mxu0 %v6459_v43  ;;  %6075 = vmatpush3.bf16.msra.mxu1 %v6460_v44 }
  0xb2   : > { %v660_v8 = vpop.xlane.xlu0 %659  ;;  %v664_v10 = vpop.xlane.xlu1 %663 }
  0xb3   : > { %v668_v9 = vmul.f32 0.0078125, %v660_v8  ;;  %v670_v11 = vmul.f32 0.0078125, %v664_v10 }
  0xb5   : > { %v7167_v12 = vsub.f32 %v649_v0, %v668_v9  ;;  %v7169_v14 = vsub.f32 %v651_v1, %v670_v11  ;;  %v5413_v0 = vld [vmem:[%s8983_s29] ss:$0 sm:$0xff] }
  0xb6   : > { %v662_v13 = vpop.xlane.xlu0 %661  ;;  %v666_v17 = vpop.xlane.xlu1 %665 }
  0xb7   : > { %v669_v15 = vmul.f32 0.0078125, %v662_v13  ;;  %v676_v16 = vmul.f32 %v7167_v12, %v7167_v12  ;;  %v671_v18 = vmul.f32 0.0078125, %v666_v17  ;;  %v678_v19 = vmul.f32 %v7169_v14, %v7169_v14 }
  0xb8   : > { %v760_v13 = vlaneseq }
  0xb9   : > { %680 = vadd.xlane.f32.xlu0 %v676_v16  ;;  %v7175_v20 = vsub.f32 %v650_v2, %v669_v15  ;;  %v7177_v21 = vsub.f32 %v652_v3, %v671_v18  ;;  %v758_v16 = vld [vmem:[%s8936_s5] sm:$0x7] }
  0xbb   : > { %v677_v22 = vmul.f32 %v7175_v20, %v7175_v20  ;;  %v679_v23 = vmul.f32 %v7177_v21, %v7177_v21 }
  0xbd   : > { %684 = vadd.xlane.f32.xlu0 %v678_v19  ;;  %682 = vadd.xlane.f32.xlu1 %v677_v22 }
  0xc1   : > { %686 = vadd.xlane.f32.xlu1 %v679_v23 }
 0x146   : > { %v681_v45 = vpop.xlane.xlu0 %680 }
 0x147   : > { %v688_v46 = vmul.f32 0.0078125, %v681_v45 }
 0x149   : > { %v692_v47 = vadd.f32 1e-05, %v688_v46 }
 0x14a   : > { %v683_v48 = vpop.xlane.xlu1 %682  ;;  %v685_v49 = vpop.xlane.xlu0 %684 }
 0x14b   : > { %6685 = vrsqrt.f32 %v692_v47  ;;  %v689_v50 = vmul.f32 0.0078125, %v683_v48  ;;  %v690_v51 = vmul.f32 0.0078125, %v685_v49 }
 0x14d   : > { %v693_v52 = vadd.f32 1e-05, %v689_v50  ;;  %v694_v53 = vadd.f32 1e-05, %v690_v51 }
 0x14e   : > { %v687_v54 = vpop.xlane.xlu1 %686 }
 0x14f   : > { %6687 = vrsqrt.f32 %v693_v52  ;;  %v691_v55 = vmul.f32 0.0078125, %v687_v54 }
 0x150   : > { %6689 = vrsqrt.f32 %v694_v53 }
 0x151   : > { %v695_v56 = vadd.f32 1e-05, %v691_v55 }
 0x153   : > { %6691 = vrsqrt.f32 %v695_v56 }
 0x155   : > { %v6686_v57 = vpop.eup %6685 }
 0x156   : > { %v700_v58 = vmul.f32 %v6686_v57, %v7167_v12 }
 0x158   : > { %v710_v63 = vmul.f32 %v5412_v59, %v700_v58 }
 0x159   : > { %v6688_v60 = vpop.eup %6687 }
 0x15a   : > { %v6690_v61 = vpop.eup %6689  ;;  %v701_v62 = vmul.f32 %v6688_v60, %v7175_v20  ;;  %v7253_v4 = vadd.f32 %v5413_v0, %v710_v63 }
 0x15b   : > { %v702_v1 = vmul.f32 %v6690_v61, %v7169_v14  ;;  %v7267_v14 = vshrl.u32 %v760_v13, 7  ;;  %v7336_v13 = vld [vmem:[%s7333_s28 + $0x10] sm:$0xff] }
 0x15c   : > { %v711_v2 = vmul.f32 %v5412_v59, %v701_v62 }
 0x15d   : > { %v6692_v3 = vpop.eup %6691  ;;  %v712_v7 = vmul.f32 %v5412_v59, %v702_v1  ;;  %v7270_v15 = vsub.s32 0, %v7267_v14  ;;  %v7276_v17 = vsub.s32 1, %v7267_v14  ;;  %v7280_v19 = vsub.s32 2, %v7267_v14 }
 0x15e   : > { %v7255_v5 = vadd.f32 %v5413_v0, %v711_v2  ;;  %v703_v6 = vmul.f32 %v6692_v3, %v7177_v21 }
 0x15f   : > { %v7260_v10 = vadd.f32 %v5413_v0, %v712_v7  ;;  %v763_v18 = vrot.slane %v758_v16, %v7270_v15  ;;  %v767_v21 = vrot.slane %v758_v16, %v7276_v17  ;;  %v771_v27 = vrot.slane %v758_v16, %v7280_v19 }
 0x160   : > { %v724_v8 = vpack.c.bf16 %v7255_v5, %v7253_v4  ;;  %v713_v9 = vmul.f32 %v5412_v59, %v703_v6 }
 0x162   : > { %936 = vmatmul.mubr.bf16.vlgmr.msra.gmra.mrb[0].mxu0 %v724_v8  ;;  %6076 = vmatprep.mubr.bf16.mxu1 %v724_v8  ;;  %v7262_v11 = vadd.f32 %v5413_v0, %v713_v9 }
 0x163   : > { %945 = vmatprep.mubr.bf16.mxu0 %v6985_v39 }
 0x164   : > { %v725_v12 = vpack.c.bf16 %v7262_v11, %v7260_v10 }
 0x166   : > { %6077 = vmatmul.mubr.bf16.vlgmr.msra.gmra.mrb[0].mxu1 %v725_v12 }
 0x16a   : > { %946 = vmatmul.mubr.bf16.gmra.mrb[4].mxu0 %v725_v12 }
 0x235   : > { %v937_v20 = vpop.f32.mrb[0].mxu0 }
 0x236   : > { %v939_v22 = vpop.f32.mrb[1].mxu0  ;;  %v938_v24 = vadd.f32 %v937_v20, %v763_v18 }
 0x237   : > { %v941_v23 = vpop.f32.mrb[2].mxu0  ;;  %v940_v28 = vadd.f32 %v939_v22, %v767_v21 }
 0x238   : > { %v942_v25 = vadd.f32 %v941_v23, %v763_v18  ;;  %v943_v26 = vpop.f32.mrb[3].mxu0 }
 0x239   : > { %v944_v29 = vadd.f32 %v943_v26, %v767_v21  ;;  %v6078_v30 = vpop.f32.mrb[0].mxu1 }
 0x23a   : > { %v1005_v31 = vpack.c.bf16 %v942_v25, %v938_v24  ;;  %v990_v32 = vpop.f32.mrb[1].mxu1  ;;  %v999_v35 = vadd.f32 %v6078_v30, %v771_v27  ;;  %v7342_v24 = vld [vmem:[%s7333_s28 + $0x8] sm:$0xff] }
 0x23b   : > { %v1006_v33 = vpack.c.bf16 %v944_v29, %v940_v28  ;;  %v6079_v34 = vpop.f32.mrb[2].mxu1  ;;  %v991_v38 = vadd.f32 %v990_v32, %v771_v27 }
 0x23c   : > { %v1002_v36 = vadd.f32 %v6079_v34, %v771_v27  ;;  %v993_v37 = vpop.f32.mrb[3].mxu1  ;;  %6084 = vmatprep.mubr.msk.bf16.mxu1 %vm1059_vm0, %v1005_v31 }
 0x23d   : > { %v994_v40 = vadd.f32 %v993_v37, %v771_v27  ;;  %1027 = vrot.lane.b32.xlu0 %v1006_v33, %s8964_s21  ;;  %v947_v41 = vpop.f32.mrb[4].mxu0  ;;  %6308 = vmatprep.subr.msk.bf16.mxu1 %vm1059_vm0, %v1006_v33  ;;  %v1067_v42 = vsel %vm1059_vm0, %v1006_v33, 0 }
 0x23e   : > { %v7288_v43 = vpack.c.bf16 %v1002_v36, %v999_v35  ;;  %v949_v44 = vpop.f32.mrb[5].mxu0  ;;  %6081 = vmatpush3.bf16.xpose.msra.mxu1 %v1067_v42  ;;  %v948_v47 = vadd.f32 %v947_v41, %v763_v18 }
 0x23f   : > { %v7290_v45 = vpack.c.bf16 %v994_v40, %v991_v38  ;;  %v951_v46 = vpop.f32.mrb[6].mxu0  ;;  %v950_v50 = vadd.f32 %v949_v44, %v767_v21 }
 0x240   : > { %v952_v48 = vadd.f32 %v951_v46, %v763_v18  ;;  %v953_v49 = vpop.f32.mrb[7].mxu0 }
 0x241   : > { %v954_v51 = vadd.f32 %v953_v49, %v767_v21  ;;  %1035 = vrot.lane.b32.xlu0 %v1006_v33, %s8962_s25  ;;  %v7339_v21 = vld [vmem:[%s7333_s28] sm:$0xff] }
 0x242   : > { %v1008_v52 = vpack.c.bf16 %v952_v48, %v948_v47 }
 0x243   : > { %v1009_v53 = vpack.c.bf16 %v954_v51, %v950_v50 }
 0x245   : > { %1033 = vrot.lane.b32.xlu0 %v1009_v53, %s8960_s20  ;;  %1029 = vrot.lane.b32.xlu1 %v1009_v53, %s8964_s21  ;;  %v1070_v54 = vsel %vm1059_vm0, %v1009_v53, 0 }
 0x246   : > { %6309 = vmatprep.subr.msk.bf16.mxu1 %vm1059_vm0, %v1009_v53 }
 0x247   : > { %6083 = vmatpush3.bf16.xpose.msra.mxu1 %v1070_v54 }
 0x249   : > { %1017 = vrot.lane.b32.xlu0 %v1005_v31, %s8960_s20  ;;  %1031 = vrot.lane.b32.xlu1 %v1006_v33, %s8960_s20 }
 0x24d   : > { %1021 = vrot.lane.b32.xlu0 %v1005_v31, %s8962_s25  ;;  %1013 = vrot.lane.b32.xlu1 %v1005_v31, %s8964_s21  ;;  %v7353_v31 = vld [vmem:[%s7333_s28 + $0x18] sm:$0xff] }
 0x24e   : > { %6085 = vmatmul.mubr.msk.bf16.vlgmr.msra.gmra.mrb[4].mxu1 %vm1059_vm0, %v1008_v52 }
 0x251   : > { %1015 = vrot.lane.b32.xlu1 %v1008_v52, %s8964_s21 }
 0x255   : > { %1037 = vrot.lane.b32.xlu1 %v1009_v53, %s8962_s25 }
 0x259   : > { %1019 = vrot.lane.b32.xlu1 %v1008_v52, %s8960_s20 }
 0x25d   : > { %1023 = vrot.lane.b32.xlu1 %v1008_v52, %s8962_s25 }
 0x2af   : > { %v1028_v55 = vpop.permute.xlu0 %1027 }
 0x2b0   : > { %6310 = vmatprep.subr.msk.bf16.mxu1 %vm1059_vm0, %v1028_v55  ;;  %v1128_v56 = vsel %vm1059_vm0, %v1028_v55, 0 }
 0x2b1   : > { %6089 = vmatpush3.bf16.xpose.msra.mxu1 %v1128_v56 }
 0x2b3   : > { %v1036_v57 = vpop.permute.xlu0 %1035 }
 0x2b4   : > { %v1250_v2 = vsel %vm1059_vm0, %v1036_v57, 0 }
 0x2b7   : > { %v1030_v58 = vpop.permute.xlu1 %1029  ;;  %v1034_v59 = vpop.permute.xlu0 %1033 }
 0x2b8   : > { %6311 = vmatprep.subr.msk.bf16.mxu1 %vm1059_vm0, %v1030_v58  ;;  %v1131_v60 = vsel %vm1059_vm0, %v1030_v58, 0  ;;  %v1192_v3 = vsel %vm1059_vm0, %v1034_v59, 0 }
 0x2b9   : > { %6091 = vmatpush3.bf16.xpose.msra.mxu1 %v1131_v60 }
 0x2ba   : > { %6314 = vmatprep.subr.msk.bf16.mxu1 %vm1059_vm0, %v1036_v57 }
 0x2bb   : > { %v1032_v61 = vpop.permute.xlu1 %1031  ;;  %v1018_v62 = vpop.permute.xlu0 %1017 }
 0x2bc   : > { %6312 = vmatprep.subr.msk.bf16.mxu0 %vm1059_vm0, %v1032_v61  ;;  %6100 = vmatprep.mubr.msk.bf16.mxu0 %vm1059_vm0, %v1018_v62  ;;  %v1189_v63 = vsel %vm1059_vm0, %v1032_v61, 0 }
 0x2bd   : > { %6097 = vmatpush3.bf16.xpose.msra.mxu0 %v1189_v63 }
 0x2be   : > { %6313 = vmatprep.subr.msk.bf16.mxu0 %vm1059_vm0, %v1034_v59 }
 0x2bf   : > { %v1014_v0 = vpop.permute.xlu1 %1013  ;;  %v1022_v6 = vpop.permute.xlu0 %1021 }
 0x2c0   : > { %6092 = vmatprep.mubr.msk.bf16.mxu1 %vm1059_vm0, %v1014_v0 }
 0x2c3   : > { %v1016_v1 = vpop.permute.xlu1 %1015 }
 0x2c4   : > { %6093 = vmatmul.mubr.msk.bf16.vlgmr.msra.gmra.mrb[8].mxu1 %vm1059_vm0, %v1016_v1 }
 0x2c5   : > { %6105 = vmatpush3.bf16.xpose.msra.mxu1 %v1250_v2  ;;  %6099 = vmatpush3.bf16.xpose.msra.mxu0 %v1192_v3 }
 0x2c6   : > { %6108 = vmatprep.mubr.msk.bf16.mxu1 %vm1059_vm0, %v1022_v6  ;;  %6112 = vmatprep.subr.bf16.mxu0 %v7290_v45 }
 0x2c7   : > { %v1038_v7 = vpop.permute.xlu1 %1037 }
 0x2c8   : > { %6315 = vmatprep.subr.msk.bf16.mxu1 %vm1059_vm0, %v1038_v7  ;;  %v1253_v9 = vsel %vm1059_vm0, %v1038_v7, 0 }
 0x2cb   : > { %v1020_v8 = vpop.permute.xlu1 %1019 }
 0x2cc   : > { %6101 = vmatmul.mubr.msk.bf16.vlgmr.msra.gmra.mrb[8].mxu0 %vm1059_vm0, %v1020_v8 }
 0x2cd   : > { %6107 = vmatpush3.bf16.xpose.msra.mxu1 %v1253_v9  ;;  %6113 = vmatpush3.bf16.msra.mxu0 %v7290_v45 }
 0x2ce   : > { %6114 = vmatprep.subr.bf16.mxu0 %v7288_v43 }
 0x2cf   : > { %v1024_v12 = vpop.permute.xlu1 %1023 }
 0x2d1   : > { %6115 = vmatpush3.bf16.msra.mxu0 %v7288_v43 }
 0x2d4   : > { %6109 = vmatmul.mubr.msk.bf16.vlgmr.msra.gmra.mrb[12].mxu1 %vm1059_vm0, %v1024_v12 }
 0x321   : > { %v6086_v16 = vpop.f32.mrb[4].mxu1 }
 0x322   : > { %v1306_v18 = vmul.f32 0.17677669, %v6086_v16  ;;  %v1106_v20 = vpop.f32.mrb[5].mxu1 }
 0x323   : > { %v1304_v22 = vmul.f32 0.17677669, %v1106_v20  ;;  %v6087_v23 = vpop.f32.mrb[6].mxu1 }
 0x324   : > { %v1109_v25 = vpop.f32.mrb[7].mxu1  ;;  %v7345_v26 = vadd.f32 %v1306_v18, %v7336_v13  ;;  %v1307_v28 = vmul.f32 0.17677669, %v6087_v23 }
 0x325   : > { %v1305_v27 = vmul.f32 0.17677669, %v1109_v25  ;;  %v7350_v30 = vadd.f32 %v1304_v22, %v7339_v21 }
 0x326   : > { %v1342_v29 = vsel %vm1059_vm0, %v7345_v26, -inf  ;;  %v7363_v35 = vadd.f32 %v1307_v28, %v7353_v31 }
 0x327   : > { %1343 = vmax.xlane.f32.xlu0 %v1342_v29  ;;  %v7356_v32 = vadd.f32 %v1305_v27, %v7342_v24  ;;  %v1336_v34 = vsel %vm1059_vm0, %v7350_v30, -inf }
 0x328   : > { %v1345_v36 = vsel %vm1059_vm0, %v7363_v35, -inf }
 0x329   : > { %v1339_v33 = vsel %vm1059_vm0, %v7356_v32, -inf }
 0x32a   : > { %1340 = vmax.xlane.f32.xlu1 %v1339_v33 }
 0x32b   : > { %1337 = vmax.xlane.f32.xlu0 %v1336_v34 }
 0x32f   : > { %1346 = vmax.xlane.f32.xlu0 %v1345_v36 }
 0x397   : > { %v6094_v37 = vpop.f32.mrb[8].mxu1 }
 0x398   : > { %v1310_v38 = vmul.f32 0.17677669, %v6094_v37  ;;  %v1167_v40 = vpop.f32.mrb[9].mxu1 }
 0x399   : > { %v6095_v41 = vpop.f32.mrb[10].mxu1  ;;  %v1308_v51 = vmul.f32 0.17677669, %v1167_v40 }
 0x39a   : > { %v1311_v42 = vmul.f32 0.17677669, %v6095_v41  ;;  %v1170_v44 = vpop.f32.mrb[11].mxu1  ;;  %v7368_v46 = vadd.f32 %v1310_v38, %v7336_v13 }
 0x39b   : > { %v1309_v55 = vmul.f32 0.17677669, %v1170_v44  ;;  %v7386_v62 = vadd.f32 %v1308_v51, %v7339_v21 }
 0x39c   : > { %v1354_v47 = vsel %vm1059_vm0, %v7368_v46, -inf  ;;  %v7373_v48 = vadd.f32 %v1311_v42, %v7353_v31 }
 0x39d   : > { %1355 = vmax.xlane.f32.xlu0 %v1354_v47  ;;  %v7391_v1 = vadd.f32 %v1309_v55, %v7342_v24  ;;  %v1348_v6 = vsel %vm1059_vm0, %v7386_v62, -inf }
 0x39e   : > { %v1357_v49 = vsel %vm1059_vm0, %v7373_v48, -inf }
 0x39f   : > { %1358 = vmax.xlane.f32.xlu1 %v1357_v49  ;;  %v6102_v50 = vpop.f32.mrb[8].mxu0  ;;  %v1351_v16 = vsel %vm1059_vm0, %v7391_v1, -inf }
 0x3a0   : > { %v1314_v52 = vmul.f32 0.17677669, %v6102_v50  ;;  %v1228_v53 = vpop.f32.mrb[9].mxu0 }
 0x3a1   : > { %v6103_v54 = vpop.f32.mrb[10].mxu0  ;;  %v1312_v59 = vmul.f32 0.17677669, %v1228_v53 }
 0x3a2   : > { %v1315_v56 = vmul.f32 0.17677669, %v6103_v54  ;;  %v1231_v57 = vpop.f32.mrb[11].mxu0  ;;  %v7378_v58 = vadd.f32 %v1314_v52, %v7336_v13 }
 0x3a3   : > { %v1313_v63 = vmul.f32 0.17677669, %v1231_v57  ;;  %v7396_v7 = vadd.f32 %v1312_v59, %v7339_v21 }
 0x3a4   : > { %v1366_v60 = vsel %vm1059_vm0, %v7378_v58, -inf  ;;  %v7383_v61 = vadd.f32 %v1315_v56, %v7353_v31 }
 0x3a5   : > { %1367 = vmax.xlane.f32.xlu0 %v1366_v60  ;;  %v7401_v18 = vadd.f32 %v1313_v63, %v7342_v24  ;;  %v1360_v22 = vsel %vm1059_vm0, %v7396_v7, -inf }
 0x3a6   : > { %v1369_v0 = vsel %vm1059_vm0, %v7383_v61, -inf }
 0x3a7   : > { %v6110_v2 = vpop.f32.mrb[12].mxu1  ;;  %1370 = vmax.xlane.f32.xlu1 %v1369_v0  ;;  %v1363_v25 = vsel %vm1059_vm0, %v7401_v18, -inf }
 0x3a8   : > { %v1289_v3 = vpop.f32.mrb[13].mxu1  ;;  %v1318_v20 = vmul.f32 0.17677669, %v6110_v2 }
 0x3a9   : > { %v1316_v8 = vmul.f32 0.17677669, %v1289_v3  ;;  %v6111_v9 = vpop.f32.mrb[14].mxu1  ;;  %1349 = vmax.xlane.f32.xlu0 %v1348_v6 }
 0x3aa   : > { %v1292_v12 = vpop.f32.mrb[15].mxu1  ;;  %v7413_v28 = vadd.f32 %v1318_v20, %v7336_v13  ;;  %v1319_v38 = vmul.f32 0.17677669, %v6111_v9 }
 0x3ab   : > { %1352 = vmax.xlane.f32.xlu1 %v1351_v16  ;;  %v7406_v23 = vadd.f32 %v1316_v8, %v7339_v21  ;;  %v1317_v40 = vmul.f32 0.17677669, %v1292_v12 }
 0x3ac   : > { %v1378_v29 = vsel %vm1059_vm0, %v7413_v28, -inf  ;;  %v7426_v41 = vadd.f32 %v1319_v38, %v7353_v31 }
 0x3ad   : > { %1361 = vmax.xlane.f32.xlu0 %v1360_v22  ;;  %v1372_v27 = vsel %vm1059_vm0, %v7406_v23, -inf  ;;  %v7433_v47 = vadd.f32 %v1317_v40, %v7342_v24 }
 0x3ae   : > { %v1381_v44 = vsel %vm1059_vm0, %v7426_v41, -inf }
 0x3af   : > { %1364 = vmax.xlane.f32.xlu1 %v1363_v25  ;;  %v1375_v49 = vsel %vm1059_vm0, %v7433_v47, -inf }
 0x3b1   : > { %1373 = vmax.xlane.f32.xlu0 %v1372_v27 }
 0x3b4   : > { %v1344_v21 = vpop.xlane.xlu0 %1343 }
 0x3b5   : > { %1379 = vmax.xlane.f32.xlu0 %v1378_v29  ;;  %v1386_v33 = vsub.f32 %v7345_v26, %v1344_v21 }
 0x3b7   : > { %v1404_v13 = vmul.f32 1.442695, %v1386_v33  ;;  %v1341_v51 = vpop.xlane.xlu1 %1340 }
 0x3b8   : > { %v1338_v34 = vpop.xlane.xlu0 %1337  ;;  %v1385_v52 = vsub.f32 %v7356_v32, %v1341_v51 }
 0x3b9   : > { %v1384_v36 = vsub.f32 %v7350_v30, %v1338_v34  ;;  %6693 = vpow2.f32 %v1404_v13 }
 0x3ba   : > { %v1402_v54 = vmul.f32 1.442695, %v1385_v52 }
 0x3bb   : > { %v1400_v37 = vmul.f32 1.442695, %v1384_v36 }
 0x3bc   : > { %v1347_v24 = vpop.xlane.xlu0 %1346 }
 0x3bd   : > { %6695 = vpow2.f32 %v1400_v37  ;;  %v1387_v50 = vsub.f32 %v7363_v35, %v1347_v24 }
 0x3bf   : > { %v1406_v53 = vmul.f32 1.442695, %v1387_v50 }
 0x3c0   : > { %1043 = vrot.lane.b32.xlu1 %v7288_v43, %s8964_s21 }
 0x3c1   : > { %6697 = vpow2.f32 %v1406_v53 }
 0x3c2   : > { %6699 = vpow2.f32 %v1402_v54 }
 0x3c3   : > { %v7428_v42 = vpop.eup %6693 }
 0x3c4   : > { %1047 = vrot.lane.b32.xlu1 %v7290_v45, %s8960_s20  ;;  %v1438_v26 = vsel %vm1059_vm0, %v7428_v42, 0.0 }
 0x3c7   : > { %v7437_v30 = vpop.eup %6695 }
 0x3c8   : > { %v1432_v31 = vsel %vm1059_vm0, %v7437_v30, 0.0 }
 0x3cb   : > { %1041 = vrot.lane.b32.xlu0 %v7290_v45, %s8964_s21  ;;  %v7447_v55 = vpop.eup %6697 }
 0x3cc   : > { %v1441_v56 = vsel %vm1059_vm0, %v7447_v55, 0.0  ;;  %v7451_v57 = vpop.eup %6699 }
 0x3e8   : > { %1382 = vmax.xlane.f32.xlu1 %v1381_v44 }
 0x3ea   : > { %1439 = vadd.xlane.f32.xlu0 %v1438_v26 }
 0x3ec   : > { %1376 = vmax.xlane.f32.xlu1 %v1375_v49 }
 0x3ee   : > { %1433 = vadd.xlane.f32.xlu0 %v1432_v31 }
 0x3fd   : > { %1053 = vrot.lane.b32.xlu1 %v7290_v45, %s8962_s25  ;;  %v1435_v45 = vsel %vm1059_vm0, %v7451_v57, 0.0 }
 0x421   : > { %1442 = vadd.xlane.f32.xlu1 %v1441_v56 }
 0x425   : > { %1436 = vadd.xlane.f32.xlu1 %v1435_v45 }
 0x42a   : > { %v1356_v35 = vpop.xlane.xlu0 %1355 }
 0x42b   : > { %v1390_v59 = vsub.f32 %v7368_v46, %v1356_v35 }
 0x42c   : > { %v1359_v32 = vpop.xlane.xlu1 %1358 }
 0x42d   : > { %v1412_v60 = vmul.f32 1.442695, %v1390_v59  ;;  %v1391_v63 = vsub.f32 %v7373_v48, %v1359_v32 }
 0x42f   : > { %6701 = vpow2.f32 %v1412_v60  ;;  %v1414_v0 = vmul.f32 1.442695, %v1391_v63 }
 0x431   : > { %6703 = vpow2.f32 %v1414_v0 }
 0x432   : > { %v1368_v2 = vpop.xlane.xlu0 %1367 }
 0x433   : > { %v1394_v3 = vsub.f32 %v7378_v58, %v1368_v2 }
 0x434   : > { %v1371_v6 = vpop.xlane.xlu1 %1370 }
 0x435   : > { %v1420_v8 = vmul.f32 1.442695, %v1394_v3  ;;  %v1395_v9 = vsub.f32 %v7383_v61, %v1371_v6 }
 0x436   : > { %v1350_v12 = vpop.xlane.xlu0 %1349 }
 0x437   : > { %6705 = vpow2.f32 %v1420_v8  ;;  %v1422_v16 = vmul.f32 1.442695, %v1395_v9  ;;  %v1388_v20 = vsub.f32 %v7386_v62, %v1350_v12 }
 0x438   : > { %v1353_v46 = vpop.xlane.xlu1 %1352 }
 0x439   : > { %v7460_v22 = vpop.eup %6701  ;;  %6707 = vpow2.f32 %v1422_v16  ;;  %v1408_v48 = vmul.f32 1.442695, %v1388_v20  ;;  %v1389_v25 = vsub.f32 %v7391_v1, %v1353_v46 }
 0x43a   : > { %v1362_v27 = vpop.xlane.xlu0 %1361  ;;  %v1450_v58 = vsel %vm1059_vm0, %v7460_v22, 0.0 }
 0x43b   : > { %v7465_v29 = vpop.eup %6703  ;;  %6709 = vpow2.f32 %v1408_v48  ;;  %v1410_v61 = vmul.f32 1.442695, %v1389_v25  ;;  %v1392_v21 = vsub.f32 %v7396_v7, %v1362_v27  ;;  %1451 = vadd.xlane.f32.xlu0 %v1450_v58 }
 0x43c   : > { %v1365_v33 = vpop.xlane.xlu1 %1364  ;;  %v1453_v62 = vsel %vm1059_vm0, %v7465_v29, 0.0 }
 0x43d   : > { %6711 = vpow2.f32 %v1410_v61  ;;  %v1416_v34 = vmul.f32 1.442695, %v1392_v21  ;;  %v1393_v13 = vsub.f32 %v7401_v18, %v1365_v33  ;;  %1454 = vadd.xlane.f32.xlu1 %v1453_v62 }
 0x43e   : > { %v1374_v1 = vpop.xlane.xlu0 %1373 }
 0x43f   : > { %6713 = vpow2.f32 %v1416_v34  ;;  %v1418_v36 = vmul.f32 1.442695, %v1393_v13  ;;  %v1396_v40 = vsub.f32 %v7406_v23, %v1374_v1 }
 0x440   : > { %v1044_v37 = vpop.permute.xlu1 %1043 }
 0x441   : > { %v7471_v38 = vpop.eup %6705  ;;  %6715 = vpow2.f32 %v1418_v36  ;;  %v1424_v50 = vmul.f32 1.442695, %v1396_v40 }
 0x442   : > { %v1380_v7 = vpop.xlane.xlu0 %1379  ;;  %v1462_v44 = vsel %vm1059_vm0, %v7471_v38, 0.0 }
 0x443   : > { %v7476_v26 = vpop.eup %6707  ;;  %v1398_v49 = vsub.f32 %v7413_v28, %v1380_v7  ;;  %1463 = vadd.xlane.f32.xlu0 %v1462_v44 }
 0x444   : > { %v7479_v18 = vpop.permute.xlu1 %1047  ;;  %v1465_v31 = vsel %vm1059_vm0, %v7476_v26, 0.0 }
 0x445   : > { %v7483_v24 = vpop.eup %6709  ;;  %v1428_v51 = vmul.f32 1.442695, %v1398_v49  ;;  %6128 = vmatprep.subr.bf16.mxu0 %v7479_v18  ;;  %1466 = vadd.xlane.f32.xlu1 %v1465_v31 }
 0x446   : > { %v1042_v23 = vpop.permute.xlu0 %1041  ;;  %v1444_v52 = vsel %vm1059_vm0, %v7483_v24, 0.0 }
 0x447   : > { %v7488_v53 = vpop.eup %6711  ;;  %6717 = vpow2.f32 %v1428_v51  ;;  %1445 = vadd.xlane.f32.xlu0 %v1444_v52  ;;  %6120 = vmatprep.subr.bf16.mxu1 %v1042_v23 }
 0x448   : > { %6121 = vmatpush3.bf16.msra.mxu1 %v1042_v23  ;;  %v1447_v28 = vsel %vm1059_vm0, %v7488_v53, 0.0  ;;  %6719 = vpow2.f32 %v1424_v50 }
 0x449   : > { %v7492_v54 = vpop.eup %6713  ;;  %1448 = vadd.xlane.f32.xlu1 %v1447_v28  ;;  %6122 = vmatprep.subr.bf16.mxu1 %v1044_v37 }
 0x44a   : > { %v1456_v56 = vsel %vm1059_vm0, %v7492_v54, 0.0 }
 0x44b   : > { %v7496_v45 = vpop.eup %6715  ;;  %1457 = vadd.xlane.f32.xlu0 %v1456_v56 }
 0x44c   : > { %6123 = vmatpush3.bf16.msra.mxu1 %v1044_v37  ;;  %v1459_v35 = vsel %vm1059_vm0, %v7496_v45, 0.0 }
 0x44d   : > { %1460 = vadd.xlane.f32.xlu1 %v1459_v35 }
 0x451   : > { %v7500_v59 = vpop.eup %6717 }
 0x452   : > { %v1474_v32 = vsel %vm1059_vm0, %v7500_v59, 0.0  ;;  %v7504_v60 = vpop.eup %6719 }
 0x453   : > { %1475 = vadd.xlane.f32.xlu0 %v1474_v32  ;;  %v1468_v63 = vsel %vm1059_vm0, %v7504_v60, 0.0 }
 0x457   : > { %1469 = vadd.xlane.f32.xlu0 %v1468_v63 }
 0x46d   : > { %1049 = vrot.lane.b32.xlu0 %v7288_v43, %s8960_s20 }
 0x475   : > { %v1383_v0 = vpop.xlane.xlu1 %1382 }
 0x476   : > { %v1399_v2 = vsub.f32 %v7426_v41, %v1383_v0 }
 0x478   : > { %v1430_v3 = vmul.f32 1.442695, %v1399_v2 }
 0x479   : > { %v1377_v6 = vpop.xlane.xlu1 %1376 }
 0x47a   : > { %6721 = vpow2.f32 %v1430_v3  ;;  %v1397_v8 = vsub.f32 %v7433_v47, %v1377_v6  ;;  %v1440_v47 = vpop.xlane.xlu0 %1439 }
 0x47c   : > { %v1426_v9 = vmul.f32 1.442695, %v1397_v8 }
 0x47d   : > { %v7512_v12 = vpop.permute.xlu1 %1053 }
 0x47e   : > { %6723 = vpow2.f32 %v1426_v9  ;;  %6136 = vmatprep.subr.bf16.mxu1 %v7512_v12  ;;  %v1434_v48 = vpop.xlane.xlu0 %1433 }
 0x484   : > { %v7515_v16 = vpop.eup %6721 }
 0x485   : > { %v1477_v20 = vsel %vm1059_vm0, %v7515_v16, 0.0 }
 0x486   : > { %1478 = vadd.xlane.f32.xlu1 %v1477_v20 }
 0x488   : > { %v7519_v46 = vpop.eup %6723 }
 0x489   : > { %v1471_v41 = vsel %vm1059_vm0, %v7519_v46, 0.0 }
 0x48a   : > { %1472 = vadd.xlane.f32.xlu1 %v1471_v41 }
 0x49b   : > { %1055 = vrot.lane.b32.xlu1 %v7288_v43, %s8962_s25 }
 0x4ae   : > { %v1443_v25 = vpop.xlane.xlu1 %1442 }
 0x4af   : > { %6725 = vrcp.f32 %v1443_v25 }
 0x4b0   : > { %6727 = vrcp.f32 %v1434_v48 }
 0x4b1   : > { %6729 = vrcp.f32 %v1440_v47 }
 0x4b2   : > { %v1437_v27 = vpop.xlane.xlu1 %1436 }
 0x4b3   : > { %6731 = vrcp.f32 %v1437_v27 }
 0x4b9   : > { %v6726_v58 = vpop.eup %6725 }
 0x4ba   : > { %v6728_v61 = vpop.eup %6727  ;;  %v1499_v62 = vmul.f32 %v6726_v58, %v7447_v55 }
 0x4bb   : > { %v6730_v21 = vpop.eup %6729  ;;  %v1496_v34 = vmul.f32 %v6728_v61, %v7437_v30 }
 0x4bc   : > { %v1498_v43 = vmul.f32 %v6730_v21, %v7428_v42 }
 0x4bd   : > { %v6732_v33 = vpop.eup %6731 }
 0x4be   : > { %v1497_v13 = vmul.f32 %v6732_v33, %v7451_v57  ;;  %v1513_v36 = vpack.c.bf16 %v1499_v62, %v1498_v43 }
 0x4c0   : > { %v1512_v1 = vpack.c.bf16 %v1497_v13, %v1496_v34  ;;  %v6462_v13 = vld [vmem:[%s8937_s6 + $0x8] sm:$0xff]  }
 0x4c2   : > { %6116 = vmatprep.mubr.msk.bf16.mxu0 %vm1059_vm0, %v1512_v1 }
 0x4c3   : > { %6117 = vmatmul.mubr.msk.bf16.vlgmr.msra.gmra.mrb[12].mxu0 %vm1059_vm0, %v1513_v36 }
 0x4c4   : > { %6129 = vmatpush3.bf16.msra.mxu0 %v7479_v18 }
 0x4c8   : > { %v1452_v37 = vpop.xlane.xlu0 %1451 }
 0x4ca   : > { %v1455_v40 = vpop.xlane.xlu1 %1454 }
 0x4cb   : > { %6733 = vrcp.f32 %v1455_v40  ;;  %v6463_v40 = vld [vmem:[%s8937_s6 + $0x10] sm:$0xff]  }
 0x4d0   : > { %v1464_v7 = vpop.xlane.xlu0 %1463 }
 0x4d2   : > { %v1467_v44 = vpop.xlane.xlu1 %1466 }
 0x4d4   : > { %v1446_v55 = vpop.xlane.xlu0 %1445 }
 0x4d5   : > { %6735 = vrcp.f32 %v1446_v55  ;;  %v6734_v49 = vpop.eup %6733 }
 0x4d6   : > { %6737 = vrcp.f32 %v1452_v37  ;;  %v1449_v30 = vpop.xlane.xlu1 %1448  ;;  %v1503_v23 = vmul.f32 %v6734_v49, %v7465_v29 }
 0x4d7   : > { %6739 = vrcp.f32 %v1449_v30 }
 0x4d8   : > { %v1458_v57 = vpop.xlane.xlu0 %1457 }
 0x4d9   : > { %6741 = vrcp.f32 %v1458_v57 }
 0x4da   : > { %6743 = vrcp.f32 %v1467_v44  ;;  %v1461_v42 = vpop.xlane.xlu1 %1460 }
 0x4db   : > { %6745 = vrcp.f32 %v1461_v42  ;;  %v6464_v42 = vld [vmem:[%s8937_s6 + $0x18] sm:$0xff]  }
 0x4dc   : > { %6747 = vrcp.f32 %v1464_v7 }
 0x4df   : > { %v6736_v31 = vpop.eup %6735 }
 0x4e0   : > { %v6738_v50 = vpop.eup %6737  ;;  %v1476_v18 = vpop.xlane.xlu0 %1475  ;;  %v1500_v52 = vmul.f32 %v6736_v31, %v7483_v24  ;;  %v6465_v31 = vld [vmem:[%s8937_s6 + $0x20] sm:$0xff]  }
 0x4e1   : > { %v6740_v51 = vpop.eup %6739  ;;  %v1502_v35 = vmul.f32 %v6738_v50, %v7460_v22  ;;  %v6466_v50 = vld [vmem:[%s8937_s6 + $0x28] sm:$0xff]  }
 0x4e2   : > { %v1501_v28 = vmul.f32 %v6740_v51, %v7488_v53  ;;  %v6468_v51 = vld [vmem:[%s8937_s6 + $0x38] sm:$0xff]  }
 0x4e3   : > { %v6742_v56 = vpop.eup %6741  ;;  %v1515_v3 = vpack.c.bf16 %v1503_v23, %v1502_v35 }
 0x4e4   : > { %v6744_v32 = vpop.eup %6743  ;;  %v1470_v63 = vpop.xlane.xlu0 %1469  ;;  %v1514_v0 = vpack.c.bf16 %v1501_v28, %v1500_v52  ;;  %v1504_v8 = vmul.f32 %v6742_v56, %v7492_v54 }
 0x4e5   : > { %v6746_v2 = vpop.eup %6745  ;;  %v1507_v29 = vmul.f32 %v6744_v32, %v7476_v26 }
 0x4e6   : > { %v6748_v6 = vpop.eup %6747  ;;  %6124 = vmatprep.mubr.msk.bf16.mxu1 %vm1059_vm0, %v1514_v0  ;;  %v1505_v9 = vmul.f32 %v6746_v2, %v7496_v45 }
 0x4e7   : > { %6125 = vmatmul.mubr.msk.bf16.vlgmr.msra.gmra.mrb[16].mxu1 %vm1059_vm0, %v1515_v3  ;;  %v1506_v53 = vmul.f32 %v6748_v6, %v7471_v38 }
 0x4e8   : > { %6137 = vmatpush3.bf16.msra.mxu1 %v7512_v12  ;;  %v1050_v24 = vpop.permute.xlu0 %1049  ;;  %v1516_v22 = vpack.c.bf16 %v1505_v9, %v1504_v8 }
 0x4e9   : > { %6130 = vmatprep.subr.bf16.mxu0 %v1050_v24  ;;  %v1517_v20 = vpack.c.bf16 %v1507_v29, %v1506_v53 }
 0x4ea   : > { %6131 = vmatpush3.bf16.msra.mxu0 %v1050_v24  ;;  %6132 = vmatprep.mubr.msk.bf16.mxu0 %vm1059_vm0, %v1516_v22 }
 0x4ed   : > { %6133 = vmatmul.mubr.msk.bf16.vlgmr.msra.gmra.mrb[16].mxu0 %vm1059_vm0, %v1517_v20 }
 0x513   : > { %v1479_v54 = vpop.xlane.xlu1 %1478 }
 0x514   : > { %6749 = vrcp.f32 %v1479_v54 }
 0x515   : > { %6751 = vrcp.f32 %v1470_v63 }
 0x516   : > { %6753 = vrcp.f32 %v1476_v18  ;;  %v6467_v18 = vld [vmem:[%s8937_s6 + $0x30] sm:$0xff]  }
 0x517   : > { %v1473_v26 = vpop.xlane.xlu1 %1472 }
 0x518   : > { %6755 = vrcp.f32 %v1473_v26 }
 0x51b   : > { %v1056_v45 = vpop.permute.xlu1 %1055 }
 0x51c   : > { %6138 = vmatprep.subr.bf16.mxu1 %v1056_v45 }
 0x51d   : > { %6139 = vmatpush3.bf16.msra.mxu1 %v1056_v45 }
 0x51e   : > { %v6750_v12 = vpop.eup %6749 }
 0x51f   : > { %v6752_v41 = vpop.eup %6751  ;;  %v1511_v48 = vmul.f32 %v6750_v12, %v7515_v16 }
 0x520   : > { %v6754_v47 = vpop.eup %6753  ;;  %v1508_v25 = vmul.f32 %v6752_v41, %v7504_v60 }
 0x521   : > { %v1510_v58 = vmul.f32 %v6754_v47, %v7500_v59  ;;  %v6461_v59 = vld [vmem:[%s8937_s6] sm:$0xff]  }
 0x522   : > { %v6756_v38 = vpop.eup %6755  ;;  %6144 = vmatprep.subr.bf16.mxu0 %v6461_v59 }
 0x523   : > { %v1509_v27 = vmul.f32 %v6756_v38, %v7519_v46  ;;  %v1519_v21 = vpack.c.bf16 %v1511_v48, %v1510_v58  ;;  %6145 = vmatpush3.bf16.msra.mxu0 %v6461_v59 }
 0x524   : > { %6146 = vmatprep.subr.bf16.mxu0 %v6462_v13 }
 0x525   : > { %v1518_v61 = vpack.c.bf16 %v1509_v27, %v1508_v25 }
 0x527   : > { %6140 = vmatprep.mubr.msk.bf16.mxu1 %vm1059_vm0, %v1518_v61  ;;  %6147 = vmatpush3.bf16.msra.mxu0 %v6462_v13  ;;  %v5454_v13 = vld [vmem:[%s8938_s7] ss:$0 sm:$0xff] }
 0x528   : > { %6141 = vmatmul.mubr.msk.bf16.vlgmr.msra.gmra.mrb[20].mxu1 %vm1059_vm0, %v1519_v21  ;;  %6148 = vmatprep.subr.bf16.mxu0 %v6463_v40 }
 0x529   : > { %2242 = vmatprep.mubr.bf16.mxu1 %v6985_v39 }
 0x52b   : > { %6149 = vmatpush3.bf16.msra.mxu0 %v6463_v40 }
 0x52c   : > { %6150 = vmatprep.subr.bf16.mxu0 %v6464_v42 }
 0x52f   : > { %6151 = vmatpush3.bf16.msra.mxu0 %v6464_v42 }
 0x530   : > { %6152 = vmatprep.subr.bf16.mxu0 %v6465_v31 }
 0x533   : > { %6153 = vmatpush3.bf16.msra.mxu0 %v6465_v31  ;;  %v6469_v31 = vld [vmem:[%s8941_s10] ss:$16 sps:$4 sm:$0xff]  }
 0x534   : > { %6154 = vmatprep.subr.bf16.mxu0 %v6466_v50 }
 0x537   : > { %6155 = vmatpush3.bf16.msra.mxu0 %v6466_v50  ;;  %v6471_v50 = vld [vmem:[%s8941_s10 + $0x4] ss:$16 sps:$4 sm:$0xff]  }
 0x538   : > { %6156 = vmatprep.subr.bf16.mxu0 %v6467_v18  ;;  %2210 = vmatprep.subr.bf16.mxu1 %v6471_v50 }
 0x539   : > { %2211 = vmatpush1.bf16.msra.mxu1 %v6469_v31 }
 0x53b   : > { %6157 = vmatpush3.bf16.msra.mxu0 %v6467_v18  ;;  %v6475_v18 = vld [vmem:[%s8941_s10 + $0x20] ss:$16 sps:$4 sm:$0xff]  }
 0x53c   : > { %6158 = vmatprep.subr.bf16.mxu0 %v6468_v51 }
 0x53f   : > { %6159 = vmatpush3.bf16.msra.mxu0 %v6468_v51  ;;  %v6478_v51 = vld [vmem:[%s8941_s10 + $0x28] ss:$16 sps:$4 sm:$0xff]  }
 0x596   : > { %v7552_v33 = vpop.f32.mrb[12].mxu0 }
 0x597   : > { %v7554_v62 = vpop.f32.mrb[13].mxu0 }
 0x598   : > { %v7556_v34 = vpop.f32.mrb[14].mxu0 }
 0x599   : > { %v7558_v16 = vpop.f32.mrb[15].mxu0 }
 0x5ba   : > { %v6126_v60 = vpop.f32.mrb[16].mxu1 }
 0x5bb   : > { %v1615_v46 = vpop.f32.mrb[17].mxu1 }
 0x5bc   : > { %v6127_v43 = vpop.f32.mrb[18].mxu1 }
 0x5bd   : > { %v6369_v1 = vpack.i.bf16 %v6127_v43, %v6126_v60  ;;  %v1618_v36 = vpop.f32.mrb[19].mxu1 }
 0x5be   : > { %v6379_v37 = vpack.i.bf16 %v1618_v36, %v1615_v46 }
 0x5bf   : > { %6370 = vrot.lane.b32.xlu1 %v6369_v1, %s8962_s25 }
 0x5c0   : > { %6380 = vrot.lane.b32.xlu0 %v6379_v37, %s8962_s25  ;;  %v6134_v7 = vpop.f32.mrb[16].mxu0 }
 0x5c1   : > { %v1670_v44 = vpop.f32.mrb[17].mxu0 }
 0x5c2   : > { %v6135_v55 = vpop.f32.mrb[18].mxu0 }
 0x5c3   : > { %v6374_v30 = vpack.i.bf16 %v6135_v55, %v6134_v7  ;;  %v1673_v57 = vpop.f32.mrb[19].mxu0 }
 0x5c4   : > { %v6384_v49 = vpack.i.bf16 %v1673_v57, %v1670_v44 }
 0x5c5   : > { %6375 = vrot.lane.b32.xlu1 %v6374_v30, %s8960_s20 }
 0x5c6   : > { %6385 = vrot.lane.b32.xlu0 %v6384_v49, %s8960_s20  ;;  %s635_s20 = sand.u32 1, %s6975_s22  }
 0x5c7   : > { %s5407_s24 = sshll.u32 %s635_s20, 1 }
 0x5c8   : > { %s637_s0 = scalar_lea.vmem [#allocation2], %s5407_s24  ;;  %s6991_s24 = smov [#allocation2]  }
 0x5c9   : > { %s5332_s29 = sshll.u32 %s637_s0, 4  ;;  %s6925_s30 = sshll.u32 %s6991_s24, 4  ;;  %s8891_s29 = int_to_ptr.vmem [resolvable:$true] %s5332_s29  ;;  %s6926_s30 = int_to_ptr.vmem [resolvable:$false] %s6925_s30 }
 0x5ca   : > { %s6927_s26 = scalar_lea.vmem %s6926_s30, 64  ;;  %p6928_p0 = scmp.lt.s32.totalorder %s8891_s29, %s6926_s30 }
 0x5fb   : > { %v6142_v23 = vpop.f32.mrb[20].mxu1 }
 0x5fc   : > { %v1725_v52 = vpop.f32.mrb[21].mxu1 }
 0x5fd   : > { %v6143_v28 = vpop.f32.mrb[22].mxu1 }
 0x5fe   : > { %v6394_v56 = vpack.i.bf16 %v6143_v28, %v6142_v23  ;;  %v1728_v35 = vpop.f32.mrb[23].mxu1 }
 0x5ff   : > { %v6389_v32 = vpack.i.bf16 %v1728_v35, %v1725_v52 }
 0x600   : > { %6395 = vrot.lane.b32.xlu1 %v6394_v56, %s8964_s21 }
 0x601   : > { %6390 = vrot.lane.b32.xlu0 %v6389_v32, %s8964_s21  ;;  %s8987_s21 = smov 64  }
 0x631   : > { %v6371_v63 = vpop.permute.xlu1 %6370 }
 0x632   : > { %v6381_v0 = vpop.permute.xlu0 %6380  ;;  %v6373_v3 = vunpack.i.h.bf16 %v6371_v63  ;;  %v6372_v6 = vunpack.i.l.bf16 %v6371_v63 }
 0x633   : > { %v6383_v9 = vunpack.i.h.bf16 %v6381_v0  ;;  %v6382_v29 = vunpack.i.l.bf16 %v6381_v0 }
 0x634   : > { %v1791_v54 = vsel %vm1059_vm0, %v7556_v34, %v6373_v3  ;;  %v1790_v26 = vsel %vm1059_vm0, %v7552_v33, %v6372_v6 }
 0x635   : > { %v1789_v12 = vsel %vm1059_vm0, %v7558_v16, %v6383_v9  ;;  %v1788_v41 = vsel %vm1059_vm0, %v7554_v62, %v6382_v29 }
 0x637   : > { %v6376_v2 = vpop.permute.xlu1 %6375 }
 0x638   : > { %v6386_v8 = vpop.permute.xlu0 %6385  ;;  %v6378_v24 = vunpack.i.h.bf16 %v6376_v2  ;;  %v6377_v22 = vunpack.i.l.bf16 %v6376_v2 }
 0x639   : > { %v6388_v53 = vunpack.i.h.bf16 %v6386_v8  ;;  %v6387_v20 = vunpack.i.l.bf16 %v6386_v8 }
 0x63a   : > { %v1796_v25 = vsel %vm1792_vm1, %v1791_v54, %v6378_v24  ;;  %v1795_v27 = vsel %vm1792_vm1, %v1790_v26, %v6377_v22  ;;  %v6481_v54 = vld [vmem:[%s8941_s10 + $0x40] ss:$16 sps:$4 sm:$0xff]   ;;  %v6484_v26 = vld [vmem:[%s8941_s10 + $0x48] ss:$16 sps:$4 sm:$0xff]  }
 0x63b   : > { %v1793_v21 = vsel %vm1792_vm1, %v1788_v41, %v6387_v20  ;;  %v1794_v33 = vsel %vm1792_vm1, %v1789_v12, %v6388_v53  ;;  %v6483_v53 = vld [vmem:[%s8941_s10 + $0x44] ss:$16 sps:$4 sm:$0xff]   ;;  %v6486_v20 = vld [vmem:[%s8941_s10 + $0x4c] ss:$16 sps:$4 sm:$0xff]   ;;  %v6487_v41 = vld [vmem:[%s8941_s10 + $0x60] ss:$16 sps:$4 sm:$0xff]  }
 0x63c   : > { %v6492_v12 = vld [vmem:[%s8941_s10 + $0x6c] ss:$16 sps:$4 sm:$0xff]  }
 0x672   : > { %v6396_v45 = vpop.permute.xlu1 %6395 }
 0x673   : > { %v6398_v47 = vunpack.i.h.bf16 %v6396_v45  ;;  %v6397_v38 = vunpack.i.l.bf16 %v6396_v45  ;;  %v6391_v48 = vpop.permute.xlu0 %6390  ;;  %v6489_v45 = vld [vmem:[%s8941_s10 + $0x64] ss:$16 sps:$4 sm:$0xff]  }
 0x674   : > { %v6393_v58 = vunpack.i.h.bf16 %v6391_v48  ;;  %v6392_v61 = vunpack.i.l.bf16 %v6391_v48  ;;  %v6498_v48 = vld [vmem:[%s8941_s10 + $0x8c] ss:$16 sps:$4 sm:$0xff]  }
 0x675   : > { %v1800_v34 = vsel %vm1797_vm2, %v1795_v27, %v6397_v38  ;;  %v1801_v16 = vsel %vm1797_vm2, %v1796_v25, %v6398_v47  ;;  %v6490_v47 = vld [vmem:[%s8941_s10 + $0x68] ss:$16 sps:$4 sm:$0xff]   ;;  %v6495_v38 = vld [vmem:[%s8941_s10 + $0x84] ss:$16 sps:$4 sm:$0xff]   ;;  %v6493_v25 = vld [vmem:[%s8941_s10 + $0x80] ss:$16 sps:$4 sm:$0xff]  }
 0x676   : > { %v1803_v60 = vpack.c.bf16 %v1801_v16, %v1800_v34  ;;  %v1798_v62 = vsel %vm1797_vm2, %v1793_v21, %v6392_v61  ;;  %v1799_v46 = vsel %vm1797_vm2, %v1794_v33, %v6393_v58  ;;  %v6496_v27 = vld [vmem:[%s8941_s10 + $0x88] ss:$16 sps:$4 sm:$0xff]   ;;  %v6501_v58 = vld [vmem:[%s8941_s10 + $0xa4] ss:$16 sps:$4 sm:$0xff]   ;;  %v6504_v61 = vld [vmem:[%s8941_s10 + $0xac] ss:$16 sps:$4 sm:$0xff]  }
 0x677   : > { %v1802_v59 = vpack.c.bf16 %v1799_v46, %v1798_v62  ;;  %v6499_v21 = vld [vmem:[%s8941_s10 + $0xa0] ss:$16 sps:$4 sm:$0xff]   ;;  %v6502_v33 = vld [vmem:[%s8941_s10 + $0xa8] ss:$16 sps:$4 sm:$0xff]   ;;  %v6507_v34 = vld [vmem:[%s8941_s10 + $0xc4] ss:$16 sps:$4 sm:$0xff]  }
 0x678   : > { %v6510_v16 = vld [vmem:[%s8941_s10 + $0xcc] ss:$16 sps:$4 sm:$0xff]   ;;  %v6508_v62 = vld [vmem:[%s8941_s10 + $0xc8] ss:$16 sps:$4 sm:$0xff]   ;;  %v6513_v46 = vld [vmem:[%s8941_s10 + $0xe4] ss:$16 sps:$4 sm:$0xff]  }
 0x679   : > { %6160 = vmatprep.mubr.bf16.mxu0 %v1802_v59  ;;  %v6516_v59 = vld [vmem:[%s8941_s10 + $0xec] ss:$16 sps:$4 sm:$0xff]  }
 0x67a   : > { %6161 = vmatmul.mubr.bf16.vlgmr.msra.gmra.mrb[20].mxu0 %v1803_v60  ;;  %v6505_v60 = vld [vmem:[%s8941_s10 + $0xc0] ss:$16 sps:$4 sm:$0xff]  }
 0x67b   : > { %2295 = vmatprep.mubr.bf16.mxu0 %v6985_v39 }
 0x74d   : > { %v6162_v43 = vpop.f32.mrb[20].mxu0 }
 0x74e   : > { %v1909_v1 = vpop.f32.mrb[21].mxu0  ;;  %v1918_v7 = vadd.f32 %v6162_v43, %v5454_v13  ;;  %v6514_v43 = vld [vmem:[%s8941_s10 + $0xe8] ss:$16 sps:$4 sm:$0xff]  }
 0x74f   : > { %v1910_v36 = vadd.f32 %v5454_v13, %v1909_v1  ;;  %v6163_v37 = vpop.f32.mrb[22].mxu0 }
 0x750   : > { %v1912_v40 = vpop.f32.mrb[23].mxu0  ;;  %v1921_v57 = vadd.f32 %v6163_v37, %v5454_v13  ;;  %v1926_v42 = vadd.f32 %v1918_v7, %v7260_v10  ;;  %v6477_v10 = vld [vmem:[%s8941_s10 + $0x24] ss:$16 sps:$4 sm:$0xff]  }
 0x751   : > { %v1913_v44 = vadd.f32 %v5454_v13, %v1912_v40  ;;  %v1924_v55 = vadd.f32 %v1910_v36, %v7253_v4  ;;  %v6472_v4 = vld [vmem:[%s8941_s10 + $0x8] ss:$16 sps:$4 sm:$0xff]   ;;  %2212 = vmatprep.subr.bf16.mxu1 %v6477_v10  ;;  %v6511_v13 = vld [vmem:[%s8941_s10 + $0xe0] ss:$16 sps:$4 sm:$0xff]  }
 0x752   : > { %v1927_v49 = vadd.f32 %v1921_v57, %v7262_v11  ;;  %v6480_v11 = vld [vmem:[%s8941_s10 + $0x2c] ss:$16 sps:$4 sm:$0xff]   ;;  %2213 = vmatpush1.bf16.msra.mxu1 %v6475_v18 }
 0x753   : > { %1930 = vadd.xlane.f32.xlu0 %v1924_v55  ;;  %v1925_v30 = vadd.f32 %v1913_v44, %v7255_v5  ;;  %v6474_v5 = vld [vmem:[%s8941_s10 + $0xc] ss:$16 sps:$4 sm:$0xff]   ;;  %2214 = vmatprep.subr.bf16.mxu1 %v6483_v53  ;;  %v6520_v53 = vld [vmem:[%s8943_s12 + $0x80] sm:$0xff]  }
 0x754   : > { %2263 = vmatprep.subr.bf16.mxu0 %v6474_v5 }
 0x755   : > { %1932 = vadd.xlane.f32.xlu1 %v1925_v30  ;;  %2264 = vmatpush1.bf16.msra.mxu0 %v6472_v4  ;;  %v5463_v4 = vld [vmem:[%s8939_s8] ss:$0 sm:$0xff] }
 0x756   : > { %2265 = vmatprep.subr.bf16.mxu0 %v6480_v11  ;;  %2215 = vmatpush1.bf16.msra.mxu1 %v6481_v54  ;;  %v6522_v54 = vld [vmem:[%s8943_s12 + $0xc8] sm:$0xff]  }
 0x757   : > { %1934 = vadd.xlane.f32.xlu0 %v1926_v42  ;;  %2216 = vmatprep.subr.bf16.mxu1 %v6489_v45  ;;  %v6524_v45 = vld [vmem:[%s8943_s12 + $0x88] sm:$0xff]  }
 0x759   : > { %2266 = vmatpush1.bf16.msra.mxu0 %v6478_v51 }
 0x75a   : > { %2267 = vmatprep.subr.bf16.mxu0 %v6486_v20  ;;  %2217 = vmatpush1.bf16.msra.mxu1 %v6487_v41  ;;  %v6521_v20 = vld [vmem:[%s8943_s12 + $0x48] sm:$0xff]   ;;  %v6526_v41 = vld [vmem:[%s8943_s12 + $0xd0] sm:$0xff]  }
 0x75b   : > { %1936 = vadd.xlane.f32.xlu0 %v1927_v49  ;;  %2218 = vmatprep.subr.bf16.mxu1 %v6495_v38  ;;  %v6528_v38 = vld [vmem:[%s8943_s12 + $0x90] sm:$0xff]  }
 0x75d   : > { %2268 = vmatpush1.bf16.msra.mxu0 %v6484_v26  ;;  %v6523_v26 = vld [vmem:[%s8943_s12 + $0x8] sm:$0xff]  }
 0x75e   : > { %2269 = vmatprep.subr.bf16.mxu0 %v6492_v12  ;;  %2219 = vmatpush1.bf16.msra.mxu1 %v6493_v25  ;;  %v6525_v12 = vld [vmem:[%s8943_s12 + $0x50] sm:$0xff]   ;;  %v6530_v25 = vld [vmem:[%s8943_s12 + $0xd8] sm:$0xff]  }
 0x75f   : > { %2220 = vmatprep.subr.bf16.mxu1 %v6501_v58  ;;  %v6532_v58 = vld [vmem:[%s8943_s12 + $0x98] sm:$0xff]  }
 0x761   : > { %2270 = vmatpush1.bf16.msra.mxu0 %v6490_v47  ;;  %v6527_v47 = vld [vmem:[%s8943_s12 + $0x10] sm:$0xff]  }
 0x762   : > { %2271 = vmatprep.subr.bf16.mxu0 %v6498_v48  ;;  %2221 = vmatpush1.bf16.msra.mxu1 %v6499_v21  ;;  %v6529_v48 = vld [vmem:[%s8943_s12 + $0x58] sm:$0xff]   ;;  %v6534_v21 = vld [vmem:[%s8943_s12 + $0xe0] sm:$0xff]  }
 0x763   : > { %2222 = vmatprep.subr.bf16.mxu1 %v6507_v34  ;;  %v6536_v34 = vld [vmem:[%s8943_s12 + $0xa0] sm:$0xff]  }
 0x765   : > { %2272 = vmatpush1.bf16.msra.mxu0 %v6496_v27  ;;  %v6531_v27 = vld [vmem:[%s8943_s12 + $0x18] sm:$0xff]  }
 0x766   : > { %2273 = vmatprep.subr.bf16.mxu0 %v6504_v61  ;;  %2223 = vmatpush1.bf16.msra.mxu1 %v6505_v60  ;;  %v6533_v61 = vld [vmem:[%s8943_s12 + $0x60] sm:$0xff]   ;;  %v6538_v60 = vld [vmem:[%s8943_s12 + $0xe8] sm:$0xff]  }
 0x767   : > { %2224 = vmatprep.subr.bf16.mxu1 %v6513_v46  ;;  %v6540_v46 = vld [vmem:[%s8943_s12 + $0xa8] sm:$0xff]  }
 0x769   : > { %2274 = vmatpush1.bf16.msra.mxu0 %v6502_v33  ;;  %v6535_v33 = vld [vmem:[%s8943_s12 + $0x20] sm:$0xff]  }
 0x76a   : > { %2275 = vmatprep.subr.bf16.mxu0 %v6510_v16  ;;  %2225 = vmatpush1.bf16.msra.mxu1 %v6511_v13  ;;  %v6537_v16 = vld [vmem:[%s8943_s12 + $0x68] sm:$0xff]   ;;  %v6542_v13 = vld [vmem:[%s8943_s12 + $0xf0] sm:$0xff]  }
 0x76d   : > { %2276 = vmatpush1.bf16.msra.mxu0 %v6508_v62  ;;  %v6539_v62 = vld [vmem:[%s8943_s12 + $0x28] sm:$0xff]  }
 0x76e   : > { %2277 = vmatprep.subr.bf16.mxu0 %v6516_v59  ;;  %v6541_v59 = vld [vmem:[%s8943_s12 + $0x70] sm:$0xff]  }
 0x771   : > { %2278 = vmatpush1.bf16.msra.mxu0 %v6514_v43  ;;  %v6543_v43 = vld [vmem:[%s8943_s12 + $0x30] sm:$0xff]  }
 0x7e0   : > { %v1931_v23 = vpop.xlane.xlu0 %1930 }
 0x7e1   : > { %v1938_v52 = vmul.f32 0.0078125, %v1931_v23  ;;  %v5464_v23 = vld [vmem:[%s8940_s9] ss:$0 sm:$0xff] }
 0x7e2   : > { %v1933_v28 = vpop.xlane.xlu1 %1932 }
 0x7e3   : > { %v7638_v56 = vsub.f32 %v1924_v55, %v1938_v52  ;;  %v1939_v35 = vmul.f32 0.0078125, %v1933_v28 }
 0x7e4   : > { %v1935_v32 = vpop.xlane.xlu0 %1934 }
 0x7e5   : > { %v7640_v63 = vsub.f32 %v1925_v30, %v1939_v35  ;;  %v1940_v0 = vmul.f32 0.0078125, %v1935_v32  ;;  %v1946_v2 = vmul.f32 %v7638_v56, %v7638_v56 }
 0x7e7   : > { %v7644_v3 = vsub.f32 %v1926_v42, %v1940_v0  ;;  %1950 = vadd.xlane.f32.xlu0 %v1946_v2  ;;  %v1947_v6 = vmul.f32 %v7640_v63, %v7640_v63 }
 0x7e8   : > { %v1937_v8 = vpop.xlane.xlu0 %1936 }
 0x7e9   : > { %v1941_v9 = vmul.f32 0.0078125, %v1937_v8  ;;  %1952 = vadd.xlane.f32.xlu1 %v1947_v6  ;;  %v1948_v29 = vmul.f32 %v7644_v3, %v7644_v3 }
 0x7eb   : > { %v7650_v24 = vsub.f32 %v1927_v49, %v1941_v9  ;;  %1954 = vadd.xlane.f32.xlu0 %v1948_v29  ;;  %v6517_v29 = vld [vmem:[%s8943_s12 + $0x40] sm:$0xff]  }
 0x7ec   : > { %5878 = vmatprep.subr.bf16.mxu1 %v6517_v29 }
 0x7ed   : > { %v1949_v22 = vmul.f32 %v7650_v24, %v7650_v24 }
 0x7ef   : > { %1956 = vadd.xlane.f32.xlu1 %v1949_v22  ;;  %v6519_v22 = vld [vmem:[%s8943_s12] sm:$0xff]  }
 0x874   : > { %v1951_v1 = vpop.xlane.xlu0 %1950 }
 0x875   : > { %v1958_v36 = vmul.f32 0.0078125, %v1951_v1  ;;  %v6544_v1 = vld [vmem:[%s8943_s12 + $0xb0] sm:$0xff]  }
 0x876   : > { %v1953_v37 = vpop.xlane.xlu1 %1952 }
 0x877   : > { %v1962_v40 = vadd.f32 1e-05, %v1958_v36  ;;  %v1959_v7 = vmul.f32 0.0078125, %v1953_v37  ;;  %v6545_v36 = vld [vmem:[%s8943_s12 + $0x78] sm:$0xff]  }
 0x878   : > { %v1955_v44 = vpop.xlane.xlu0 %1954  ;;  %v6546_v37 = vld [vmem:[%s8943_s12 + $0xf8] sm:$0xff]  }
 0x879   : > { %6757 = vrsqrt.f32 %v1962_v40  ;;  %v1963_v55 = vadd.f32 1e-05, %v1959_v7  ;;  %v1960_v30 = vmul.f32 0.0078125, %v1955_v44  ;;  %v6547_v40 = vld [vmem:[%s8943_s12 + $0x38] sm:$0xff]   ;;  %v2028_v44 = vld [vmem:[%s8942_s11] sm:$0xf] }
 0x87a   : > { %v6548_v7 = vld [vmem:[%s8943_s12 + $0xb8] sm:$0xff]  }
 0x87b   : > { %6759 = vrsqrt.f32 %v1963_v55  ;;  %v1964_v57 = vadd.f32 1e-05, %v1960_v30  ;;  %v7850_v55 = vrot.slane %v2028_v44, %v7270_v15  ;;  %v7853_v30 = vrot.slane %v2028_v44, %v7280_v19 }
 0x87c   : > { %v1957_v42 = vpop.xlane.xlu1 %1956 }
 0x87d   : > { %6761 = vrsqrt.f32 %v1964_v57  ;;  %v1961_v49 = vmul.f32 0.0078125, %v1957_v42  ;;  %v2044_v57 = vsub.s32 3, %v7267_v14 }
 0x87f   : > { %v1965_v31 = vadd.f32 1e-05, %v1961_v49 }
 0x881   : > { %6763 = vrsqrt.f32 %v1965_v31  ;;  %v7857_v31 = vrot.slane %v2028_v44, %v7276_v17 }
 0x883   : > { %v6758_v50 = vpop.eup %6757 }
 0x884   : > { %v1970_v5 = vmul.f32 %v6758_v50, %v7638_v56 }
 0x885   : > { %v6760_v10 = vpop.eup %6759 }
 0x886   : > { %v1971_v11 = vmul.f32 %v6760_v10, %v7640_v63  ;;  %v1980_v18 = vmul.f32 %v5463_v4, %v1970_v5 }
 0x887   : > { %v6762_v51 = vpop.eup %6761 }
 0x888   : > { %v1981_v52 = vmul.f32 %v5463_v4, %v1971_v11  ;;  %v7734_v28 = vadd.f32 %v5464_v23, %v1980_v18  ;;  %v1972_v32 = vmul.f32 %v6762_v51, %v7644_v3  ;;  %v7863_v11 = vrot.slane %v2028_v44, %v2044_v57 }
 0x88a   : > { %v7736_v35 = vadd.f32 %v5464_v23, %v1981_v52  ;;  %v1982_v63 = vmul.f32 %v5463_v4, %v1972_v32 }
 0x88b   : > { %v6764_v0 = vpop.eup %6763 }
 0x88c   : > { %v1994_v56 = vpack.c.bf16 %v7736_v35, %v7734_v28  ;;  %v1973_v2 = vmul.f32 %v6764_v0, %v7650_v24  ;;  %v7746_v9 = vadd.f32 %v5464_v23, %v1982_v63  ;;  %v6518_v24 = vld [vmem:[%s8943_s12 + $0xc0] sm:$0xff]  }
 0x88d   : > { %5906 = vmatprep.subr.bf16.mxu0 %v6518_v24 }
 0x88e   : > { %2243 = vmatmul.mubr.bf16.vlgmr.msra.gmra.mrb[24].mxu1 %v1994_v56  ;;  %2296 = vmatmul.mubr.bf16.vlgmr.msra.gmra.mrb[24].mxu0 %v1994_v56  ;;  %v1983_v6 = vmul.f32 %v5463_v4, %v1973_v2 }
 0x88f   : > { %2252 = vmatprep.mubr.bf16.mxu1 %v6985_v39  ;;  %2305 = vmatprep.mubr.bf16.mxu0 %v6985_v39 }
 0x890   : > { %v7744_v8 = vadd.f32 %v5464_v23, %v1983_v6  ;;  %5879 = vmatpush3.bf16.msra.mxu1 %v6519_v22  ;;  %5907 = vmatpush3.bf16.msra.mxu0 %v6520_v53 }
 0x891   : > { %5880 = vmatprep.subr.bf16.mxu1 %v6521_v20  ;;  %5908 = vmatprep.subr.bf16.mxu0 %v6522_v54 }
 0x892   : > { %v1995_v3 = vpack.c.bf16 %v7744_v8, %v7746_v9 }
 0x894   : > { %5881 = vmatpush3.bf16.msra.mxu1 %v6523_v26  ;;  %5909 = vmatpush3.bf16.msra.mxu0 %v6524_v45 }
 0x895   : > { %5882 = vmatprep.subr.bf16.mxu1 %v6525_v12  ;;  %5910 = vmatprep.subr.bf16.mxu0 %v6526_v41 }
 0x896   : > { %2253 = vmatmul.mubr.bf16.gmra.mrb[28].mxu1 %v1995_v3  ;;  %2306 = vmatmul.mubr.bf16.gmra.mrb[28].mxu0 %v1995_v3 }
 0x898   : > { %5883 = vmatpush3.bf16.msra.mxu1 %v6527_v47  ;;  %5911 = vmatpush3.bf16.msra.mxu0 %v6528_v38 }
 0x899   : > { %5884 = vmatprep.subr.bf16.mxu1 %v6529_v48  ;;  %5912 = vmatprep.subr.bf16.mxu0 %v6530_v25 }
 0x89c   : > { %5885 = vmatpush3.bf16.msra.mxu1 %v6531_v27  ;;  %5913 = vmatpush3.bf16.msra.mxu0 %v6532_v58 }
 0x89d   : > { %5886 = vmatprep.subr.bf16.mxu1 %v6533_v61  ;;  %5914 = vmatprep.subr.bf16.mxu0 %v6534_v21 }
 0x8a0   : > { %5887 = vmatpush3.bf16.msra.mxu1 %v6535_v33  ;;  %5915 = vmatpush3.bf16.msra.mxu0 %v6536_v34 }
 0x8a1   : > { %5888 = vmatprep.subr.bf16.mxu1 %v6537_v16  ;;  %5916 = vmatprep.subr.bf16.mxu0 %v6538_v60 }
 0x8a4   : > { %5889 = vmatpush3.bf16.msra.mxu1 %v6539_v62  ;;  %5917 = vmatpush3.bf16.msra.mxu0 %v6540_v46 }
 0x8a5   : > { %5890 = vmatprep.subr.bf16.mxu1 %v6541_v59  ;;  %5918 = vmatprep.subr.bf16.mxu0 %v6542_v13 }
 0x8a8   : > { %5891 = vmatpush3.bf16.msra.mxu1 %v6543_v43  ;;  %5919 = vmatpush3.bf16.msra.mxu0 %v6544_v1 }
 0x8a9   : > { %5892 = vmatprep.subr.bf16.mxu1 %v6545_v36  ;;  %5920 = vmatprep.subr.bf16.mxu0 %v6546_v37 }
 0x8ac   : > { %5893 = vmatpush3.bf16.msra.mxu1 %v6547_v40  ;;  %5921 = vmatpush3.bf16.msra.mxu0 %v6548_v7 }
 0x961   : > { %v2244_v42 = vpop.f32.mrb[24].mxu1  ;;  %v2297_v49 = vpop.f32.mrb[24].mxu0 }
 0x962   : > { %v2245_v50 = vadd.f32 %v2244_v42, %v7850_v55  ;;  %v2298_v4 = vadd.f32 %v2297_v49, %v7853_v30  ;;  %v2246_v5 = vpop.f32.mrb[25].mxu1  ;;  %v2299_v10 = vpop.f32.mrb[25].mxu0 }
 0x963   : > { %v2248_v18 = vpop.f32.mrb[26].mxu1  ;;  %v2301_v51 = vpop.f32.mrb[26].mxu0  ;;  %v7866_v32 = vadd.f32 %v2246_v5, %v7857_v31  ;;  %v7876_v24 = vadd.f32 %v2299_v10, %v7863_v11 }
 0x964   : > { %v2332_v23 = vmul.f32 0.044715, %v2245_v50  ;;  %v2334_v52 = vmul.f32 0.044715, %v2298_v4  ;;  %v2249_v0 = vadd.f32 %v2248_v18, %v7850_v55  ;;  %v7870_v56 = vadd.f32 %v2301_v51, %v7853_v30  ;;  %v2250_v2 = vpop.f32.mrb[27].mxu1  ;;  %v2303_v63 = vpop.f32.mrb[27].mxu0 }
 0x965   : > { %v7873_v29 = vadd.f32 %v2250_v2, %v7857_v31  ;;  %v7879_v53 = vadd.f32 %v2303_v63, %v7863_v11  ;;  %v7881_v20 = vmul.f32 0.5, %v2245_v50  ;;  %v2333_v12 = vmul.f32 0.044715, %v7866_v32 }
 0x966   : > { %v2348_v6 = vmul.f32 %v2332_v23, %v2245_v50  ;;  %v2350_v3 = vmul.f32 %v2334_v52, %v2298_v4  ;;  %v2336_v22 = vmul.f32 0.044715, %v2249_v0  ;;  %v2338_v45 = vmul.f32 0.044715, %v7870_v56 }
 0x967   : > { %v2337_v47 = vmul.f32 0.044715, %v7873_v29  ;;  %v7886_v27 = vmul.f32 0.5, %v2298_v4  ;;  %v2335_v34 = vmul.f32 0.044715, %v7876_v24  ;;  %v2349_v40 = vmul.f32 %v2333_v12, %v7866_v32 }
 0x968   : > { %v2364_v54 = vmul.f32 %v2348_v6, %v2245_v50  ;;  %v2366_v26 = vmul.f32 %v2350_v3, %v2298_v4  ;;  %v2352_v41 = vmul.f32 %v2336_v22, %v2249_v0  ;;  %v2354_v61 = vmul.f32 %v2338_v45, %v7870_v56 }
 0x969   : > { %v2254_v38 = vpop.f32.mrb[28].mxu1  ;;  %v2307_v48 = vpop.f32.mrb[28].mxu0  ;;  %v2339_v60 = vmul.f32 0.044715, %v7879_v53  ;;  %v2353_v44 = vmul.f32 %v2337_v47, %v7873_v29  ;;  %v2351_v5 = vmul.f32 %v2335_v34, %v7876_v24  ;;  %v2365_v63 = vmul.f32 %v2349_v40, %v7866_v32 }
 0x96a   : > { %v2380_v25 = vadd.f32 %v2364_v54, %v2245_v50  ;;  %v2382_v58 = vadd.f32 %v2366_v26, %v2298_v4  ;;  %v2256_v21 = vpop.f32.mrb[29].mxu1  ;;  %v2309_v33 = vpop.f32.mrb[29].mxu0  ;;  %v2368_v16 = vmul.f32 %v2352_v41, %v2249_v0  ;;  %v7892_v62 = vadd.f32 %v2254_v38, %v7850_v55 }
 0x96b   : > { %v2258_v46 = vpop.f32.mrb[30].mxu1  ;;  %v2311_v59 = vpop.f32.mrb[30].mxu0  ;;  %v2370_v1 = vmul.f32 %v2354_v61, %v7870_v56  ;;  %v7898_v42 = vadd.f32 %v2307_v48, %v7853_v30  ;;  %v7903_v4 = vadd.f32 %v2256_v21, %v7857_v31  ;;  %v2355_v18 = vmul.f32 %v2339_v60, %v7879_v53 }
 0x96c   : > { %v2396_v13 = vmul.f32 0.7978846, %v2380_v25  ;;  %v2398_v43 = vmul.f32 0.7978846, %v2382_v58  ;;  %v2260_v36 = vpop.f32.mrb[31].mxu1  ;;  %v2313_v37 = vpop.f32.mrb[31].mxu0  ;;  %v2384_v7 = vadd.f32 %v2368_v16, %v2249_v0  ;;  %v7909_v52 = vadd.f32 %v2309_v33, %v7863_v11 }
 0x96d   : > { %v2386_v49 = vadd.f32 %v2370_v1, %v7870_v56  ;;  %v2340_v50 = vmul.f32 0.044715, %v7892_v62  ;;  %v2341_v23 = vmul.f32 0.044715, %v7903_v4  ;;  %v7912_v2 = vadd.f32 %v2258_v46, %v7850_v55 }
 0x96e   : > { %6765 = vtanh.f32 %v2396_v13  ;;  %v2400_v10 = vmul.f32 0.7978846, %v2384_v7  ;;  %v2369_v6 = vmul.f32 %v2353_v44, %v7873_v29  ;;  %v7917_v3 = vadd.f32 %v2311_v59, %v7853_v30 }
 0x96f   : > { %6767 = vtanh.f32 %v2398_v43  ;;  %v2402_v51 = vmul.f32 0.7978846, %v2386_v49  ;;  %v2356_v22 = vmul.f32 %v2340_v50, %v7892_v62  ;;  %v2342_v54 = vmul.f32 0.044715, %v7898_v42 }
 0x970   : > { %6769 = vtanh.f32 %v2400_v10  ;;  %v2343_v26 = vmul.f32 0.044715, %v7909_v52  ;;  %v2320_v45 = vmul.f32 0.5, %v2249_v0  ;;  %v2357_v12 = vmul.f32 %v2341_v23, %v7903_v4 }
 0x971   : > { %6771 = vtanh.f32 %v2402_v51  ;;  %v7924_v55 = vadd.f32 %v2260_v36, %v7857_v31  ;;  %v7927_v41 = vadd.f32 %v2313_v37, %v7863_v11  ;;  %v2367_v47 = vmul.f32 %v2351_v5, %v7876_v24 }
 0x972   : > { %v2371_v30 = vmul.f32 %v2355_v18, %v7879_v53  ;;  %v2344_v38 = vmul.f32 0.044715, %v7912_v2  ;;  %v2346_v48 = vmul.f32 0.044715, %v7917_v3  ;;  %v2359_v25 = vmul.f32 %v2343_v26, %v7909_v52 }
 0x973   : > { %v2345_v0 = vmul.f32 0.044715, %v7924_v55  ;;  %v2347_v58 = vmul.f32 0.044715, %v7927_v41  ;;  %v2381_v31 = vadd.f32 %v2365_v63, %v7866_v32  ;;  %v2322_v61 = vmul.f32 0.5, %v7870_v56 }
 0x974   : > { %v2372_v11 = vmul.f32 %v2356_v22, %v7892_v62  ;;  %v2358_v21 = vmul.f32 %v2342_v54, %v7898_v42  ;;  %v2385_v33 = vadd.f32 %v2369_v6, %v7873_v29  ;;  %v2373_v34 = vmul.f32 %v2357_v12, %v7903_v4 }
 0x975   : > { %v2361_v16 = vmul.f32 %v2345_v0, %v7924_v55  ;;  %v2363_v60 = vmul.f32 %v2347_v58, %v7927_v41  ;;  %v2397_v46 = vmul.f32 0.7978846, %v2381_v31  ;;  %v2360_v13 = vmul.f32 %v2344_v38, %v7912_v2 }
 0x976   : > { %v2401_v43 = vmul.f32 0.7978846, %v2385_v33  ;;  %v2383_v1 = vadd.f32 %v2367_v47, %v7876_v24  ;;  %v2387_v56 = vadd.f32 %v2371_v30, %v7879_v53  ;;  %v2375_v37 = vmul.f32 %v2359_v25, %v7909_v52 }
 0x977   : > { %v2362_v40 = vmul.f32 %v2346_v48, %v7917_v3  ;;  %v2377_v7 = vmul.f32 %v2361_v16, %v7924_v55  ;;  %6773 = vtanh.f32 %v2397_v46  ;;  %v2374_v10 = vmul.f32 %v2358_v21, %v7898_v42 }
 0x978   : > { %v6766_v59 = vpop.eup %6765  ;;  %6775 = vtanh.f32 %v2401_v43  ;;  %v2399_v44 = vmul.f32 0.7978846, %v2383_v1  ;;  %v2403_v49 = vmul.f32 0.7978846, %v2387_v56  ;;  %v2379_v18 = vmul.f32 %v2363_v60, %v7927_v41 }
 0x979   : > { %v6768_v36 = vpop.eup %6767  ;;  %v2428_v50 = vadd.f32 1.0, %v6766_v59  ;;  %v2389_v23 = vadd.f32 %v2373_v34, %v7903_v4  ;;  %v2376_v6 = vmul.f32 %v2360_v13, %v7912_v2  ;;  %v2393_v54 = vadd.f32 %v2377_v7, %v7924_v55 }
 0x97a   : > { %v6770_v5 = vpop.eup %6769  ;;  %v2430_v51 = vadd.f32 1.0, %v6768_v36  ;;  %6777 = vtanh.f32 %v2399_v44  ;;  %v2378_v26 = vmul.f32 %v2362_v40, %v7917_v3  ;;  %v2391_v25 = vadd.f32 %v2375_v37, %v7909_v52 }
 0x97b   : > { %v6772_v63 = vpop.eup %6771  ;;  %v2432_v22 = vadd.f32 1.0, %v6770_v5  ;;  %6779 = vtanh.f32 %v2403_v49  ;;  %v2405_v47 = vmul.f32 0.7978846, %v2389_v23  ;;  %v2444_v30 = vmul.f32 %v2428_v50, %v7881_v20 }
 0x97c   : > { %v2434_v12 = vadd.f32 1.0, %v6772_v63  ;;  %v2409_v48 = vmul.f32 0.7978846, %v2393_v54  ;;  %v2446_v0 = vmul.f32 %v2430_v51, %v7886_v27  ;;  %v2395_v31 = vadd.f32 %v2379_v18, %v7927_v41 }
 0x97d   : > { %v2448_v38 = vmul.f32 %v2432_v22, %v2320_v45  ;;  %6781 = vtanh.f32 %v2405_v47  ;;  %v2407_v33 = vmul.f32 0.7978846, %v2391_v25  ;;  %v2388_v60 = vadd.f32 %v2372_v11, %v7892_v62 }
 0x97e   : > { %v2450_v58 = vmul.f32 %v2434_v12, %v2322_v61  ;;  %6783 = vtanh.f32 %v2409_v48  ;;  %v2411_v16 = vmul.f32 0.7978846, %v2395_v31  ;;  %v2392_v46 = vadd.f32 %v2376_v6, %v7912_v2 }
 0x97f   : > { %v2460_v21 = vpack.c.bf16 %v2448_v38, %v2444_v30  ;;  %6785 = vtanh.f32 %v2407_v33  ;;  %v2390_v20 = vadd.f32 %v2374_v10, %v7898_v42  ;;  %v2404_v59 = vmul.f32 0.7978846, %v2388_v60 }
 0x980   : > { %v2462_v34 = vpack.c.bf16 %v2450_v58, %v2446_v0  ;;  %6787 = vtanh.f32 %v2411_v16  ;;  %v2408_v27 = vmul.f32 0.7978846, %v2392_v46  ;;  %v2394_v61 = vadd.f32 %v2378_v26, %v7917_v3 }
 0x981   : > { %v6774_v45 = vpop.eup %6773  ;;  %v2317_v43 = vmul.f32 0.5, %v7866_v32  ;;  %v2406_v56 = vmul.f32 0.7978846, %v2390_v20  ;;  %v2321_v36 = vmul.f32 0.5, %v7873_v29  ;;  %6789 = vtanh.f32 %v2404_v59 }
 0x982   : > { %v6776_v13 = vpop.eup %6775  ;;  %v2429_v1 = vadd.f32 1.0, %v6774_v45  ;;  %v2410_v11 = vmul.f32 0.7978846, %v2394_v61  ;;  %6791 = vtanh.f32 %v2408_v27  ;;  %v2319_v5 = vmul.f32 0.5, %v7876_v24 }
 0x983   : > { %v2433_v37 = vadd.f32 1.0, %v6776_v13  ;;  %6793 = vtanh.f32 %v2406_v56  ;;  %v2323_v10 = vmul.f32 0.5, %v7879_v53  ;;  %v2325_v22 = vmul.f32 0.5, %v7903_v4 }
 0x984   : > { %v6778_v40 = vpop.eup %6777  ;;  %v2445_v44 = vmul.f32 %v2429_v1, %v2317_v43  ;;  %6795 = vtanh.f32 %v2410_v11  ;;  %v2329_v54 = vmul.f32 0.5, %v7924_v55  ;;  %v2327_v48 = vmul.f32 0.5, %v7909_v52 }
 0x985   : > { %v6780_v7 = vpop.eup %6779  ;;  %v2449_v49 = vmul.f32 %v2433_v37, %v2321_v36  ;;  %v2431_v50 = vadd.f32 1.0, %v6778_v40  ;;  %v2331_v25 = vmul.f32 0.5, %v7927_v41  ;;  %v2328_v46 = vmul.f32 0.5, %v7912_v2 }
 0x986   : > { %v2435_v18 = vadd.f32 1.0, %v6780_v7  ;;  %v2326_v52 = vmul.f32 0.5, %v7898_v42  ;;  %v5497_v42 = vld [vmem:[%s8944_s13] ss:$0 sm:$0xff] }
 0x987   : > { %v6782_v32 = vpop.eup %6781  ;;  %v2461_v51 = vpack.c.bf16 %v2449_v49, %v2445_v44  ;;  %v2447_v29 = vmul.f32 %v2431_v50, %v2319_v5 }
 0x988   : > { %v6784_v23 = vpop.eup %6783  ;;  %v2451_v63 = vmul.f32 %v2435_v18, %v2323_v10  ;;  %v2437_v6 = vadd.f32 1.0, %v6782_v32 }
 0x989   : > { %2763 = vmatprep.mubr.bf16.mxu1 %v2461_v51  ;;  %v2441_v26 = vadd.f32 1.0, %v6784_v23  ;;  %v6786_v12 = vpop.eup %6785 }
 0x98a   : > { %v2463_v47 = vpack.c.bf16 %v2451_v63, %v2447_v29  ;;  %2764 = vmatmul.mubr.bf16.vlgmr.msra.gmra.mrb[32].mxu1 %v2460_v21  ;;  %v6788_v24 = vpop.eup %6787  ;;  %v2453_v30 = vmul.f32 %v2437_v6, %v2325_v22  ;;  %v2439_v38 = vadd.f32 1.0, %v6786_v12  ;;  %v2324_v21 = vmul.f32 0.5, %v7892_v62 }
 0x98b   : > { %v2457_v53 = vmul.f32 %v2441_v26, %v2329_v54  ;;  %v2443_v0 = vadd.f32 1.0, %v6788_v24  ;;  %v6790_v58 = vpop.eup %6789 }
 0x98c   : > { %2812 = vmatprep.mubr.bf16.mxu0 %v2463_v47  ;;  %v6792_v4 = vpop.eup %6791  ;;  %v2455_v33 = vmul.f32 %v2439_v38, %v2327_v48  ;;  %v2436_v16 = vadd.f32 1.0, %v6790_v58 }
 0x98d   : > { %2813 = vmatmul.mubr.bf16.vlgmr.msra.gmra.mrb[32].mxu0 %v2462_v34  ;;  %v2465_v31 = vpack.c.bf16 %v2457_v53, %v2453_v30  ;;  %v2459_v55 = vmul.f32 %v2443_v0, %v2331_v25  ;;  %v6794_v60 = vpop.eup %6793  ;;  %v2440_v20 = vadd.f32 1.0, %v6792_v4  ;;  %v2330_v34 = vmul.f32 0.5, %v7917_v3 }
 0x98e   : > { %v6796_v45 = vpop.eup %6795  ;;  %v2438_v41 = vadd.f32 1.0, %v6794_v60  ;;  %v2452_v27 = vmul.f32 %v2436_v16, %v2324_v21  ;;  %v6554_v16 = vld [vmem:[%s8981_s3 + $0xdc] ss:$12 sps:$4 sm:$0xff]  }
 0x98f   : > { %2771 = vmatprep.mubr.bf16.mxu1 %v2465_v31  ;;  %v2467_v59 = vpack.c.bf16 %v2459_v55, %v2455_v33  ;;  %v2456_v61 = vmul.f32 %v2440_v20, %v2328_v46  ;;  %v2442_v13 = vadd.f32 1.0, %v6796_v45  ;;  %v6549_v33 = vld [vmem:[%s8981_s3 + $0xc0] ss:$12 sps:$4 sm:$0xff]   ;;  %v6551_v55 = vld [vmem:[%s8981_s3 + $0xc4] ss:$12 sps:$4 sm:$0xff]  }
 0x990   : > { %v2454_v1 = vmul.f32 %v2438_v41, %v2326_v52  ;;  %3080 = vmatprep.subr.bf16.mxu1 %v6551_v55 }
 0x991   : > { %2820 = vmatprep.mubr.bf16.mxu0 %v2467_v59  ;;  %v2464_v43 = vpack.c.bf16 %v2456_v61, %v2452_v27  ;;  %v2458_v56 = vmul.f32 %v2442_v13, %v2330_v34  ;;  %3081 = vmatpush1.bf16.msra.mxu1 %v6549_v33  ;;  %v5531_v33 = vld [vmem:[%s8946_s15] ss:$0 sm:$0xff] }
 0x992   : > { %3082 = vmatprep.subr.bf16.mxu1 %v6554_v16 }
 0x993   : > { %2772 = vmatmul.mubr.bf16.gmra.mrb[36].mxu1 %v2464_v43  ;;  %v2466_v36 = vpack.c.bf16 %v2458_v56, %v2454_v1 }
 0x994   : > { %3112 = vmatprep.mubr.bf16.mxu1 %v6985_v39 }
 0x995   : > { %2821 = vmatmul.mubr.bf16.gmra.mrb[36].mxu0 %v2466_v36  ;;  %v6557_v36 = vld [vmem:[%s8981_s3 + $0xf4] ss:$12 sps:$4 sm:$0xff]  }
 0xa5d   : > { %v5894_v62 = vpop.f32.mrb[32].mxu1 }
 0xa5e   : > { %v5895_v2 = vpop.f32.mrb[33].mxu1 }
 0xa5f   : > { %v5896_v37 = vadd.f32 %v5895_v2, %v5894_v62  ;;  %v5897_v11 = vpop.f32.mrb[34].mxu1  ;;  %v6558_v62 = vld [vmem:[%s8981_s3 + $0xc8] ss:$12 sps:$4 sm:$0xff]   ;;  %v6561_v2 = vld [vmem:[%s8981_s3 + $0x10c] ss:$12 sps:$4 sm:$0xff]  }
 0xa60   : > { %v5922_v40 = vpop.f32.mrb[32].mxu0  ;;  %v5898_v3 = vpop.f32.mrb[35].mxu1  ;;  %6164 = vmatprep.subr.bf16.mxu0 %v6558_v62 }
 0xa61   : > { %v2766_v7 = vadd.f32 %v5896_v37, %v5497_v42  ;;  %v5923_v44 = vpop.f32.mrb[33].mxu0  ;;  %v5899_v49 = vadd.f32 %v5898_v3, %v5897_v11  ;;  %6165 = vmatpush3.bf16.msra.mxu0 %v6558_v62  ;;  %v6562_v37 = vld [vmem:[%s8981_s3 + $0xe0] ss:$12 sps:$4 sm:$0xff]   ;;  %v6559_v11 = vld [vmem:[%s8981_s3 + $0x108] ss:$12 sps:$4 sm:$0xff]  }
 0xa62   : > { %v5924_v50 = vadd.f32 %v5923_v44, %v5922_v40  ;;  %v5925_v5 = vpop.f32.mrb[34].mxu0  ;;  %6166 = vmatprep.subr.bf16.mxu0 %v6562_v37  ;;  %v6563_v40 = vld [vmem:[%s8981_s3 + $0x120] ss:$12 sps:$4 sm:$0xff]   ;;  %v6565_v3 = vld [vmem:[%s8981_s3 + $0x124] ss:$12 sps:$4 sm:$0xff]  }
 0xa63   : > { %v2769_v10 = vadd.f32 %v5899_v49, %v5497_v42  ;;  %v5926_v18 = vpop.f32.mrb[35].mxu0  ;;  %v6569_v44 = vld [vmem:[%s8981_s3 + $0x13c] ss:$12 sps:$4 sm:$0xff]  }
 0xa64   : > { %v2815_v32 = vadd.f32 %v5924_v50, %v2766_v7  ;;  %v5927_v51 = vadd.f32 %v5926_v18, %v5925_v5  ;;  %v6566_v7 = vld [vmem:[%s8981_s3 + $0xf8] ss:$12 sps:$4 sm:$0xff]   ;;  %v6570_v49 = vld [vmem:[%s8981_s3 + $0x110] ss:$12 sps:$4 sm:$0xff]   ;;  %v6573_v5 = vld [vmem:[%s8981_s3 + $0x154] ss:$12 sps:$4 sm:$0xff]  }
 0xa65   : > { %6167 = vmatpush3.bf16.msra.mxu0 %v6562_v37  ;;  %v6567_v50 = vld [vmem:[%s8981_s3 + $0x138] ss:$12 sps:$4 sm:$0xff]   ;;  %v6571_v18 = vld [vmem:[%s8981_s3 + $0x150] ss:$12 sps:$4 sm:$0xff]  }
 0xa66   : > { %v2818_v23 = vadd.f32 %v5927_v51, %v2769_v10  ;;  %v2829_v29 = vadd.f32 %v2815_v32, %v7734_v28  ;;  %v5900_v63 = vpop.f32.mrb[36].mxu1  ;;  %6168 = vmatprep.subr.bf16.mxu0 %v6566_v7  ;;  %v6574_v10 = vld [vmem:[%s8981_s3 + $0x128] ss:$12 sps:$4 sm:$0xff]   ;;  %v6577_v32 = vld [vmem:[%s8981_s3 + $0x16c] ss:$12 sps:$4 sm:$0xff]  }
 0xa67   : > { %v5901_v22 = vpop.f32.mrb[37].mxu1  ;;  %v6578_v51 = vld [vmem:[%s8981_s3 + $0x140] ss:$12 sps:$4 sm:$0xff]  }
 0xa68   : > { %2835 = vadd.xlane.f32.xlu0 %v2829_v29  ;;  %v2830_v6 = vadd.f32 %v2818_v23, %v7736_v35  ;;  %v5928_v54 = vpop.f32.mrb[36].mxu0  ;;  %v5902_v26 = vadd.f32 %v5901_v22, %v5900_v63  ;;  %v5903_v12 = vpop.f32.mrb[38].mxu1  ;;  %v6575_v23 = vld [vmem:[%s8981_s3 + $0x168] ss:$12 sps:$4 sm:$0xff]   ;;  %v6580_v63 = vld [vmem:[%s8981_s3 + $0x170] ss:$12 sps:$4 sm:$0xff]  }
 0xa69   : > { %v5929_v47 = vpop.f32.mrb[37].mxu0  ;;  %v5904_v24 = vpop.f32.mrb[39].mxu1  ;;  %6169 = vmatpush3.bf16.msra.mxu0 %v6566_v7 }
 0xa6a   : > { %2837 = vadd.xlane.f32.xlu1 %v2830_v6  ;;  %v2774_v30 = vadd.f32 %v5902_v26, %v5497_v42  ;;  %v5930_v53 = vadd.f32 %v5929_v47, %v5928_v54  ;;  %v5931_v38 = vpop.f32.mrb[38].mxu0  ;;  %v5905_v48 = vadd.f32 %v5904_v24, %v5903_v12  ;;  %6170 = vmatprep.subr.bf16.mxu0 %v6570_v49 }
 0xa6b   : > { %v5932_v25 = vpop.f32.mrb[39].mxu0 }
 0xa6c   : > { %v2823_v0 = vadd.f32 %v5930_v53, %v2774_v30  ;;  %v2777_v58 = vadd.f32 %v5905_v48, %v5497_v42  ;;  %v5933_v31 = vadd.f32 %v5932_v25, %v5931_v38  ;;  %v6555_v42 = vld [vmem:[%s8981_s3 + $0xf0] ss:$12 sps:$4 sm:$0xff]  }
 0xa6d   : > { %6171 = vmatpush3.bf16.msra.mxu0 %v6570_v49 }
 0xa6e   : > { %v2826_v28 = vadd.f32 %v5933_v31, %v2777_v58  ;;  %v2831_v4 = vadd.f32 %v2823_v0, %v7746_v9  ;;  %v6552_v9 = vld [vmem:[%s8981_s3 + $0xd8] ss:$12 sps:$4 sm:$0xff]   ;;  %6172 = vmatprep.subr.bf16.mxu0 %v6574_v10  ;;  %v5530_v0 = vld [vmem:[%s8945_s14] ss:$0 sm:$0xff] }
 0xa6f   : > { %3083 = vmatpush1.bf16.msra.mxu1 %v6552_v9 }
 0xa70   : > { %2839 = vadd.xlane.f32.xlu0 %v2831_v4  ;;  %v2832_v35 = vadd.f32 %v2826_v28, %v7744_v8  ;;  %3084 = vmatprep.subr.bf16.mxu1 %v6557_v36 }
 0xa71   : > { %6173 = vmatpush3.bf16.msra.mxu0 %v6574_v10 }
 0xa72   : > { %2841 = vadd.xlane.f32.xlu1 %v2832_v35  ;;  %6174 = vmatprep.subr.bf16.mxu0 %v6578_v51 }
 0xa73   : > { %3085 = vmatpush1.bf16.msra.mxu1 %v6555_v42 }
 0xa74   : > { %3086 = vmatprep.subr.bf16.mxu1 %v6561_v2 }
 0xa75   : > { %6175 = vmatpush3.bf16.msra.mxu0 %v6578_v51 }
 0xa77   : > { %3087 = vmatpush1.bf16.msra.mxu1 %v6559_v11 }
 0xa78   : > { %3088 = vmatprep.subr.bf16.mxu1 %v6565_v3 }
 0xa7b   : > { %3089 = vmatpush1.bf16.msra.mxu1 %v6563_v40 }
 0xa7c   : > { %3090 = vmatprep.subr.bf16.mxu1 %v6569_v44 }
 0xa7f   : > { %3091 = vmatpush1.bf16.msra.mxu1 %v6567_v50 }
 0xa80   : > { %3092 = vmatprep.subr.bf16.mxu1 %v6573_v5 }
 0xa83   : > { %3093 = vmatpush1.bf16.msra.mxu1 %v6571_v18 }
 0xa84   : > { %3094 = vmatprep.subr.bf16.mxu1 %v6577_v32 }
 0xa87   : > { %3095 = vmatpush1.bf16.msra.mxu1 %v6575_v23 }
 0xaf5   : > { %v2836_v8 = vpop.xlane.xlu0 %2835 }
 0xaf6   : > { %v2843_v60 = vmul.f32 0.0078125, %v2836_v8 }
 0xaf7   : > { %v2838_v21 = vpop.xlane.xlu1 %2837 }
 0xaf8   : > { %v7996_v46 = vsub.f32 %v2829_v29, %v2843_v60  ;;  %v2844_v20 = vmul.f32 0.0078125, %v2838_v21  ;;  %v6579_v29 = vld [vmem:[%s8981_s3 + $0x158] ss:$12 sps:$4 sm:$0xff]  }
 0xaf9   : > { %6176 = vmatprep.subr.bf16.mxu0 %v6579_v29 }
 0xafa   : > { %v7998_v45 = vsub.f32 %v2830_v6, %v2844_v20  ;;  %v2851_v59 = vmul.f32 %v7996_v46, %v7996_v46  ;;  %6177 = vmatpush3.bf16.msra.mxu0 %v6579_v29 }
 0xafb   : > { %6178 = vmatprep.subr.bf16.mxu0 %v6580_v63 }
 0xafc   : > { %2855 = vadd.xlane.f32.xlu0 %v2851_v59  ;;  %v2852_v52 = vmul.f32 %v7998_v45, %v7998_v45 }
 0xafd   : > { %v2840_v41 = vpop.xlane.xlu0 %2839 }
 0xafe   : > { %2857 = vadd.xlane.f32.xlu1 %v2852_v52  ;;  %v2845_v27 = vmul.f32 0.0078125, %v2840_v41  ;;  %6179 = vmatpush3.bf16.msra.mxu0 %v6580_v63 }
 0xaff   : > { %v2842_v61 = vpop.xlane.xlu1 %2841 }
 0xb00   : > { %v8004_v34 = vsub.f32 %v2831_v4, %v2845_v27  ;;  %v2846_v13 = vmul.f32 0.0078125, %v2842_v61  ;;  %v5564_v61 = vld [vmem:[%s8936_s5 + $0x3] sm:$0x7] }
 0xb01   : > { %v2948_v7 = vrot.slane %v5564_v61, %v7280_v19 }
 0xb02   : > { %v8006_v43 = vsub.f32 %v2832_v35, %v2846_v13  ;;  %v2853_v1 = vmul.f32 %v8004_v34, %v8004_v34 }
 0xb04   : > { %2859 = vadd.xlane.f32.xlu0 %v2853_v1  ;;  %v2854_v56 = vmul.f32 %v8006_v43, %v8006_v43 }
 0xb06   : > { %2861 = vadd.xlane.f32.xlu1 %v2854_v56 }
 0xb89   : > { %v2856_v6 = vpop.xlane.xlu0 %2855 }
 0xb8a   : > { %v2863_v22 = vmul.f32 0.0078125, %v2856_v6 }
 0xb8b   : > { %v2858_v54 = vpop.xlane.xlu1 %2857 }
 0xb8c   : > { %v2867_v26 = vadd.f32 1e-05, %v2863_v22  ;;  %v2864_v12 = vmul.f32 0.0078125, %v2858_v54 }
 0xb8e   : > { %6797 = vrsqrt.f32 %v2867_v26  ;;  %v2868_v47 = vadd.f32 1e-05, %v2864_v12 }
 0xb90   : > { %6799 = vrsqrt.f32 %v2868_v47 }
 0xb91   : > { %v2860_v24 = vpop.xlane.xlu0 %2859 }
 0xb92   : > { %v2865_v30 = vmul.f32 0.0078125, %v2860_v24 }
 0xb93   : > { %v2862_v53 = vpop.xlane.xlu1 %2861 }
 0xb94   : > { %v2869_v38 = vadd.f32 1e-05, %v2865_v30  ;;  %v2866_v48 = vmul.f32 0.0078125, %v2862_v53 }
 0xb96   : > { %6801 = vrsqrt.f32 %v2869_v38  ;;  %v2870_v58 = vadd.f32 1e-05, %v2866_v48 }
 0xb98   : > { %v6798_v25 = vpop.eup %6797  ;;  %6803 = vrsqrt.f32 %v2870_v58 }
 0xb99   : > { %v2875_v31 = vmul.f32 %v6798_v25, %v7996_v46 }
 0xb9a   : > { %v6800_v28 = vpop.eup %6799 }
 0xb9b   : > { %v2885_v4 = vmul.f32 %v5530_v0, %v2875_v31  ;;  %v2876_v35 = vmul.f32 %v6800_v28, %v7998_v45 }
 0xb9d   : > { %v2886_v55 = vmul.f32 %v5530_v0, %v2876_v35  ;;  %v8080_v16 = vadd.f32 %v5531_v33, %v2885_v4 }
 0xb9f   : > { %v8082_v9 = vadd.f32 %v5531_v33, %v2886_v55 }
 0xba0   : > { %v6802_v60 = vpop.eup %6801 }
 0xba1   : > { %v2899_v8 = vpack.c.bf16 %v8082_v9, %v8080_v16  ;;  %v2877_v21 = vmul.f32 %v6802_v60, %v8004_v34  ;;  %v2940_v34 = vrot.slane %v5564_v61, %v7270_v15 }
 0xba2   : > { %v6804_v46 = vpop.eup %6803 }
 0xba3   : > { %3113 = vmatmul.mubr.bf16.vlgmr.msra.gmra.mrb[40].mxu1 %v2899_v8  ;;  %6180 = vmatprep.mubr.bf16.mxu0 %v2899_v8  ;;  %v2878_v20 = vmul.f32 %v6804_v46, %v8006_v43  ;;  %v2887_v45 = vmul.f32 %v5530_v0, %v2877_v21  ;;  %v2944_v43 = vrot.slane %v5564_v61, %v7276_v17 }
 0xba4   : > { %3122 = vmatprep.mubr.bf16.mxu1 %v6985_v39 }
 0xba5   : > { %v2888_v59 = vmul.f32 %v5530_v0, %v2878_v20  ;;  %v8089_v52 = vadd.f32 %v5531_v33, %v2887_v45 }
 0xba7   : > { %v8091_v41 = vadd.f32 %v5531_v33, %v2888_v59 }
 0xba9   : > { %v2900_v27 = vpack.c.bf16 %v8091_v41, %v8089_v52 }
 0xbab   : > { %3123 = vmatmul.mubr.bf16.gmra.mrb[44].mxu1 %v2900_v27  ;;  %6181 = vmatmul.mubr.bf16.vlgmr.msra.gmra.mrb[40].mxu0 %v2900_v27 }
 0xc76   : > { %v3114_v13 = vpop.f32.mrb[40].mxu1 }
 0xc77   : > { %v3116_v1 = vpop.f32.mrb[41].mxu1  ;;  %v3115_v36 = vadd.f32 %v3114_v13, %v2940_v34 }
 0xc78   : > { %v3118_v56 = vpop.f32.mrb[42].mxu1  ;;  %v3117_v2 = vadd.f32 %v3116_v1, %v2944_v43 }
 0xc79   : > { %v3119_v62 = vadd.f32 %v3118_v56, %v2940_v34  ;;  %v3120_v42 = vpop.f32.mrb[43].mxu1 }
 0xc7a   : > { %v3121_v37 = vadd.f32 %v3120_v42, %v2944_v43 }
 0xc7b   : > { %v3182_v11 = vpack.c.bf16 %v3119_v62, %v3115_v36  ;;  %v8146_v36 = vld [vmem:[%s7333_s28 + $0x10] sm:$0xff] }
 0xc7c   : > { %v3183_v40 = vpack.c.bf16 %v3121_v37, %v3117_v2 }
 0xc7d   : > { %6188 = vmatprep.mubr.msk.bf16.mxu1 %vm1059_vm0, %v3182_v11 }
 0xc7e   : > { %3204 = vrot.lane.b32.xlu0 %v3183_v40, %s8985_s1  ;;  %6316 = vmatprep.subr.msk.bf16.mxu1 %vm1059_vm0, %v3183_v40  ;;  %v3243_v3 = vsel %vm1059_vm0, %v3183_v40, 0  ;;  %v3124_v44 = vpop.f32.mrb[44].mxu1  ;;  %v6182_v49 = vpop.f32.mrb[40].mxu0 }
 0xc7f   : > { %6185 = vmatpush3.bf16.xpose.msra.mxu1 %v3243_v3  ;;  %v3126_v50 = vpop.f32.mrb[45].mxu1  ;;  %v3167_v5 = vpop.f32.mrb[41].mxu0  ;;  %v3125_v32 = vadd.f32 %v3124_v44, %v2940_v34  ;;  %v3176_v51 = vadd.f32 %v6182_v49, %v2948_v7  ;;  %v8157_v3 = vld [vmem:[%s7333_s28 + $0x8] sm:$0xff] }
 0xc80   : > { %v3128_v10 = vpop.f32.mrb[46].mxu1  ;;  %v6183_v18 = vpop.f32.mrb[42].mxu0  ;;  %v3127_v22 = vadd.f32 %v3126_v50, %v2944_v43  ;;  %v3168_v54 = vadd.f32 %v3167_v5, %v2948_v7  ;;  %v8167_v50 = vld [vmem:[%s7333_s28 + $0x18] sm:$0xff] }
 0xc81   : > { %v3129_v23 = vadd.f32 %v3128_v10, %v2940_v34  ;;  %v3179_v29 = vadd.f32 %v6183_v18, %v2948_v7  ;;  %v3130_v63 = vpop.f32.mrb[47].mxu1  ;;  %v3170_v6 = vpop.f32.mrb[43].mxu0 }
 0xc82   : > { %3212 = vrot.lane.b32.xlu0 %v3183_v40, %s8986_s23  ;;  %v3131_v26 = vadd.f32 %v3130_v63, %v2944_v43  ;;  %v3171_v12 = vadd.f32 %v3170_v6, %v2948_v7 }
 0xc83   : > { %v3185_v47 = vpack.c.bf16 %v3129_v23, %v3125_v32  ;;  %v8106_v24 = vpack.c.bf16 %v3179_v29, %v3176_v51 }
 0xc84   : > { %v3186_v30 = vpack.c.bf16 %v3131_v26, %v3127_v22  ;;  %v8108_v53 = vpack.c.bf16 %v3171_v12, %v3168_v54 }
 0xc86   : > { %3210 = vrot.lane.b32.xlu0 %v3186_v30, %s8987_s21  ;;  %3206 = vrot.lane.b32.xlu1 %v3186_v30, %s8985_s1  ;;  %v3246_v38 = vsel %vm1059_vm0, %v3186_v30, 0 }
 0xc87   : > { %6317 = vmatprep.subr.msk.bf16.mxu1 %vm1059_vm0, %v3186_v30 }
 0xc88   : > { %6187 = vmatpush3.bf16.xpose.msra.mxu1 %v3246_v38 }
 0xc8a   : > { %3194 = vrot.lane.b32.xlu0 %v3182_v11, %s8987_s21  ;;  %3208 = vrot.lane.b32.xlu1 %v3183_v40, %s8987_s21 }
 0xc8e   : > { %3198 = vrot.lane.b32.xlu0 %v3182_v11, %s8986_s23  ;;  %3190 = vrot.lane.b32.xlu1 %v3182_v11, %s8985_s1  ;;  %v6918_v11 = vld [vmem:[%s7333_s28] sm:$0xff] }
 0xc8f   : > { %6189 = vmatmul.mubr.msk.bf16.vlgmr.msra.gmra.mrb[48].mxu1 %vm1059_vm0, %v3185_v47 }
 0xc92   : > { %3192 = vrot.lane.b32.xlu1 %v3185_v47, %s8985_s1 }
 0xc96   : > { %3214 = vrot.lane.b32.xlu1 %v3186_v30, %s8986_s23 }
 0xc9a   : > { %3196 = vrot.lane.b32.xlu1 %v3185_v47, %s8987_s21 }
 0xc9e   : > { %3200 = vrot.lane.b32.xlu1 %v3185_v47, %s8986_s23 }
 0xcf0   : > { %v3205_v48 = vpop.permute.xlu0 %3204 }
 0xcf1   : > { %v3304_v25 = vsel %vm1059_vm0, %v3205_v48, 0  ;;  %6318 = vmatprep.subr.msk.bf16.mxu1 %vm1059_vm0, %v3205_v48 }
 0xcf2   : > { %6193 = vmatpush3.bf16.xpose.msra.mxu1 %v3304_v25 }
 0xcf4   : > { %v3213_v0 = vpop.permute.xlu0 %3212 }
 0xcf5   : > { %v3426_v60 = vsel %vm1059_vm0, %v3213_v0, 0 }
 0xcf8   : > { %v3207_v58 = vpop.permute.xlu1 %3206  ;;  %v3211_v31 = vpop.permute.xlu0 %3210 }
 0xcf9   : > { %v3307_v28 = vsel %vm1059_vm0, %v3207_v58, 0  ;;  %6319 = vmatprep.subr.msk.bf16.mxu1 %vm1059_vm0, %v3207_v58  ;;  %v3368_v21 = vsel %vm1059_vm0, %v3211_v31, 0 }
 0xcfa   : > { %6195 = vmatpush3.bf16.xpose.msra.mxu1 %v3307_v28 }
 0xcfb   : > { %6322 = vmatprep.subr.msk.bf16.mxu1 %vm1059_vm0, %v3213_v0 }
 0xcfc   : > { %v3209_v4 = vpop.permute.xlu1 %3208  ;;  %v3195_v35 = vpop.permute.xlu0 %3194 }
 0xcfd   : > { %v3365_v33 = vsel %vm1059_vm0, %v3209_v4, 0  ;;  %6320 = vmatprep.subr.msk.bf16.mxu0 %vm1059_vm0, %v3209_v4  ;;  %6204 = vmatprep.mubr.msk.bf16.mxu0 %vm1059_vm0, %v3195_v35 }
 0xcfe   : > { %6201 = vmatpush3.bf16.xpose.msra.mxu0 %v3365_v33 }
 0xcff   : > { %6321 = vmatprep.subr.msk.bf16.mxu0 %vm1059_vm0, %v3211_v31 }
 0xd00   : > { %v3191_v55 = vpop.permute.xlu1 %3190  ;;  %v3199_v46 = vpop.permute.xlu0 %3198 }
 0xd01   : > { %6196 = vmatprep.mubr.msk.bf16.mxu1 %vm1059_vm0, %v3191_v55 }
 0xd04   : > { %v3193_v8 = vpop.permute.xlu1 %3192 }
 0xd05   : > { %6197 = vmatmul.mubr.msk.bf16.vlgmr.msra.gmra.mrb[52].mxu1 %vm1059_vm0, %v3193_v8 }
 0xd06   : > { %6209 = vmatpush3.bf16.xpose.msra.mxu1 %v3426_v60  ;;  %6203 = vmatpush3.bf16.xpose.msra.mxu0 %v3368_v21 }
 0xd07   : > { %6212 = vmatprep.mubr.msk.bf16.mxu1 %vm1059_vm0, %v3199_v46  ;;  %6216 = vmatprep.subr.bf16.mxu0 %v8108_v53 }
 0xd08   : > { %v3215_v20 = vpop.permute.xlu1 %3214 }
 0xd09   : > { %6323 = vmatprep.subr.msk.bf16.mxu1 %vm1059_vm0, %v3215_v20  ;;  %v3429_v59 = vsel %vm1059_vm0, %v3215_v20, 0 }
 0xd0c   : > { %v3197_v45 = vpop.permute.xlu1 %3196 }
 0xd0d   : > { %6205 = vmatmul.mubr.msk.bf16.vlgmr.msra.gmra.mrb[44].mxu0 %vm1059_vm0, %v3197_v45 }
 0xd0e   : > { %6211 = vmatpush3.bf16.xpose.msra.mxu1 %v3429_v59  ;;  %6217 = vmatpush3.bf16.msra.mxu0 %v8108_v53 }
 0xd0f   : > { %6218 = vmatprep.subr.bf16.mxu0 %v8106_v24 }
 0xd10   : > { %v3201_v27 = vpop.permute.xlu1 %3200 }
 0xd12   : > { %6219 = vmatpush3.bf16.msra.mxu0 %v8106_v24 }
 0xd15   : > { %6213 = vmatmul.mubr.msk.bf16.vlgmr.msra.gmra.mrb[56].mxu1 %vm1059_vm0, %v3201_v27 }
 0xd62   : > { %v6190_v61 = vpop.f32.mrb[48].mxu1 }
 0xd63   : > { %v3482_v34 = vmul.f32 0.17677669, %v6190_v61  ;;  %v3282_v13 = vpop.f32.mrb[49].mxu1 }
 0xd64   : > { %v3480_v43 = vmul.f32 0.17677669, %v3282_v13  ;;  %v6191_v1 = vpop.f32.mrb[50].mxu1 }
 0xd65   : > { %v3285_v56 = vpop.f32.mrb[51].mxu1  ;;  %v8149_v62 = vadd.f32 %v8146_v36, %v3482_v34  ;;  %v3483_v2 = vmul.f32 0.17677669, %v6191_v1 }
 0xd66   : > { %v3481_v42 = vmul.f32 0.17677669, %v3285_v56  ;;  %v8154_v40 = vadd.f32 %v6918_v11, %v3480_v43 }
 0xd67   : > { %v3518_v37 = vsel %vm1059_vm0, %v8149_v62, -inf  ;;  %v8170_v5 = vadd.f32 %v8167_v50, %v3483_v2 }
 0xd68   : > { %3519 = vmax.xlane.f32.xlu0 %v3518_v37  ;;  %v8160_v7 = vadd.f32 %v8157_v3, %v3481_v42  ;;  %v3512_v49 = vsel %vm1059_vm0, %v8154_v40, -inf }
 0xd69   : > { %v3521_v10 = vsel %vm1059_vm0, %v8170_v5, -inf }
 0xd6a   : > { %v3515_v44 = vsel %vm1059_vm0, %v8160_v7, -inf }
 0xd6b   : > { %3516 = vmax.xlane.f32.xlu1 %v3515_v44 }
 0xd6c   : > { %3513 = vmax.xlane.f32.xlu0 %v3512_v49 }
 0xd70   : > { %3522 = vmax.xlane.f32.xlu0 %v3521_v10 }
 0xdd8   : > { %v6198_v18 = vpop.f32.mrb[52].mxu1 }
 0xdd9   : > { %v3486_v32 = vmul.f32 0.17677669, %v6198_v18  ;;  %v3343_v51 = vpop.f32.mrb[53].mxu1 }
 0xdda   : > { %v6199_v23 = vpop.f32.mrb[54].mxu1  ;;  %v3484_v47 = vmul.f32 0.17677669, %v3343_v51 }
 0xddb   : > { %v3487_v29 = vmul.f32 0.17677669, %v6199_v23  ;;  %v3346_v63 = vpop.f32.mrb[55].mxu1  ;;  %v8175_v6 = vadd.f32 %v8146_v36, %v3486_v32 }
 0xddc   : > { %v3485_v25 = vmul.f32 0.17677669, %v3346_v63  ;;  %v8187_v28 = vadd.f32 %v6918_v11, %v3484_v47 }
 0xddd   : > { %v3530_v22 = vsel %vm1059_vm0, %v8175_v6, -inf  ;;  %v8180_v54 = vadd.f32 %v8167_v50, %v3487_v29 }
 0xdde   : > { %3531 = vmax.xlane.f32.xlu0 %v3530_v22  ;;  %v8195_v55 = vadd.f32 %v8157_v3, %v3485_v25  ;;  %v3524_v45 = vsel %vm1059_vm0, %v8187_v28, -inf }
 0xddf   : > { %v3533_v26 = vsel %vm1059_vm0, %v8180_v54, -inf }
 0xde0   : > { %3534 = vmax.xlane.f32.xlu1 %v3533_v26  ;;  %v6206_v12 = vpop.f32.mrb[44].mxu0  ;;  %v3527_v13 = vsel %vm1059_vm0, %v8195_v55, -inf }
 0xde1   : > { %v3490_v30 = vmul.f32 0.17677669, %v6206_v12  ;;  %v3404_v38 = vpop.f32.mrb[45].mxu0 }
 0xde2   : > { %v6207_v48 = vpop.f32.mrb[46].mxu0  ;;  %v3488_v4 = vmul.f32 0.17677669, %v3404_v38 }
 0xde3   : > { %v8185_v0 = vadd.f32 %v8146_v36, %v3490_v30  ;;  %v3491_v58 = vmul.f32 0.17677669, %v6207_v48  ;;  %v3407_v31 = vpop.f32.mrb[47].mxu0 }
 0xde4   : > { %v3489_v8 = vmul.f32 0.17677669, %v3407_v31  ;;  %v8199_v46 = vadd.f32 %v6918_v11, %v3488_v4 }
 0xde5   : > { %v8190_v35 = vadd.f32 %v8167_v50, %v3491_v58  ;;  %v3542_v33 = vsel %vm1059_vm0, %v8185_v0, -inf }
 0xde6   : > { %3543 = vmax.xlane.f32.xlu0 %v3542_v33  ;;  %v8204_v61 = vadd.f32 %v8157_v3, %v3489_v8  ;;  %v3536_v56 = vsel %vm1059_vm0, %v8199_v46, -inf }
 0xde7   : > { %v3545_v60 = vsel %vm1059_vm0, %v8190_v35, -inf }
 0xde8   : > { %v6214_v21 = vpop.f32.mrb[56].mxu1  ;;  %3546 = vmax.xlane.f32.xlu1 %v3545_v60  ;;  %v3539_v42 = vsel %vm1059_vm0, %v8204_v61, -inf }
 0xde9   : > { %v3465_v20 = vpop.f32.mrb[57].mxu1  ;;  %v3494_v43 = vmul.f32 0.17677669, %v6214_v21 }
 0xdea   : > { %v3492_v59 = vmul.f32 0.17677669, %v3465_v20  ;;  %v6215_v27 = vpop.f32.mrb[58].mxu1  ;;  %3525 = vmax.xlane.f32.xlu0 %v3524_v45 }
 0xdeb   : > { %v3468_v34 = vpop.f32.mrb[59].mxu1  ;;  %v8215_v2 = vadd.f32 %v8146_v36, %v3494_v43  ;;  %v3495_v51 = vmul.f32 0.17677669, %v6215_v27 }
 0xdec   : > { %3528 = vmax.xlane.f32.xlu1 %v3527_v13  ;;  %v8208_v1 = vadd.f32 %v6918_v11, %v3492_v59  ;;  %v3493_v29 = vmul.f32 0.17677669, %v3468_v34 }
 0xded   : > { %v3554_v44 = vsel %vm1059_vm0, %v8215_v2, -inf  ;;  %v8230_v23 = vadd.f32 %v8167_v50, %v3495_v51 }
 0xdee   : > { %3537 = vmax.xlane.f32.xlu0 %v3536_v56  ;;  %v3548_v37 = vsel %vm1059_vm0, %v8208_v1, -inf  ;;  %v8235_v22 = vadd.f32 %v8157_v3, %v3493_v29 }
 0xdf0   : > { %3540 = vmax.xlane.f32.xlu1 %v3539_v42  ;;  %v3551_v50 = vsel %vm1059_vm0, %v8235_v22, -inf }
 0xdf2   : > { %3549 = vmax.xlane.f32.xlu0 %v3548_v37 }
 0xdf5   : > { %v3520_v11 = vpop.xlane.xlu0 %3519 }
 0xdf6   : > { %3555 = vmax.xlane.f32.xlu0 %v3554_v44  ;;  %v3562_v36 = vsub.f32 %v8149_v62, %v3520_v11  ;;  %v3557_v62 = vsel %vm1059_vm0, %v8230_v23, -inf }
 0xdf8   : > { %v3580_v10 = vmul.f32 1.442695, %v3562_v36  ;;  %v3517_v30 = vpop.xlane.xlu1 %3516 }
 0xdf9   : > { %v3514_v49 = vpop.xlane.xlu0 %3513  ;;  %v3561_v38 = vsub.f32 %v8160_v7, %v3517_v30 }
 0xdfa   : > { %v3560_v18 = vsub.f32 %v8154_v40, %v3514_v49  ;;  %6805 = vpow2.f32 %v3580_v10 }
 0xdfb   : > { %v3578_v25 = vmul.f32 1.442695, %v3561_v38 }
 0xdfc   : > { %v3576_v32 = vmul.f32 1.442695, %v3560_v18 }
 0xdfd   : > { %v3523_v3 = vpop.xlane.xlu0 %3522 }
 0xdfe   : > { %6807 = vpow2.f32 %v3576_v32  ;;  %v3563_v47 = vsub.f32 %v8170_v5, %v3523_v3 }
 0xe00   : > { %v3582_v48 = vmul.f32 1.442695, %v3563_v47 }
 0xe01   : > { %3220 = vrot.lane.b32.xlu1 %v8106_v24, %s8985_s1 }
 0xe02   : > { %6809 = vpow2.f32 %v3582_v48 }
 0xe03   : > { %6811 = vpow2.f32 %v3578_v25 }
 0xe04   : > { %v8232_v63 = vpop.eup %6805 }
 0xe05   : > { %3224 = vrot.lane.b32.xlu1 %v8108_v53, %s8987_s21  ;;  %v3614_v40 = vsel %vm1059_vm0, %v8232_v63, 0.0 }
 0xe08   : > { %v8241_v26 = vpop.eup %6807 }
 0xe09   : > { %v3608_v12 = vsel %vm1059_vm0, %v8241_v26, 0.0 }
 0xe0c   : > { %3218 = vrot.lane.b32.xlu0 %v8108_v53, %s8985_s1  ;;  %v8251_v58 = vpop.eup %6809 }
 0xe0d   : > { %v3617_v31 = vsel %vm1059_vm0, %v8251_v58, 0.0  ;;  %v8255_v4 = vpop.eup %6811 }
 0xe29   : > { %3558 = vmax.xlane.f32.xlu1 %v3557_v62 }
 0xe2b   : > { %3615 = vadd.xlane.f32.xlu0 %v3614_v40 }
 0xe2d   : > { %3552 = vmax.xlane.f32.xlu1 %v3551_v50 }
 0xe2f   : > { %3609 = vadd.xlane.f32.xlu0 %v3608_v12 }
 0xe3e   : > { %3230 = vrot.lane.b32.xlu1 %v8108_v53, %s8986_s23  ;;  %v3611_v53 = vsel %vm1059_vm0, %v8255_v4, 0.0 }
 0xe62   : > { %3618 = vadd.xlane.f32.xlu1 %v3617_v31 }
 0xe66   : > { %3612 = vadd.xlane.f32.xlu1 %v3611_v53 }
 0xe6b   : > { %v3532_v5 = vpop.xlane.xlu0 %3531 }
 0xe6c   : > { %v3566_v33 = vsub.f32 %v8175_v6, %v3532_v5 }
 0xe6d   : > { %v3535_v7 = vpop.xlane.xlu1 %3534 }
 0xe6e   : > { %v3588_v8 = vmul.f32 1.442695, %v3566_v33  ;;  %v3567_v60 = vsub.f32 %v8180_v54, %v3535_v7 }
 0xe70   : > { %6813 = vpow2.f32 %v3588_v8  ;;  %v3590_v21 = vmul.f32 1.442695, %v3567_v60 }
 0xe72   : > { %6815 = vpow2.f32 %v3590_v21 }
 0xe73   : > { %v3544_v20 = vpop.xlane.xlu0 %3543 }
 0xe74   : > { %v3570_v45 = vsub.f32 %v8185_v0, %v3544_v20 }
 0xe75   : > { %v3547_v59 = vpop.xlane.xlu1 %3546 }
 0xe76   : > { %v3596_v27 = vmul.f32 1.442695, %v3570_v45  ;;  %v3571_v34 = vsub.f32 %v8190_v35, %v3547_v59 }
 0xe77   : > { %v3526_v13 = vpop.xlane.xlu0 %3525 }
 0xe78   : > { %6817 = vpow2.f32 %v3596_v27  ;;  %v3598_v43 = vmul.f32 1.442695, %v3571_v34  ;;  %v3564_v56 = vsub.f32 %v8187_v28, %v3526_v13 }
 0xe79   : > { %v3529_v6 = vpop.xlane.xlu1 %3528 }
 0xe7a   : > { %v8264_v42 = vpop.eup %6813  ;;  %6819 = vpow2.f32 %v3598_v43  ;;  %v3584_v54 = vmul.f32 1.442695, %v3564_v56  ;;  %v3565_v37 = vsub.f32 %v8195_v55, %v3529_v6 }
 0xe7b   : > { %v3538_v44 = vpop.xlane.xlu0 %3537  ;;  %v3626_v0 = vsel %vm1059_vm0, %v8264_v42, 0.0 }
 0xe7c   : > { %v8269_v11 = vpop.eup %6815  ;;  %6821 = vpow2.f32 %v3584_v54  ;;  %v3586_v35 = vmul.f32 1.442695, %v3565_v37  ;;  %v3568_v36 = vsub.f32 %v8199_v46, %v3538_v44  ;;  %3627 = vadd.xlane.f32.xlu0 %v3626_v0 }
 0xe7d   : > { %v3541_v49 = vpop.xlane.xlu1 %3540  ;;  %v3629_v28 = vsel %vm1059_vm0, %v8269_v11, 0.0 }
 0xe7e   : > { %6823 = vpow2.f32 %v3586_v35  ;;  %v3592_v10 = vmul.f32 1.442695, %v3568_v36  ;;  %v3569_v18 = vsub.f32 %v8204_v61, %v3541_v49  ;;  %3630 = vadd.xlane.f32.xlu1 %v3629_v28 }
 0xe7f   : > { %v3550_v55 = vpop.xlane.xlu0 %3549 }
 0xe80   : > { %6825 = vpow2.f32 %v3592_v10  ;;  %v3594_v32 = vmul.f32 1.442695, %v3569_v18  ;;  %v3572_v62 = vsub.f32 %v8208_v1, %v3550_v55 }
 0xe81   : > { %v3221_v51 = vpop.permute.xlu1 %3220 }
 0xe82   : > { %v8275_v29 = vpop.eup %6817  ;;  %6827 = vpow2.f32 %v3594_v32  ;;  %v3600_v30 = vmul.f32 1.442695, %v3572_v62 }
 0xe83   : > { %v3556_v46 = vpop.xlane.xlu0 %3555  ;;  %v3638_v40 = vsel %vm1059_vm0, %v8275_v29, 0.0 }
 0xe84   : > { %v8280_v50 = vpop.eup %6819  ;;  %v3574_v12 = vsub.f32 %v8215_v2, %v3556_v46  ;;  %3639 = vadd.xlane.f32.xlu0 %v3638_v40 }
 0xe85   : > { %v8283_v61 = vpop.permute.xlu1 %3224  ;;  %v3641_v3 = vsel %vm1059_vm0, %v8280_v50, 0.0 }
 0xe86   : > { %v8287_v47 = vpop.eup %6821  ;;  %v3604_v38 = vmul.f32 1.442695, %v3574_v12  ;;  %6232 = vmatprep.subr.bf16.mxu0 %v8283_v61  ;;  %3642 = vadd.xlane.f32.xlu1 %v3641_v3 }
 0xe87   : > { %v3219_v1 = vpop.permute.xlu0 %3218  ;;  %v3620_v48 = vsel %vm1059_vm0, %v8287_v47, 0.0 }
 0xe88   : > { %v8292_v25 = vpop.eup %6823  ;;  %6829 = vpow2.f32 %v3604_v38  ;;  %3621 = vadd.xlane.f32.xlu0 %v3620_v48  ;;  %6224 = vmatprep.subr.bf16.mxu1 %v3219_v1 }
 0xe89   : > { %6225 = vmatpush3.bf16.msra.mxu1 %v3219_v1  ;;  %v3623_v2 = vsel %vm1059_vm0, %v8292_v25, 0.0  ;;  %6831 = vpow2.f32 %v3600_v30 }
 0xe8a   : > { %v8296_v31 = vpop.eup %6825  ;;  %3624 = vadd.xlane.f32.xlu1 %v3623_v2  ;;  %6226 = vmatprep.subr.bf16.mxu1 %v3221_v51 }
 0xe8b   : > { %v3632_v53 = vsel %vm1059_vm0, %v8296_v31, 0.0 }
 0xe8c   : > { %v8300_v5 = vpop.eup %6827  ;;  %3633 = vadd.xlane.f32.xlu0 %v3632_v53 }
 0xe8d   : > { %6227 = vmatpush3.bf16.msra.mxu1 %v3221_v51  ;;  %v3635_v33 = vsel %vm1059_vm0, %v8300_v5, 0.0 }
 0xe8e   : > { %3636 = vadd.xlane.f32.xlu1 %v3635_v33 }
 0xe92   : > { %v8304_v7 = vpop.eup %6829 }
 0xe93   : > { %v3650_v8 = vsel %vm1059_vm0, %v8304_v7, 0.0  ;;  %v8308_v60 = vpop.eup %6831 }
 0xe94   : > { %3651 = vadd.xlane.f32.xlu0 %v3650_v8  ;;  %v3644_v21 = vsel %vm1059_vm0, %v8308_v60, 0.0 }
 0xe98   : > { %3645 = vadd.xlane.f32.xlu0 %v3644_v21 }
 0xeae   : > { %3226 = vrot.lane.b32.xlu0 %v8106_v24, %s8987_s21 }
 0xeb6   : > { %v3559_v20 = vpop.xlane.xlu1 %3558 }
 0xeb7   : > { %v3575_v45 = vsub.f32 %v8230_v23, %v3559_v20 }
 0xeb9   : > { %v3606_v59 = vmul.f32 1.442695, %v3575_v45 }
 0xeba   : > { %v3553_v27 = vpop.xlane.xlu1 %3552 }
 0xebb   : > { %6833 = vpow2.f32 %v3606_v59  ;;  %v3573_v34 = vsub.f32 %v8235_v22, %v3553_v27  ;;  %v3616_v22 = vpop.xlane.xlu0 %3615 }
 0xebd   : > { %v3602_v13 = vmul.f32 1.442695, %v3573_v34 }
 0xebe   : > { %v8316_v43 = vpop.permute.xlu1 %3230 }
 0xebf   : > { %6835 = vpow2.f32 %v3602_v13  ;;  %6240 = vmatprep.subr.bf16.mxu1 %v8316_v43  ;;  %v3610_v37 = vpop.xlane.xlu0 %3609 }
 0xec5   : > { %v8319_v56 = vpop.eup %6833 }
 0xec6   : > { %v3653_v6 = vsel %vm1059_vm0, %v8319_v56, 0.0 }
 0xec7   : > { %3654 = vadd.xlane.f32.xlu1 %v3653_v6 }
 0xec9   : > { %v8323_v54 = vpop.eup %6835 }
 0xeca   : > { %v3647_v23 = vsel %vm1059_vm0, %v8323_v54, 0.0 }
 0xecb   : > { %3648 = vadd.xlane.f32.xlu1 %v3647_v23 }
 0xedc   : > { %3232 = vrot.lane.b32.xlu1 %v8106_v24, %s8986_s23 }
 0xeef   : > { %v3619_v44 = vpop.xlane.xlu1 %3618 }
 0xef0   : > { %6837 = vrcp.f32 %v3619_v44 }
 0xef1   : > { %6839 = vrcp.f32 %v3610_v37 }
 0xef2   : > { %6841 = vrcp.f32 %v3616_v22 }
 0xef3   : > { %v3613_v0 = vpop.xlane.xlu1 %3612 }
 0xef4   : > { %6843 = vrcp.f32 %v3613_v0 }
 0xefa   : > { %v6838_v35 = vpop.eup %6837 }
 0xefb   : > { %v6840_v36 = vpop.eup %6839  ;;  %v3675_v10 = vmul.f32 %v6838_v35, %v8251_v58 }
 0xefc   : > { %v6842_v49 = vpop.eup %6841  ;;  %v3672_v18 = vmul.f32 %v6840_v36, %v8241_v26 }
 0xefd   : > { %v3674_v24 = vmul.f32 %v6842_v49, %v8232_v63 }
 0xefe   : > { %v6844_v28 = vpop.eup %6843 }
 0xeff   : > { %v3673_v55 = vmul.f32 %v6844_v28, %v8255_v4  ;;  %v3689_v51 = vpack.c.bf16 %v3675_v10, %v3674_v24  ;;  %v6582_v24 = vld [vmem:[%s8937_s6 + $0x48] sm:$0xff]  }
 0xf01   : > { %v3688_v32 = vpack.c.bf16 %v3673_v55, %v3672_v18 }
 0xf03   : > { %6220 = vmatprep.mubr.msk.bf16.mxu0 %vm1059_vm0, %v3688_v32 }
 0xf04   : > { %6221 = vmatmul.mubr.msk.bf16.vlgmr.msra.gmra.mrb[48].mxu0 %vm1059_vm0, %v3689_v51 }
 0xf05   : > { %6233 = vmatpush3.bf16.msra.mxu0 %v8283_v61 }
 0xf09   : > { %v3628_v62 = vpop.xlane.xlu0 %3627 }
 0xf0b   : > { %v3631_v46 = vpop.xlane.xlu1 %3630 }
 0xf0c   : > { %6845 = vrcp.f32 %v3631_v46 }
 0xf11   : > { %v3640_v40 = vpop.xlane.xlu0 %3639 }
 0xf13   : > { %v3643_v12 = vpop.xlane.xlu1 %3642 }
 0xf15   : > { %v3622_v58 = vpop.xlane.xlu0 %3621 }
 0xf16   : > { %6847 = vrcp.f32 %v3622_v58  ;;  %v6846_v3 = vpop.eup %6845 }
 0xf17   : > { %6849 = vrcp.f32 %v3628_v62  ;;  %v3625_v26 = vpop.xlane.xlu1 %3624  ;;  %v3679_v48 = vmul.f32 %v6846_v3, %v8269_v11  ;;  %v6584_v3 = vld [vmem:[%s8937_s6 + $0x58] sm:$0xff]  }
 0xf18   : > { %6851 = vrcp.f32 %v3625_v26 }
 0xf19   : > { %v3634_v4 = vpop.xlane.xlu0 %3633 }
 0xf1a   : > { %6853 = vrcp.f32 %v3634_v4 }
 0xf1b   : > { %6855 = vrcp.f32 %v3643_v12  ;;  %v3637_v63 = vpop.xlane.xlu1 %3636 }
 0xf1c   : > { %6857 = vrcp.f32 %v3637_v63 }
 0xf1d   : > { %6859 = vrcp.f32 %v3640_v40  ;;  %v6583_v40 = vld [vmem:[%s8937_s6 + $0x50] sm:$0xff]  }
 0xf20   : > { %v6848_v30 = vpop.eup %6847 }
 0xf21   : > { %v6850_v38 = vpop.eup %6849  ;;  %v3652_v61 = vpop.xlane.xlu0 %3651  ;;  %v3676_v2 = vmul.f32 %v6848_v30, %v8287_v47 }
 0xf22   : > { %v6852_v1 = vpop.eup %6851  ;;  %v3678_v8 = vmul.f32 %v6850_v38, %v8264_v42  ;;  %v6585_v38 = vld [vmem:[%s8937_s6 + $0x60] sm:$0xff]  }
 0xf23   : > { %v3677_v53 = vmul.f32 %v6852_v1, %v8292_v25  ;;  %v6587_v1 = vld [vmem:[%s8937_s6 + $0x70] sm:$0xff]  }
 0xf24   : > { %v6854_v33 = vpop.eup %6853  ;;  %v3691_v27 = vpack.c.bf16 %v3679_v48, %v3678_v8  ;;  %v6588_v48 = vld [vmem:[%s8937_s6 + $0x78] sm:$0xff]  }
 0xf25   : > { %v6856_v21 = vpop.eup %6855  ;;  %v3646_v20 = vpop.xlane.xlu0 %3645  ;;  %v3690_v45 = vpack.c.bf16 %v3677_v53, %v3676_v2  ;;  %v3680_v13 = vmul.f32 %v6854_v33, %v8296_v31 }
 0xf26   : > { %v6858_v59 = vpop.eup %6857  ;;  %v3683_v11 = vmul.f32 %v6856_v21, %v8280_v50 }
 0xf27   : > { %v6860_v34 = vpop.eup %6859  ;;  %6228 = vmatprep.mubr.msk.bf16.mxu1 %vm1059_vm0, %v3690_v45  ;;  %v3681_v6 = vmul.f32 %v6858_v59, %v8300_v5 }
 0xf28   : > { %6229 = vmatmul.mubr.msk.bf16.vlgmr.msra.gmra.mrb[60].mxu1 %vm1059_vm0, %v3691_v27  ;;  %v3682_v25 = vmul.f32 %v6860_v34, %v8275_v29 }
 0xf29   : > { %6241 = vmatpush3.bf16.msra.mxu1 %v8316_v43  ;;  %v3227_v47 = vpop.permute.xlu0 %3226  ;;  %v3692_v42 = vpack.c.bf16 %v3681_v6, %v3680_v13 }
 0xf2a   : > { %6234 = vmatprep.subr.bf16.mxu0 %v3227_v47  ;;  %v3693_v23 = vpack.c.bf16 %v3683_v11, %v3682_v25 }
 0xf2b   : > { %6235 = vmatpush3.bf16.msra.mxu0 %v3227_v47  ;;  %6236 = vmatprep.mubr.msk.bf16.mxu0 %vm1059_vm0, %v3692_v42 }
 0xf2e   : > { %6237 = vmatmul.mubr.msk.bf16.vlgmr.msra.gmra.mrb[52].mxu0 %vm1059_vm0, %v3693_v23 }
 0xf54   : > { %v3655_v31 = vpop.xlane.xlu1 %3654 }
 0xf55   : > { %6861 = vrcp.f32 %v3655_v31 }
 0xf56   : > { %6863 = vrcp.f32 %v3646_v20 }
 0xf57   : > { %6865 = vrcp.f32 %v3652_v61  ;;  %v6586_v61 = vld [vmem:[%s8937_s6 + $0x68] sm:$0xff]  }
 0xf58   : > { %v3649_v50 = vpop.xlane.xlu1 %3648 }
 0xf59   : > { %6867 = vrcp.f32 %v3649_v50 }
 0xf5c   : > { %v3233_v5 = vpop.permute.xlu1 %3232 }
 0xf5d   : > { %6242 = vmatprep.subr.bf16.mxu1 %v3233_v5 }
 0xf5e   : > { %6243 = vmatpush3.bf16.msra.mxu1 %v3233_v5 }
 0xf5f   : > { %v6862_v43 = vpop.eup %6861 }
 0xf60   : > { %v6864_v22 = vpop.eup %6863  ;;  %v3687_v44 = vmul.f32 %v6862_v43, %v8319_v56 }
 0xf61   : > { %v6866_v37 = vpop.eup %6865  ;;  %v3684_v0 = vmul.f32 %v6864_v22, %v8308_v60 }
 0xf62   : > { %v3686_v36 = vmul.f32 %v6866_v37, %v8304_v7  ;;  %v6581_v7 = vld [vmem:[%s8937_s6 + $0x40] sm:$0xff]  }
 0xf63   : > { %v6868_v29 = vpop.eup %6867  ;;  %6248 = vmatprep.subr.bf16.mxu0 %v6581_v7 }
 0xf64   : > { %v3685_v35 = vmul.f32 %v6868_v29, %v8323_v54  ;;  %v3695_v28 = vpack.c.bf16 %v3687_v44, %v3686_v36  ;;  %6249 = vmatpush3.bf16.msra.mxu0 %v6581_v7 }
 0xf65   : > { %6250 = vmatprep.subr.bf16.mxu0 %v6582_v24 }
 0xf66   : > { %v3694_v49 = vpack.c.bf16 %v3685_v35, %v3684_v0 }
 0xf68   : > { %6244 = vmatprep.mubr.msk.bf16.mxu1 %vm1059_vm0, %v3694_v49  ;;  %6251 = vmatpush3.bf16.msra.mxu0 %v6582_v24 }
 0xf69   : > { %6245 = vmatmul.mubr.msk.bf16.vlgmr.msra.gmra.mrb[64].mxu1 %vm1059_vm0, %v3695_v28  ;;  %6252 = vmatprep.subr.bf16.mxu0 %v6583_v40 }
 0xf6a   : > { %4422 = vmatprep.mubr.bf16.mxu1 %v6985_v39 }
 0xf6c   : > { %6253 = vmatpush3.bf16.msra.mxu0 %v6583_v40 }
 0xf6d   : > { %6254 = vmatprep.subr.bf16.mxu0 %v6584_v3 }
 0xf70   : > { %6255 = vmatpush3.bf16.msra.mxu0 %v6584_v3 }
 0xf71   : > { %6256 = vmatprep.subr.bf16.mxu0 %v6585_v38 }
 0xf74   : > { %6257 = vmatpush3.bf16.msra.mxu0 %v6585_v38 }
 0xf75   : > { %6258 = vmatprep.subr.bf16.mxu0 %v6586_v61 }
 0xf78   : > { %6259 = vmatpush3.bf16.msra.mxu0 %v6586_v61  ;;  %v6589_v61 = vld [vmem:[%s8941_s10 + $0x100] ss:$16 sps:$4 sm:$0xff]  }
 0xf79   : > { %6260 = vmatprep.subr.bf16.mxu0 %v6587_v1 }
 0xf7c   : > { %6261 = vmatpush3.bf16.msra.mxu0 %v6587_v1  ;;  %v6600_v1 = vld [vmem:[%s8941_s10 + $0x12c] ss:$16 sps:$4 sm:$0xff]  }
 0xf7d   : > { %6262 = vmatprep.subr.bf16.mxu0 %v6588_v48 }
 0xf80   : > { %6263 = vmatpush3.bf16.msra.mxu0 %v6588_v48  ;;  %v6595_v48 = vld [vmem:[%s8941_s10 + $0x120] ss:$16 sps:$4 sm:$0xff]  }
 0xfd7   : > { %v8356_v10 = vpop.f32.mrb[48].mxu0 }
 0xfd8   : > { %v8358_v18 = vpop.f32.mrb[49].mxu0 }
 0xfd9   : > { %v8360_v55 = vpop.f32.mrb[50].mxu0 }
 0xfda   : > { %v8362_v56 = vpop.f32.mrb[51].mxu0 }
 0xffb   : > { %v6230_v60 = vpop.f32.mrb[60].mxu1 }
 0xffc   : > { %v3791_v54 = vpop.f32.mrb[61].mxu1 }
 0xffd   : > { %v6231_v32 = vpop.f32.mrb[62].mxu1 }
 0xffe   : > { %v6399_v51 = vpack.i.bf16 %v6231_v32, %v6230_v60  ;;  %v3794_v62 = vpop.f32.mrb[63].mxu1  ;;  %v5622_v32 = vld [vmem:[%s8938_s7 + $0x1] ss:$0 sm:$0xff] }
 0xfff   : > { %v6409_v46 = vpack.i.bf16 %v3794_v62, %v3791_v54 }
0x1000   : > { %6400 = vrot.lane.b32.xlu1 %v6399_v51, %s8986_s23 }
0x1001   : > { %6410 = vrot.lane.b32.xlu0 %v6409_v46, %s8986_s23  ;;  %v6238_v12 = vpop.f32.mrb[52].mxu0  ;;  %s8988_s23 = sld [smem:[#allocation16_spill]] }
0x1002   : > { %v3846_v58 = vpop.f32.mrb[53].mxu0 }
0x1003   : > { %v6239_v26 = vpop.f32.mrb[54].mxu0 }
0x1004   : > { %v6404_v4 = vpack.i.bf16 %v6239_v26, %v6238_v12  ;;  %v3849_v63 = vpop.f32.mrb[55].mxu0 }
0x1005   : > { %v6414_v30 = vpack.i.bf16 %v3849_v63, %v3846_v58 }
0x1006   : > { %6405 = vrot.lane.b32.xlu1 %v6404_v4, %s8987_s21 }
0x1007   : > { %6415 = vrot.lane.b32.xlu0 %v6414_v30, %s8987_s21  ;;  %s8989_s28 = smov %s8988_s23  ;;  %s5319_s21 = scalar_lea.sflag [#allocation3], %s635_s20 }
0x103c   : > { %v6246_v2 = vpop.f32.mrb[64].mxu1 }
0x103d   : > { %v3901_v53 = vpop.f32.mrb[65].mxu1 }
0x103e   : > { %v6247_v33 = vpop.f32.mrb[66].mxu1 }
0x103f   : > { %v6424_v8 = vpack.i.bf16 %v6247_v33, %v6246_v2  ;;  %v3904_v21 = vpop.f32.mrb[67].mxu1  ;;  %v6598_v2 = vld [vmem:[%s8941_s10 + $0x128] ss:$16 sps:$4 sm:$0xff]  }
0x1040   : > { %v6419_v20 = vpack.i.bf16 %v3904_v21, %v3901_v53 }
0x1041   : > { %6425 = vrot.lane.b32.xlu1 %v6424_v8, %s8985_s1 }
0x1042   : > { %6420 = vrot.lane.b32.xlu0 %v6419_v20, %s8985_s1  ;;  %s5821_s1 = sshll.u32 %s7118_s2, 5  ;;  %s6921_s2 = scalar_lea.vmem %s8891_s29, 32 }
0x1043   : > { %s8889_s25 = scalar_lea.hbm %s8988_s23, %s5821_s1  ;;  %p6922_p11 = scmp.ne.s32.totalorder %s8891_s29, %s6921_s2 }
0x1044   : > { %p6929_p1 = scmp.lt.s32.totalorder %s6927_s26, %s6921_s2 }
0x1045   : > { %p6923_p12 = pnand %p6922_p11, %p7135_p5 }
0x1046   : > { %p6930_p2 = por %p6929_p1, %p6928_p0 }
0x1047   : > { %p6924_p13 = pneg %p6923_p12 }
0x1049   : > { %p6931_p3 = pnand %p6930_p2, %p6924_p13 }
0x1072   : > { %v6401_v45 = vpop.permute.xlu1 %6400 }
0x1073   : > { %v6411_v59 = vpop.permute.xlu0 %6410  ;;  %v6403_v34 = vunpack.i.h.bf16 %v6401_v45  ;;  %v6402_v13 = vunpack.i.l.bf16 %v6401_v45 }
0x1074   : > { %v6413_v11 = vunpack.i.h.bf16 %v6411_v59  ;;  %v6412_v47 = vunpack.i.l.bf16 %v6411_v59 }
0x1075   : > { %v3967_v50 = vsel %vm1059_vm0, %v8360_v55, %v6403_v34  ;;  %v3966_v5 = vsel %vm1059_vm0, %v8356_v10, %v6402_v13 }
0x1076   : > { %v3965_v22 = vsel %vm1059_vm0, %v8362_v56, %v6413_v11  ;;  %v3964_v37 = vsel %vm1059_vm0, %v8358_v18, %v6412_v47 }
0x1078   : > { %v6406_v27 = vpop.permute.xlu1 %6405 }
0x1079   : > { %v6416_v6 = vpop.permute.xlu0 %6415  ;;  %v6408_v42 = vunpack.i.h.bf16 %v6406_v27  ;;  %v6407_v25 = vunpack.i.l.bf16 %v6406_v27 }
0x107a   : > { %v6418_v23 = vunpack.i.h.bf16 %v6416_v6  ;;  %v6417_v31 = vunpack.i.l.bf16 %v6416_v6 }
0x107b   : > { %v3971_v35 = vsel %vm1792_vm1, %v3967_v50, %v6408_v42  ;;  %v3970_v36 = vsel %vm1792_vm1, %v3966_v5, %v6407_v25  ;;  %v6606_v50 = vld [vmem:[%s8941_s10 + $0x14c] ss:$16 sps:$4 sm:$0xff]   ;;  %v6601_v5 = vld [vmem:[%s8941_s10 + $0x140] ss:$16 sps:$4 sm:$0xff]  }
0x107c   : > { %v3968_v55 = vsel %vm1792_vm1, %v3964_v37, %v6417_v31  ;;  %v3969_v10 = vsel %vm1792_vm1, %v3965_v22, %v6418_v23  ;;  %v6603_v31 = vld [vmem:[%s8941_s10 + $0x144] ss:$16 sps:$4 sm:$0xff]   ;;  %v6612_v37 = vld [vmem:[%s8941_s10 + $0x16c] ss:$16 sps:$4 sm:$0xff]  }
0x107d   : > { %v6609_v22 = vld [vmem:[%s8941_s10 + $0x164] ss:$16 sps:$4 sm:$0xff]  }
0x10b3   : > { %v6426_v43 = vpop.permute.xlu1 %6425 }
0x10b4   : > { %v6428_v29 = vunpack.i.h.bf16 %v6426_v43  ;;  %v6427_v44 = vunpack.i.l.bf16 %v6426_v43  ;;  %v6421_v0 = vpop.permute.xlu0 %6420  ;;  %v6604_v43 = vld [vmem:[%s8941_s10 + $0x148] ss:$16 sps:$4 sm:$0xff]  }
0x10b5   : > { %v6423_v49 = vunpack.i.h.bf16 %v6421_v0  ;;  %v6422_v28 = vunpack.i.l.bf16 %v6421_v0  ;;  %v6613_v0 = vld [vmem:[%s8941_s10 + $0x180] ss:$16 sps:$4 sm:$0xff]  }
0x10b6   : > { %v3974_v60 = vsel %vm1797_vm2, %v3970_v36, %v6427_v44  ;;  %v3975_v56 = vsel %vm1797_vm2, %v3971_v35, %v6428_v29  ;;  %v6607_v29 = vld [vmem:[%s8941_s10 + $0x160] ss:$16 sps:$4 sm:$0xff]   ;;  %v6610_v44 = vld [vmem:[%s8941_s10 + $0x168] ss:$16 sps:$4 sm:$0xff]   ;;  %v6615_v35 = vld [vmem:[%s8941_s10 + $0x184] ss:$16 sps:$4 sm:$0xff]  }
0x10b7   : > { %v3977_v54 = vpack.c.bf16 %v3975_v56, %v3974_v60  ;;  %v3972_v18 = vsel %vm1797_vm2, %v3968_v55, %v6422_v28  ;;  %v3973_v7 = vsel %vm1797_vm2, %v3969_v10, %v6423_v49  ;;  %v6616_v36 = vld [vmem:[%s8941_s10 + $0x188] ss:$16 sps:$4 sm:$0xff]   ;;  %v6618_v49 = vld [vmem:[%s8941_s10 + $0x18c] ss:$16 sps:$4 sm:$0xff]   ;;  %v6621_v28 = vld [vmem:[%s8941_s10 + $0x1a4] ss:$16 sps:$4 sm:$0xff]  }
0x10b8   : > { %v3976_v24 = vpack.c.bf16 %v3973_v7, %v3972_v18  ;;  %v6624_v55 = vld [vmem:[%s8941_s10 + $0x1ac] ss:$16 sps:$4 sm:$0xff]   ;;  %v6619_v10 = vld [vmem:[%s8941_s10 + $0x1a0] ss:$16 sps:$4 sm:$0xff]   ;;  %v6622_v60 = vld [vmem:[%s8941_s10 + $0x1a8] ss:$16 sps:$4 sm:$0xff]  }
0x10b9   : > { %v6627_v56 = vld [vmem:[%s8941_s10 + $0x1c4] ss:$16 sps:$4 sm:$0xff]   ;;  %v6625_v18 = vld [vmem:[%s8941_s10 + $0x1c0] ss:$16 sps:$4 sm:$0xff]   ;;  %v6628_v7 = vld [vmem:[%s8941_s10 + $0x1c8] ss:$16 sps:$4 sm:$0xff]  }
0x10ba   : > { %6264 = vmatprep.mubr.bf16.mxu0 %v3976_v24  ;;  %v6633_v24 = vld [vmem:[%s8941_s10 + $0x1e4] ss:$16 sps:$4 sm:$0xff]  }
0x10bb   : > { %6265 = vmatmul.mubr.bf16.vlgmr.msra.gmra.mrb[56].mxu0 %v3977_v54  ;;  %v6630_v54 = vld [vmem:[%s8941_s10 + $0x1cc] ss:$16 sps:$4 sm:$0xff]  }
0x10bc   : > { %4475 = vmatprep.mubr.bf16.mxu0 %v6985_v39 }
0x118e   : > { %v6266_v51 = vpop.f32.mrb[56].mxu0 }
0x118f   : > { %v4085_v62 = vpop.f32.mrb[57].mxu0  ;;  %v4094_v58 = vadd.f32 %v6266_v51, %v5622_v32  ;;  %v6631_v51 = vld [vmem:[%s8941_s10 + $0x1e0] ss:$16 sps:$4 sm:$0xff]  }
0x1190   : > { %v4086_v46 = vadd.f32 %v5622_v32, %v4085_v62  ;;  %v6267_v40 = vpop.f32.mrb[58].mxu0  ;;  %v6634_v62 = vld [vmem:[%s8941_s10 + $0x1e8] ss:$16 sps:$4 sm:$0xff]  }
0x1191   : > { %v4088_v12 = vpop.f32.mrb[59].mxu0  ;;  %v4102_v3 = vadd.f32 %v4094_v58, %v8089_v52  ;;  %v4097_v30 = vadd.f32 %v6267_v40, %v5622_v32  ;;  %v6594_v52 = vld [vmem:[%s8941_s10 + $0x10c] ss:$16 sps:$4 sm:$0xff]  }
0x1192   : > { %v4100_v26 = vadd.f32 %v4086_v46, %v8080_v16  ;;  %v4089_v4 = vadd.f32 %v5622_v32, %v4088_v12  ;;  %v6591_v16 = vld [vmem:[%s8941_s10 + $0x104] ss:$16 sps:$4 sm:$0xff]   ;;  %4443 = vmatprep.subr.bf16.mxu0 %v6594_v52  ;;  %v6636_v32 = vld [vmem:[%s8941_s10 + $0x1ec] ss:$16 sps:$4 sm:$0xff]   ;;  %v5633_v52 = vld [vmem:[%s8939_s8 + $0x1] ss:$0 sm:$0xff] }
0x1193   : > { %v4103_v38 = vadd.f32 %v4097_v30, %v8091_v41  ;;  %v6597_v41 = vld [vmem:[%s8941_s10 + $0x124] ss:$16 sps:$4 sm:$0xff]   ;;  %4390 = vmatprep.subr.bf16.mxu1 %v6591_v16 }
0x1194   : > { %v4101_v63 = vadd.f32 %v4089_v4, %v8082_v9  ;;  %4108 = vadd.xlane.f32.xlu0 %v4100_v26  ;;  %v6592_v9 = vld [vmem:[%s8941_s10 + $0x108] ss:$16 sps:$4 sm:$0xff]   ;;  %4391 = vmatpush1.bf16.msra.mxu1 %v6589_v61 }
0x1195   : > { %4444 = vmatpush1.bf16.msra.mxu0 %v6592_v9  ;;  %4392 = vmatprep.subr.bf16.mxu1 %v6597_v41 }
0x1196   : > { %4110 = vadd.xlane.f32.xlu1 %v4101_v63  ;;  %4445 = vmatprep.subr.bf16.mxu0 %v6600_v1 }
0x1198   : > { %4112 = vadd.xlane.f32.xlu0 %v4102_v3  ;;  %4393 = vmatpush1.bf16.msra.mxu1 %v6595_v48 }
0x1199   : > { %4446 = vmatpush1.bf16.msra.mxu0 %v6598_v2  ;;  %4394 = vmatprep.subr.bf16.mxu1 %v6603_v31  ;;  %v6640_v31 = vld [vmem:[%s8943_s12 + $0x180] sm:$0xff]  }
0x119a   : > { %4447 = vmatprep.subr.bf16.mxu0 %v6606_v50  ;;  %v6641_v50 = vld [vmem:[%s8943_s12 + $0x148] sm:$0xff]  }
0x119c   : > { %4114 = vadd.xlane.f32.xlu0 %v4103_v38  ;;  %4395 = vmatpush1.bf16.msra.mxu1 %v6601_v5  ;;  %v6642_v5 = vld [vmem:[%s8943_s12 + $0x1c8] sm:$0xff]  }
0x119d   : > { %4448 = vmatpush1.bf16.msra.mxu0 %v6604_v43  ;;  %4396 = vmatprep.subr.bf16.mxu1 %v6609_v22  ;;  %v6643_v43 = vld [vmem:[%s8943_s12 + $0x108] sm:$0xff]  }
0x119e   : > { %4449 = vmatprep.subr.bf16.mxu0 %v6612_v37  ;;  %v6644_v22 = vld [vmem:[%s8943_s12 + $0x188] sm:$0xff]   ;;  %v6645_v37 = vld [vmem:[%s8943_s12 + $0x150] sm:$0xff]  }
0x11a0   : > { %4397 = vmatpush1.bf16.msra.mxu1 %v6607_v29  ;;  %v6646_v29 = vld [vmem:[%s8943_s12 + $0x1d0] sm:$0xff]  }
0x11a1   : > { %4450 = vmatpush1.bf16.msra.mxu0 %v6610_v44  ;;  %4398 = vmatprep.subr.bf16.mxu1 %v6615_v35  ;;  %v6647_v44 = vld [vmem:[%s8943_s12 + $0x110] sm:$0xff]   ;;  %v6649_v35 = vld [vmem:[%s8943_s12 + $0x158] sm:$0xff]  }
0x11a2   : > { %4451 = vmatprep.subr.bf16.mxu0 %v6618_v49  ;;  %v6651_v49 = vld [vmem:[%s8943_s12 + $0x118] sm:$0xff]  }
0x11a4   : > { %4399 = vmatpush1.bf16.msra.mxu1 %v6613_v0  ;;  %v6648_v0 = vld [vmem:[%s8943_s12 + $0x190] sm:$0xff]  }
0x11a5   : > { %4452 = vmatpush1.bf16.msra.mxu0 %v6616_v36  ;;  %4400 = vmatprep.subr.bf16.mxu1 %v6621_v28  ;;  %v6650_v36 = vld [vmem:[%s8943_s12 + $0x1d8] sm:$0xff]  }
0x11a6   : > { %4453 = vmatprep.subr.bf16.mxu0 %v6624_v55  ;;  %v6652_v28 = vld [vmem:[%s8943_s12 + $0x198] sm:$0xff]   ;;  %v6653_v55 = vld [vmem:[%s8943_s12 + $0x160] sm:$0xff]  }
0x11a8   : > { %4401 = vmatpush1.bf16.msra.mxu1 %v6619_v10  ;;  %v6654_v10 = vld [vmem:[%s8943_s12 + $0x1e0] sm:$0xff]  }
0x11a9   : > { %4454 = vmatpush1.bf16.msra.mxu0 %v6622_v60  ;;  %4402 = vmatprep.subr.bf16.mxu1 %v6627_v56  ;;  %v6655_v60 = vld [vmem:[%s8943_s12 + $0x120] sm:$0xff]  }
0x11aa   : > { %4455 = vmatprep.subr.bf16.mxu0 %v6630_v54  ;;  %v6656_v56 = vld [vmem:[%s8943_s12 + $0x1a0] sm:$0xff]   ;;  %v6657_v54 = vld [vmem:[%s8943_s12 + $0x168] sm:$0xff]  }
0x11ac   : > { %4403 = vmatpush1.bf16.msra.mxu1 %v6625_v18  ;;  %v6658_v18 = vld [vmem:[%s8943_s12 + $0x1e8] sm:$0xff]  }
0x11ad   : > { %4456 = vmatpush1.bf16.msra.mxu0 %v6628_v7  ;;  %4404 = vmatprep.subr.bf16.mxu1 %v6633_v24  ;;  %v6659_v7 = vld [vmem:[%s8943_s12 + $0x128] sm:$0xff]  }
0x11ae   : > { %4457 = vmatprep.subr.bf16.mxu0 %v6636_v32  ;;  %v6660_v24 = vld [vmem:[%s8943_s12 + $0x1a8] sm:$0xff]   ;;  %v6661_v32 = vld [vmem:[%s8943_s12 + $0x170] sm:$0xff]  }
0x11b0   : > { %4405 = vmatpush1.bf16.msra.mxu1 %v6631_v51  ;;  %v6662_v51 = vld [vmem:[%s8943_s12 + $0x1f0] sm:$0xff]  }
0x11b1   : > { %4458 = vmatpush1.bf16.msra.mxu0 %v6634_v62  ;;  %v6663_v62 = vld [vmem:[%s8943_s12 + $0x130] sm:$0xff]  }
0x1221   : > { %v4109_v53 = vpop.xlane.xlu0 %4108 }
0x1222   : > { %v4116_v33 = vmul.f32 0.0078125, %v4109_v53 }
0x1223   : > { %v4111_v8 = vpop.xlane.xlu1 %4110 }
0x1224   : > { %v8442_v21 = vsub.f32 %v4100_v26, %v4116_v33  ;;  %v4117_v20 = vmul.f32 0.0078125, %v4111_v8  ;;  %v5634_v33 = vld [vmem:[%s8940_s9 + $0x1] ss:$0 sm:$0xff] }
0x1225   : > { %v4113_v45 = vpop.xlane.xlu0 %4112 }
0x1226   : > { %v8444_v59 = vsub.f32 %v4101_v63, %v4117_v20  ;;  %v4118_v27 = vmul.f32 0.0078125, %v4113_v45  ;;  %v4124_v34 = vmul.f32 %v8442_v21, %v8442_v21 }
0x1228   : > { %v8448_v13 = vsub.f32 %v4102_v3, %v4118_v27  ;;  %4128 = vadd.xlane.f32.xlu0 %v4124_v34  ;;  %v4125_v6 = vmul.f32 %v8444_v59, %v8444_v59 }
0x1229   : > { %v4115_v11 = vpop.xlane.xlu0 %4114 }
0x122a   : > { %v4119_v47 = vmul.f32 0.0078125, %v4115_v11  ;;  %4130 = vadd.xlane.f32.xlu1 %v4125_v6  ;;  %v4126_v42 = vmul.f32 %v8448_v13, %v8448_v13 }
0x122c   : > { %v8454_v25 = vsub.f32 %v4103_v38, %v4119_v47  ;;  %4132 = vadd.xlane.f32.xlu0 %v4126_v42 }
0x122e   : > { %v4127_v23 = vmul.f32 %v8454_v25, %v8454_v25 }
0x1230   : > { %4134 = vadd.xlane.f32.xlu1 %v4127_v23  ;;  %v6638_v23 = vld [vmem:[%s8943_s12 + $0x1c0] sm:$0xff]  }
0x1231   : > { %6014 = vmatprep.subr.bf16.mxu0 %v6638_v23 }
0x12b5   : > { %v4129_v46 = vpop.xlane.xlu0 %4128 }
0x12b6   : > { %v4136_v40 = vmul.f32 0.0078125, %v4129_v46  ;;  %v6664_v46 = vld [vmem:[%s8943_s12 + $0x1b0] sm:$0xff]  }
0x12b7   : > { %v4131_v12 = vpop.xlane.xlu1 %4130 }
0x12b8   : > { %v4140_v58 = vadd.f32 1e-05, %v4136_v40  ;;  %v4137_v26 = vmul.f32 0.0078125, %v4131_v12  ;;  %v6665_v40 = vld [vmem:[%s8943_s12 + $0x178] sm:$0xff]  }
0x12b9   : > { %v4133_v4 = vpop.xlane.xlu0 %4132  ;;  %v6666_v12 = vld [vmem:[%s8943_s12 + $0x1f8] sm:$0xff]  }
0x12ba   : > { %6869 = vrsqrt.f32 %v4140_v58  ;;  %v4141_v63 = vadd.f32 1e-05, %v4137_v26  ;;  %v4138_v3 = vmul.f32 0.0078125, %v4133_v4  ;;  %v6667_v58 = vld [vmem:[%s8943_s12 + $0x138] sm:$0xff]   ;;  %v5667_v4 = vld [vmem:[%s8942_s11 + $0x4] sm:$0xf] }
0x12bb   : > { %v6668_v26 = vld [vmem:[%s8943_s12 + $0x1b8] sm:$0xff]  }
0x12bc   : > { %6871 = vrsqrt.f32 %v4141_v63  ;;  %v4142_v30 = vadd.f32 1e-05, %v4138_v3  ;;  %v8654_v63 = vrot.slane %v5667_v4, %v7270_v15  ;;  %v8657_v3 = vrot.slane %v5667_v4, %v7280_v19 }
0x12bd   : > { %v4135_v38 = vpop.xlane.xlu1 %4134 }
0x12be   : > { %6873 = vrsqrt.f32 %v4142_v30  ;;  %v4139_v61 = vmul.f32 0.0078125, %v4135_v38 }
0x12c0   : > { %v4143_v16 = vadd.f32 1e-05, %v4139_v61  ;;  %v8660_v61 = vrot.slane %v5667_v4, %v7276_v17 }
0x12c2   : > { %6875 = vrsqrt.f32 %v4143_v16 }
0x12c4   : > { %v6870_v9 = vpop.eup %6869 }
0x12c5   : > { %v4148_v41 = vmul.f32 %v6870_v9, %v8442_v21 }
0x12c6   : > { %v6872_v1 = vpop.eup %6871 }
0x12c7   : > { %v4149_v48 = vmul.f32 %v6872_v1, %v8444_v59  ;;  %v4158_v2 = vmul.f32 %v5633_v52, %v4148_v41  ;;  %v8666_v1 = vrot.slane %v5667_v4, %v2044_v57 }
0x12c8   : > { %v6874_v53 = vpop.eup %6873 }
0x12c9   : > { %v4159_v8 = vmul.f32 %v5633_v52, %v4149_v48  ;;  %v8538_v20 = vadd.f32 %v5634_v33, %v4158_v2  ;;  %v4150_v27 = vmul.f32 %v6874_v53, %v8448_v13 }
0x12cb   : > { %v8540_v45 = vadd.f32 %v5634_v33, %v4159_v8  ;;  %v4160_v59 = vmul.f32 %v5633_v52, %v4150_v27 }
0x12cc   : > { %v6876_v34 = vpop.eup %6875 }
0x12cd   : > { %v4172_v21 = vpack.c.bf16 %v8540_v45, %v8538_v20  ;;  %v4151_v6 = vmul.f32 %v6876_v34, %v8454_v25  ;;  %v8550_v42 = vadd.f32 %v5634_v33, %v4160_v59  ;;  %v6637_v25 = vld [vmem:[%s8943_s12 + $0x140] sm:$0xff]  }
0x12ce   : > { %5986 = vmatprep.subr.bf16.mxu1 %v6637_v25 }
0x12cf   : > { %4423 = vmatmul.mubr.bf16.vlgmr.msra.gmra.mrb[68].mxu1 %v4172_v21  ;;  %4476 = vmatmul.mubr.bf16.vlgmr.msra.gmra.mrb[60].mxu0 %v4172_v21  ;;  %v4161_v11 = vmul.f32 %v5633_v52, %v4151_v6 }
0x12d0   : > { %4432 = vmatprep.mubr.bf16.mxu1 %v6985_v39  ;;  %4485 = vmatprep.mubr.bf16.mxu0 %v6985_v39  ;;  %v6639_v39 = vld [vmem:[%s8943_s12 + $0x100] sm:$0xff]  }
0x12d1   : > { %v8548_v47 = vadd.f32 %v5634_v33, %v4161_v11  ;;  %5987 = vmatpush3.bf16.msra.mxu1 %v6639_v39  ;;  %6015 = vmatpush3.bf16.msra.mxu0 %v6640_v31 }
0x12d2   : > { %5988 = vmatprep.subr.bf16.mxu1 %v6641_v50  ;;  %6016 = vmatprep.subr.bf16.mxu0 %v6642_v5 }
0x12d3   : > { %v4173_v13 = vpack.c.bf16 %v8548_v47, %v8550_v42 }
0x12d5   : > { %5989 = vmatpush3.bf16.msra.mxu1 %v6643_v43  ;;  %6017 = vmatpush3.bf16.msra.mxu0 %v6644_v22 }
0x12d6   : > { %5990 = vmatprep.subr.bf16.mxu1 %v6645_v37  ;;  %6018 = vmatprep.subr.bf16.mxu0 %v6646_v29 }
0x12d7   : > { %4433 = vmatmul.mubr.bf16.gmra.mrb[72].mxu1 %v4173_v13  ;;  %4486 = vmatmul.mubr.bf16.gmra.mrb[64].mxu0 %v4173_v13 }
0x12d9   : > { %5991 = vmatpush3.bf16.msra.mxu1 %v6647_v44  ;;  %6019 = vmatpush3.bf16.msra.mxu0 %v6648_v0 }
0x12da   : > { %5992 = vmatprep.subr.bf16.mxu1 %v6649_v35  ;;  %6020 = vmatprep.subr.bf16.mxu0 %v6650_v36 }
0x12dd   : > { %5993 = vmatpush3.bf16.msra.mxu1 %v6651_v49  ;;  %6021 = vmatpush3.bf16.msra.mxu0 %v6652_v28 }
0x12de   : > { %5994 = vmatprep.subr.bf16.mxu1 %v6653_v55  ;;  %6022 = vmatprep.subr.bf16.mxu0 %v6654_v10 }
0x12e1   : > { %5995 = vmatpush3.bf16.msra.mxu1 %v6655_v60  ;;  %6023 = vmatpush3.bf16.msra.mxu0 %v6656_v56 }
0x12e2   : > { %5996 = vmatprep.subr.bf16.mxu1 %v6657_v54  ;;  %6024 = vmatprep.subr.bf16.mxu0 %v6658_v18 }
0x12e5   : > { %5997 = vmatpush3.bf16.msra.mxu1 %v6659_v7  ;;  %6025 = vmatpush3.bf16.msra.mxu0 %v6660_v24 }
0x12e6   : > { %5998 = vmatprep.subr.bf16.mxu1 %v6661_v32  ;;  %6026 = vmatprep.subr.bf16.mxu0 %v6662_v51 }
0x12e9   : > { %5999 = vmatpush3.bf16.msra.mxu1 %v6663_v62  ;;  %6027 = vmatpush3.bf16.msra.mxu0 %v6664_v46 }
0x12ea   : > { %6000 = vmatprep.subr.bf16.mxu1 %v6665_v40  ;;  %6028 = vmatprep.subr.bf16.mxu0 %v6666_v12 }
0x12ed   : > { %6001 = vmatpush3.bf16.msra.mxu1 %v6667_v58  ;;  %6029 = vmatpush3.bf16.msra.mxu0 %v6668_v26 }
0x13a2   : > { %v4424_v30 = vpop.f32.mrb[68].mxu1  ;;  %v4477_v38 = vpop.f32.mrb[60].mxu0 }
0x13a3   : > { %v4425_v16 = vadd.f32 %v4424_v30, %v8654_v63  ;;  %v4478_v9 = vadd.f32 %v4477_v38, %v8657_v3  ;;  %v4426_v52 = vpop.f32.mrb[69].mxu1  ;;  %v4479_v41 = vpop.f32.mrb[61].mxu0 }
0x13a4   : > { %v4428_v15 = vpop.f32.mrb[70].mxu1  ;;  %v4481_v48 = vpop.f32.mrb[62].mxu0  ;;  %v8669_v53 = vadd.f32 %v4426_v52, %v8660_v61  ;;  %v8679_v57 = vadd.f32 %v4479_v41, %v8666_v1 }
0x13a5   : > { %v4512_v2 = vmul.f32 0.044715, %v4425_v16  ;;  %v4514_v19 = vmul.f32 0.044715, %v4478_v9  ;;  %v4429_v17 = vadd.f32 %v4428_v15, %v8654_v63  ;;  %v8673_v33 = vadd.f32 %v4481_v48, %v8657_v3  ;;  %v4430_v8 = vpop.f32.mrb[71].mxu1  ;;  %v4483_v27 = vpop.f32.mrb[63].mxu0 }
0x13a6   : > { %v8676_v14 = vadd.f32 %v4430_v8, %v8660_v61  ;;  %v8682_v59 = vadd.f32 %v4483_v27, %v8666_v1  ;;  %v8684_v11 = vmul.f32 0.5, %v4425_v16  ;;  %v4513_v39 = vmul.f32 0.044715, %v8669_v53 }
0x13a7   : > { %v4528_v34 = vmul.f32 %v4512_v2, %v4425_v16  ;;  %v4530_v21 = vmul.f32 %v4514_v19, %v4478_v9  ;;  %v4516_v6 = vmul.f32 0.044715, %v4429_v17  ;;  %v4518_v23 = vmul.f32 0.044715, %v8673_v33 }
0x13a8   : > { %v4517_v50 = vmul.f32 0.044715, %v8676_v14  ;;  %v8689_v37 = vmul.f32 0.5, %v4478_v9  ;;  %v4515_v36 = vmul.f32 0.044715, %v8679_v57  ;;  %v4529_v32 = vmul.f32 %v4513_v39, %v8669_v53 }
0x13a9   : > { %v4544_v13 = vmul.f32 %v4528_v34, %v4425_v16  ;;  %v4546_v25 = vmul.f32 %v4530_v21, %v4478_v9  ;;  %v4532_v31 = vmul.f32 %v4516_v6, %v4429_v17  ;;  %v4534_v44 = vmul.f32 %v4518_v23, %v8673_v33 }
0x13aa   : > { %v4434_v5 = vpop.f32.mrb[72].mxu1  ;;  %v4487_v43 = vpop.f32.mrb[64].mxu0  ;;  %v4519_v28 = vmul.f32 0.044715, %v8682_v59  ;;  %v4533_v62 = vmul.f32 %v4517_v50, %v8676_v14  ;;  %v4531_v26 = vmul.f32 %v4515_v36, %v8679_v57  ;;  %v4545_v41 = vmul.f32 %v4529_v32, %v8669_v53 }
0x13ab   : > { %v4560_v22 = vadd.f32 %v4544_v13, %v4425_v16  ;;  %v4562_v29 = vadd.f32 %v4546_v25, %v4478_v9  ;;  %v4436_v0 = vpop.f32.mrb[73].mxu1  ;;  %v4489_v35 = vpop.f32.mrb[65].mxu0  ;;  %v4548_v49 = vmul.f32 %v4532_v31, %v4429_v17  ;;  %v8695_v55 = vadd.f32 %v4434_v5, %v8654_v63 }
0x13ac   : > { %v4438_v10 = vpop.f32.mrb[74].mxu1  ;;  %v4491_v60 = vpop.f32.mrb[66].mxu0  ;;  %v4550_v18 = vmul.f32 %v4534_v44, %v8673_v33  ;;  %v8701_v46 = vadd.f32 %v4487_v43, %v8657_v3  ;;  %v8706_v58 = vadd.f32 %v4436_v0, %v8660_v61  ;;  %v4535_v30 = vmul.f32 %v4519_v28, %v8682_v59 }
0x13ad   : > { %v4576_v56 = vmul.f32 0.7978846, %v4560_v22  ;;  %v4578_v54 = vmul.f32 0.7978846, %v4562_v29  ;;  %v4440_v7 = vpop.f32.mrb[75].mxu1  ;;  %v4493_v24 = vpop.f32.mrb[67].mxu0  ;;  %v4564_v51 = vadd.f32 %v4548_v49, %v4429_v17  ;;  %v8712_v9 = vadd.f32 %v4489_v35, %v8666_v1 }
0x13ae   : > { %v4566_v40 = vadd.f32 %v4550_v18, %v8673_v33  ;;  %v4520_v12 = vmul.f32 0.044715, %v8695_v55  ;;  %v4521_v16 = vmul.f32 0.044715, %v8706_v58  ;;  %v8715_v52 = vadd.f32 %v4438_v10, %v8654_v63 }
0x13af   : > { %6877 = vtanh.f32 %v4576_v56  ;;  %v4580_v4 = vmul.f32 0.7978846, %v4564_v51  ;;  %v4549_v15 = vmul.f32 %v4533_v62, %v8676_v14  ;;  %v8720_v48 = vadd.f32 %v4491_v60, %v8657_v3 }
0x13b0   : > { %6879 = vtanh.f32 %v4578_v54  ;;  %v4582_v38 = vmul.f32 0.7978846, %v4566_v40  ;;  %v4536_v2 = vmul.f32 %v4520_v12, %v8695_v55  ;;  %v4522_v19 = vmul.f32 0.044715, %v8701_v46 }
0x13b1   : > { %6881 = vtanh.f32 %v4580_v4  ;;  %v4523_v8 = vmul.f32 0.044715, %v8712_v9  ;;  %v4500_v27 = vmul.f32 0.5, %v4429_v17  ;;  %v4537_v34 = vmul.f32 %v4521_v16, %v8706_v58 }
0x13b2   : > { %6883 = vtanh.f32 %v4582_v38  ;;  %v8727_v63 = vadd.f32 %v4440_v7, %v8660_v61  ;;  %v8730_v21 = vadd.f32 %v4493_v24, %v8666_v1  ;;  %v4547_v6 = vmul.f32 %v4531_v26, %v8679_v57 }
0x13b3   : > { %v4551_v3 = vmul.f32 %v4535_v30, %v8682_v59  ;;  %v4524_v13 = vmul.f32 0.044715, %v8715_v52  ;;  %v4526_v25 = vmul.f32 0.044715, %v8720_v48  ;;  %v4539_v23 = vmul.f32 %v4523_v8, %v8712_v9 }
0x13b4   : > { %v4525_v17 = vmul.f32 0.044715, %v8727_v63  ;;  %v4527_v39 = vmul.f32 0.044715, %v8730_v21  ;;  %v4561_v61 = vadd.f32 %v4545_v41, %v8669_v53  ;;  %v4502_v31 = vmul.f32 0.5, %v8673_v33 }
0x13b5   : > { %v4552_v1 = vmul.f32 %v4536_v2, %v8695_v55  ;;  %v4538_v50 = vmul.f32 %v4522_v19, %v8701_v46  ;;  %v4565_v5 = vadd.f32 %v4549_v15, %v8676_v14  ;;  %v4553_v43 = vmul.f32 %v4537_v34, %v8706_v58 }
0x13b6   : > { %v4541_v22 = vmul.f32 %v4525_v17, %v8727_v63  ;;  %v4543_v29 = vmul.f32 %v4527_v39, %v8730_v21  ;;  %v4577_v44 = vmul.f32 0.7978846, %v4561_v61  ;;  %v4540_v35 = vmul.f32 %v4524_v13, %v8715_v52 }
0x13b7   : > { %v4581_v36 = vmul.f32 0.7978846, %v4565_v5  ;;  %v4563_v49 = vadd.f32 %v4547_v6, %v8679_v57  ;;  %v4567_v33 = vadd.f32 %v4551_v3, %v8682_v59  ;;  %v4555_v10 = vmul.f32 %v4539_v23, %v8712_v9 }
0x13b8   : > { %v4542_v60 = vmul.f32 %v4526_v25, %v8720_v48  ;;  %v4557_v56 = vmul.f32 %v4541_v22, %v8727_v63  ;;  %6885 = vtanh.f32 %v4577_v44  ;;  %v4554_v32 = vmul.f32 %v4538_v50, %v8701_v46 }
0x13b9   : > { %v6878_v0 = vpop.eup %6877  ;;  %6887 = vtanh.f32 %v4581_v36  ;;  %v4579_v54 = vmul.f32 0.7978846, %v4563_v49  ;;  %v4583_v18 = vmul.f32 0.7978846, %v4567_v33  ;;  %v4559_v51 = vmul.f32 %v4543_v29, %v8730_v21 }
0x13ba   : > { %v6880_v28 = vpop.eup %6879  ;;  %v4608_v7 = vadd.f32 1.0, %v6878_v0  ;;  %v4569_v40 = vadd.f32 %v4553_v43, %v8706_v58  ;;  %v4556_v26 = vmul.f32 %v4540_v35, %v8715_v52  ;;  %v4573_v30 = vadd.f32 %v4557_v56, %v8727_v63 }
0x13bb   : > { %v6882_v24 = vpop.eup %6881  ;;  %v4610_v62 = vadd.f32 1.0, %v6880_v28  ;;  %6889 = vtanh.f32 %v4579_v54  ;;  %v4558_v38 = vmul.f32 %v4542_v60, %v8720_v48  ;;  %v4571_v8 = vadd.f32 %v4555_v10, %v8712_v9 }
0x13bc   : > { %v6884_v12 = vpop.eup %6883  ;;  %v4612_v4 = vadd.f32 1.0, %v6882_v24  ;;  %6891 = vtanh.f32 %v4583_v18  ;;  %v4585_v41 = vmul.f32 0.7978846, %v4569_v40  ;;  %v4624_v15 = vmul.f32 %v4608_v7, %v8684_v11 }
0x13bd   : > { %v4614_v16 = vadd.f32 1.0, %v6884_v12  ;;  %v4589_v19 = vmul.f32 0.7978846, %v4573_v30  ;;  %v4626_v34 = vmul.f32 %v4610_v62, %v8689_v37  ;;  %v4575_v3 = vadd.f32 %v4559_v51, %v8730_v21 }
0x13be   : > { %v4628_v2 = vmul.f32 %v4612_v4, %v4500_v27  ;;  %6893 = vtanh.f32 %v4585_v41  ;;  %v4587_v25 = vmul.f32 0.7978846, %v4571_v8  ;;  %v4568_v39 = vadd.f32 %v4552_v1, %v8695_v55 }
0x13bf   : > { %v4630_v6 = vmul.f32 %v4614_v16, %v4502_v31  ;;  %6895 = vtanh.f32 %v4589_v19  ;;  %v4591_v17 = vmul.f32 0.7978846, %v4575_v3  ;;  %v4572_v61 = vadd.f32 %v4556_v26, %v8715_v52 }
0x13c0   : > { %v4640_v13 = vpack.c.bf16 %v4628_v2, %v4624_v15  ;;  %6897 = vtanh.f32 %v4587_v25  ;;  %v4570_v11 = vadd.f32 %v4554_v32, %v8701_v46  ;;  %v4584_v50 = vmul.f32 0.7978846, %v4568_v39 }
0x13c1   : > { %v4642_v23 = vpack.c.bf16 %v4630_v6, %v4626_v34  ;;  %6899 = vtanh.f32 %v4591_v17  ;;  %v4588_v37 = vmul.f32 0.7978846, %v4572_v61  ;;  %v4574_v31 = vadd.f32 %v4558_v38, %v8720_v48 }
0x13c2   : > { %v6886_v27 = vpop.eup %6885  ;;  %v4497_v43 = vmul.f32 0.5, %v8669_v53  ;;  %v4586_v29 = vmul.f32 0.7978846, %v4570_v11  ;;  %v4501_v44 = vmul.f32 0.5, %v8676_v14  ;;  %6901 = vtanh.f32 %v4584_v50 }
0x13c3   : > { %v6888_v5 = vpop.eup %6887  ;;  %v4609_v22 = vadd.f32 1.0, %v6886_v27  ;;  %v4590_v1 = vmul.f32 0.7978846, %v4574_v31  ;;  %6903 = vtanh.f32 %v4588_v37  ;;  %v4499_v10 = vmul.f32 0.5, %v8679_v57 }
0x13c4   : > { %v4613_v0 = vadd.f32 1.0, %v6888_v5  ;;  %6905 = vtanh.f32 %v4586_v29  ;;  %v4503_v60 = vmul.f32 0.5, %v8682_v59  ;;  %v4505_v32 = vmul.f32 0.5, %v8706_v58 }
0x13c5   : > { %v6890_v35 = vpop.eup %6889  ;;  %v4625_v49 = vmul.f32 %v4609_v22, %v4497_v43  ;;  %6907 = vtanh.f32 %v4590_v1  ;;  %v4509_v51 = vmul.f32 0.5, %v8727_v63  ;;  %v4507_v30 = vmul.f32 0.5, %v8712_v9 }
0x13c6   : > { %v6892_v36 = vpop.eup %6891  ;;  %v4629_v33 = vmul.f32 %v4613_v0, %v4501_v44  ;;  %v4611_v28 = vadd.f32 1.0, %v6890_v35  ;;  %v4511_v38 = vmul.f32 0.5, %v8730_v21  ;;  %v4504_v34 = vmul.f32 0.5, %v8695_v55 }
0x13c7   : > { %v4615_v56 = vadd.f32 1.0, %v6892_v36  ;;  %v4508_v6 = vmul.f32 0.5, %v8715_v52  ;;  %v4506_v9 = vmul.f32 0.5, %v8701_v46  ;;  %v5765_v52 = vld [vmem:[%s8944_s13 + $0x1] ss:$0 sm:$0xff] }
0x13c8   : > { %v6894_v53 = vpop.eup %6893  ;;  %v4641_v54 = vpack.c.bf16 %v4629_v33, %v4625_v49  ;;  %v4627_v14 = vmul.f32 %v4611_v28, %v4499_v10 }
0x13c9   : > { %v6896_v18 = vpop.eup %6895  ;;  %v4631_v7 = vmul.f32 %v4615_v56, %v4503_v60  ;;  %v4617_v24 = vadd.f32 1.0, %v6894_v53 }
0x13ca   : > { %4945 = vmatprep.mubr.bf16.mxu1 %v4641_v54  ;;  %v4621_v62 = vadd.f32 1.0, %v6896_v18  ;;  %v6898_v40 = vpop.eup %6897 }
0x13cb   : > { %v4643_v12 = vpack.c.bf16 %v4631_v7, %v4627_v14  ;;  %4946 = vmatmul.mubr.bf16.vlgmr.msra.gmra.mrb[76].mxu1 %v4640_v13  ;;  %v6900_v57 = vpop.eup %6899  ;;  %v4633_v26 = vmul.f32 %v4617_v24, %v4505_v32  ;;  %v4619_v4 = vadd.f32 1.0, %v6898_v40 }
0x13cc   : > { %v4637_v59 = vmul.f32 %v4621_v62, %v4509_v51  ;;  %v4623_v16 = vadd.f32 1.0, %v6900_v57  ;;  %v6902_v41 = vpop.eup %6901 }
0x13cd   : > { %4994 = vmatprep.mubr.bf16.mxu0 %v4643_v12  ;;  %v6904_v58 = vpop.eup %6903  ;;  %v4635_v2 = vmul.f32 %v4619_v4, %v4507_v30  ;;  %v4616_v19 = vadd.f32 1.0, %v6902_v41  ;;  %v6989_v41 = vmov 0.0  }
0x13ce   : > { %4995 = vmatmul.mubr.bf16.vlgmr.msra.gmra.mrb[68].mxu0 %v4642_v23  ;;  %v4645_v15 = vpack.c.bf16 %v4637_v59, %v4633_v26  ;;  %v4639_v63 = vmul.f32 %v4623_v16, %v4511_v38  ;;  %v6906_v8 = vpop.eup %6905  ;;  %v4620_v3 = vadd.f32 1.0, %v6904_v58  ;;  %v4510_v23 = vmul.f32 0.5, %v8720_v48  ;;  %v6669_v16 = vld [vmem:[%s8947_s16] sm:$0xff]   ;;  %6268 = vmatprep.subr.bf16.mxu1 %v6989_v41 }
0x13cf   : > { %v6908_v13 = vpop.eup %6907  ;;  %v4618_v21 = vadd.f32 1.0, %v6906_v8  ;;  %v4632_v17 = vmul.f32 %v4616_v19, %v4504_v34  ;;  %6288 = vmatprep.subr.bf16.mxu0 %v6989_v41  ;;  %6269 = vmatpush3.bf16.msra.mxu1 %v6669_v16 }
0x13d0   : > { %4953 = vmatprep.mubr.bf16.mxu1 %v4645_v15  ;;  %v4647_v25 = vpack.c.bf16 %v4639_v63, %v4635_v2  ;;  %v4636_v39 = vmul.f32 %v4620_v3, %v4508_v6  ;;  %v4622_v61 = vadd.f32 1.0, %v6908_v13  ;;  %6270 = vmatprep.subr.bf16.mxu1 %v6989_v41 }
0x13d1   : > { %v4634_v27 = vmul.f32 %v4618_v21, %v4506_v9  ;;  %v6670_v21 = vld [vmem:[%s8947_s16 + $0x8] sm:$0xff]  }
0x13d2   : > { %5002 = vmatprep.mubr.bf16.mxu0 %v4647_v25  ;;  %v4644_v11 = vpack.c.bf16 %v4636_v39, %v4632_v17  ;;  %v4638_v50 = vmul.f32 %v4622_v61, %v4510_v23  ;;  %v6671_v17 = vld [vmem:[%s8947_s16 + $0x10] sm:$0xff]   ;;  %v6672_v39 = vld [vmem:[%s8947_s16 + $0x18] sm:$0xff]   ;;  %v6673_v23 = vld [vmem:[%s8947_s16 + $0x20] sm:$0xff]  }
0x13d3   : > { %6271 = vmatpush3.bf16.msra.mxu1 %v6670_v21  ;;  %v6674_v61 = vld [vmem:[%s8947_s16 + $0x28] sm:$0xff]  }
0x13d4   : > { %4954 = vmatmul.mubr.bf16.gmra.mrb[80].mxu1 %v4644_v11  ;;  %v4646_v37 = vpack.c.bf16 %v4638_v50, %v4634_v27  ;;  %6272 = vmatprep.subr.bf16.mxu1 %v6989_v41  ;;  %v6675_v11 = vld [vmem:[%s8947_s16 + $0x30] sm:$0xff]   ;;  %v6677_v27 = vld [vmem:[%s8949_s18] sm:$0xff]   ;;  %v6678_v50 = vld [vmem:[%s8949_s18 + $0x8] sm:$0xff]  }
0x13d5   : > { %6284 = vmatprep.mubr.msk.bf16.mxu1 %vm6990_vm3, %v6989_v41  ;;  %6289 = vmatpush3.bf16.msra.mxu0 %v6677_v27 }
0x13d6   : > { %5003 = vmatmul.mubr.bf16.gmra.mrb[72].mxu0 %v4646_v37  ;;  %v6676_v37 = vld [vmem:[%s8947_s16 + $0x38] sm:$0xff]   ;;  %6290 = vmatprep.subr.bf16.mxu0 %v6989_v41 }
0x13d7   : > { %6273 = vmatpush3.bf16.msra.mxu1 %v6671_v17  ;;  %6304 = vmatprep.mubr.msk.bf16.mxu0 %vm6990_vm3, %v6989_v41 }
0x13d8   : > { %6274 = vmatprep.subr.bf16.mxu1 %v6989_v41 }
0x13d9   : > { %6291 = vmatpush3.bf16.msra.mxu0 %v6678_v50 }
0x13da   : > { %6292 = vmatprep.subr.bf16.mxu0 %v6989_v41 }
0x13db   : > { %6275 = vmatpush3.bf16.msra.mxu1 %v6672_v39 }
0x13dc   : > { %6276 = vmatprep.subr.bf16.mxu1 %v6989_v41 }
0x13df   : > { %6277 = vmatpush3.bf16.msra.mxu1 %v6673_v23 }
0x13e0   : > { %6278 = vmatprep.subr.bf16.mxu1 %v6989_v41 }
0x13e3   : > { %6279 = vmatpush3.bf16.msra.mxu1 %v6674_v61 }
0x13e4   : > { %6280 = vmatprep.subr.bf16.mxu1 %v6989_v41 }
0x13e7   : > { %6281 = vmatpush3.bf16.msra.mxu1 %v6675_v11 }
0x13e8   : > { %6282 = vmatprep.subr.bf16.mxu1 %v6989_v41 }
0x13eb   : > { %6283 = vmatpush3.bf16.msra.mxu1 %v6676_v37 }
0x149e   : > { %v6002_v55 = vpop.f32.mrb[76].mxu1 }
0x149f   : > { %v6003_v31 = vpop.f32.mrb[77].mxu1 }
0x14a0   : > { %v6004_v46 = vadd.f32 %v6003_v31, %v6002_v55  ;;  %v6005_v5 = vpop.f32.mrb[78].mxu1  ;;  %v6679_v55 = vld [vmem:[%s8949_s18 + $0x10] sm:$0xff]   ;;  %v6681_v31 = vld [vmem:[%s8949_s18 + $0x20] sm:$0xff]  }
0x14a1   : > { %v6030_v43 = vpop.f32.mrb[68].mxu0  ;;  %v6006_v22 = vpop.f32.mrb[79].mxu1  ;;  %6293 = vmatpush3.bf16.msra.mxu0 %v6679_v55 }
0x14a2   : > { %v4948_v29 = vadd.f32 %v6004_v46, %v5765_v52  ;;  %v6031_v48 = vpop.f32.mrb[69].mxu0  ;;  %v6007_v44 = vadd.f32 %v6006_v22, %v6005_v5  ;;  %6294 = vmatprep.subr.bf16.mxu0 %v6989_v41  ;;  %v6682_v46 = vld [vmem:[%s8949_s18 + $0x28] sm:$0xff]  }
0x14a3   : > { %v6032_v0 = vadd.f32 %v6031_v48, %v6030_v43  ;;  %v6033_v1 = vpop.f32.mrb[70].mxu0 }
0x14a4   : > { %v4951_v35 = vadd.f32 %v6007_v44, %v5765_v52  ;;  %v6034_v36 = vpop.f32.mrb[71].mxu0 }
0x14a5   : > { %v4997_v49 = vadd.f32 %v6032_v0, %v4948_v29  ;;  %v6035_v33 = vadd.f32 %v6034_v36, %v6033_v1 }
0x14a7   : > { %v5000_v28 = vadd.f32 %v6035_v33, %v4951_v35  ;;  %v6008_v10 = vpop.f32.mrb[80].mxu1  ;;  %v5011_v30 = vadd.f32 %v4997_v49, %v8538_v20 }
0x14a8   : > { %v6009_v60 = vpop.f32.mrb[81].mxu1 }
0x14a9   : > { %v6036_v56 = vpop.f32.mrb[72].mxu0  ;;  %v6010_v53 = vadd.f32 %v6009_v60, %v6008_v10  ;;  %v6011_v54 = vpop.f32.mrb[82].mxu1  ;;  %v5012_v38 = vadd.f32 %v5000_v28, %v8540_v45  ;;  %v5800_v10 = vld [vmem:[%s8945_s14 + $0x1] ss:$0 sm:$0xff] }
0x14aa   : > { %v6037_v18 = vpop.f32.mrb[73].mxu0  ;;  %v6012_v14 = vpop.f32.mrb[83].mxu1 }
0x14ab   : > { %v4956_v7 = vadd.f32 %v6010_v53, %v5765_v52  ;;  %v6038_v24 = vadd.f32 %v6037_v18, %v6036_v56  ;;  %v6039_v32 = vpop.f32.mrb[74].mxu0  ;;  %v6013_v51 = vadd.f32 %v6012_v14, %v6011_v54  ;;  %v5801_v14 = vld [vmem:[%s8946_s15 + $0x1] ss:$0 sm:$0xff] }
0x14ac   : > { %v6040_v62 = vpop.f32.mrb[75].mxu0 }
0x14ad   : > { %v5005_v40 = vadd.f32 %v6038_v24, %v4956_v7  ;;  %v4959_v12 = vadd.f32 %v6013_v51, %v5765_v52  ;;  %v6041_v57 = vadd.f32 %v6040_v62, %v6039_v32  ;;  %v6680_v52 = vld [vmem:[%s8949_s18 + $0x18] sm:$0xff]  }
0x14ae   : > { %6295 = vmatpush3.bf16.msra.mxu0 %v6680_v52 }
0x14af   : > { %v5008_v26 = vadd.f32 %v6041_v57, %v4959_v12  ;;  %v5013_v59 = vadd.f32 %v5005_v40, %v8550_v42  ;;  %6296 = vmatprep.subr.bf16.mxu0 %v6989_v41 }
0x14b1   : > { %5023 = vadd.xlane.f32.xlu0 %v5013_v59  ;;  %v5014_v4 = vadd.f32 %v5008_v26, %v8548_v47 }
0x14b2   : > { %6297 = vmatpush3.bf16.msra.mxu0 %v6681_v31 }
0x14b3   : > { %5025 = vadd.xlane.f32.xlu1 %v5014_v4  ;;  %6298 = vmatprep.subr.bf16.mxu0 %v6989_v41 }
0x14b5   : > { %5019 = vadd.xlane.f32.xlu0 %v5011_v30 }
0x14b6   : > { %6299 = vmatpush3.bf16.msra.mxu0 %v6682_v46 }
0x14b7   : > { %5021 = vadd.xlane.f32.xlu1 %v5012_v38  ;;  %6300 = vmatprep.subr.bf16.mxu0 %v6989_v41 }
0x153e   : > { %v5024_v47 = vpop.xlane.xlu0 %5023 }
0x153f   : > { %v5029_v42 = vmul.f32 0.0078125, %v5024_v47  ;;  %v6683_v47 = vld [vmem:[%s8949_s18 + $0x30] sm:$0xff]  }
0x1540   : > { %v5026_v15 = vpop.xlane.xlu1 %5025  ;;  %6301 = vmatpush3.bf16.msra.mxu0 %v6683_v47 }
0x1541   : > { %v8792_v20 = vsub.f32 %v5013_v59, %v5029_v42  ;;  %v5030_v58 = vmul.f32 0.0078125, %v5026_v15  ;;  %v6684_v42 = vld [vmem:[%s8949_s18 + $0x38] sm:$0xff]   ;;  %6302 = vmatprep.subr.bf16.mxu0 %v6989_v41  ;;  %v5802_v15 = vld [vmem:[%s8948_s17] ss:$0 sm:$0xff] }
0x1542   : > { %v5020_v45 = vpop.xlane.xlu0 %5019  ;;  %v5811_v41 = vld [vmem:[%s8950_s19] ss:$0 sm:$0xff] }
0x1543   : > { %v8794_v2 = vsub.f32 %v5014_v4, %v5030_v58  ;;  %v5027_v63 = vmul.f32 0.0078125, %v5020_v45  ;;  %v5037_v19 = vmul.f32 %v8792_v20, %v8792_v20 }
0x1544   : > { %v5022_v8 = vpop.xlane.xlu1 %5021  ;;  %6303 = vmatpush3.bf16.msra.mxu0 %v6684_v42 }
0x1545   : > { %v8798_v34 = vsub.f32 %v5011_v30, %v5027_v63  ;;  %v5028_v6 = vmul.f32 0.0078125, %v5022_v8  ;;  %5043 = vadd.xlane.f32.xlu0 %v5037_v19  ;;  %v5038_v3 = vmul.f32 %v8794_v2, %v8794_v2 }
0x1547   : > { %v8802_v13 = vsub.f32 %v5012_v38, %v5028_v6  ;;  %5045 = vadd.xlane.f32.xlu1 %v5038_v3  ;;  %v5035_v25 = vmul.f32 %v8798_v34, %v8798_v34 }
0x1549   : > { %5039 = vadd.xlane.f32.xlu0 %v5035_v25  ;;  %v5036_v9 = vmul.f32 %v8802_v13, %v8802_v13 }
0x154b   : > { %5041 = vadd.xlane.f32.xlu1 %v5036_v9 }
0x15d2   : > { %v5044_v5 = vpop.xlane.xlu0 %5043 }
0x15d3   : > { %v5049_v43 = vmul.f32 0.0078125, %v5044_v5 }
0x15d4   : > { %v5046_v22 = vpop.xlane.xlu1 %5045 }
0x15d5   : > { %v5053_v29 = vadd.f32 1e-05, %v5049_v43  ;;  %v5050_v48 = vmul.f32 0.0078125, %v5046_v22 }
0x15d6   : > { %v5040_v44 = vpop.xlane.xlu0 %5039 }
0x15d7   : > { %6909 = vrsqrt.f32 %v5053_v29  ;;  %v5054_v0 = vadd.f32 1e-05, %v5050_v48  ;;  %v5047_v1 = vmul.f32 0.0078125, %v5040_v44 }
0x15d8   : > { %v5042_v35 = vpop.xlane.xlu1 %5041 }
0x15d9   : > { %6911 = vrsqrt.f32 %v5054_v0  ;;  %v5051_v36 = vadd.f32 1e-05, %v5047_v1  ;;  %v5048_v49 = vmul.f32 0.0078125, %v5042_v35 }
0x15db   : > { %6913 = vrsqrt.f32 %v5051_v36  ;;  %v5052_v33 = vadd.f32 1e-05, %v5048_v49 }
0x15dd   : > { %6915 = vrsqrt.f32 %v5052_v33 }
0x15e1   : > { %v6910_v28 = vpop.eup %6909 }
0x15e2   : > { %v5061_v60 = vmul.f32 %v6910_v28, %v8792_v20 }
0x15e3   : > { %v6912_v56 = vpop.eup %6911 }
0x15e4   : > { %v5071_v53 = vmul.f32 %v5800_v10, %v5061_v60  ;;  %v5062_v54 = vmul.f32 %v6912_v56, %v8794_v2 }
0x15e5   : > { %v6914_v18 = vpop.eup %6913 }
0x15e6   : > { %v5072_v7 = vmul.f32 %v5800_v10, %v5062_v54  ;;  %v5059_v24 = vmul.f32 %v6914_v18, %v8798_v34  ;;  %v5081_v40 = vadd.f32 %v5801_v14, %v5071_v53 }
0x15e7   : > { %v6916_v32 = vpop.eup %6915 }
0x15e8   : > { %v5069_v51 = vmul.f32 %v5800_v10, %v5059_v24  ;;  %v5060_v62 = vmul.f32 %v6916_v32, %v8802_v13  ;;  %v5082_v12 = vadd.f32 %v5801_v14, %v5072_v7 }
0x15ea   : > { %v5070_v57 = vmul.f32 %v5800_v10, %v5060_v62  ;;  %v5084_v26 = vpack.c.bf16 %v5082_v12, %v5081_v40  ;;  %v5079_v59 = vadd.f32 %v5801_v14, %v5069_v51 }
0x15ec   : > { %v5080_v4 = vadd.f32 %v5801_v14, %v5070_v57  ;;  %v5086_v38 = vshll.u32 %v5084_v26, 16 }
0x15ee   : > { %v5083_v30 = vpack.c.bf16 %v5080_v4, %v5079_v59 }
0x15f0   : > { %v5092_v16 = vsel %vm5091_vm6, %v5083_v30, %v5086_v38 }
0x15f1   : > { %6285 = vmatmul.mubr.bf16.vlgmr.msra.gmra.mrb[84].mxu1 %v5092_v16 }
0x16c4   : > { %v5198_v20 = vpop.f32.mrb[84].mxu1 }
0x16c5   : > { %v5199_v58 = vadd.f32 %v5802_v15, %v5198_v20  ;;  %v6286_v45 = vpop.f32.mrb[85].mxu1 }
0x16c6   : > { %v5201_v2 = vpop.f32.mrb[86].mxu1 }
0x16c7   : > { %v5204_v63 = vmax.f32 %v5199_v58, 0.0  ;;  %v6287_v19 = vpop.f32.mrb[87].mxu1 }
0x16c9   : > { %v5205_v8 = vpack.c.bf16 %v5204_v63, %v5204_v63 }
0x16cb   : > { %6305 = vmatmul.mubr.bf16.vlgmr.msra.gmra.mrb[76].mxu0 %v5205_v8 }
0x179e   : > { %v5311_v34 = vpop.f32.mrb[76].mxu0 }
0x179f   : > { %v5312_v6 = vadd.f32 %v5811_v41, %v5311_v34  ;;  %v6306_v3 = vpop.f32.mrb[77].mxu0 }
0x17a0   : > { %v5314_v13 = vpop.f32.mrb[78].mxu0 }
0x17a1   : > { %5317 = vst [vmem:[%s637_s0] sm:$0x3] %v5312_v6  ;;  %v6307_v25 = vpop.f32.mrb[79].mxu0 }
0x17a2   : > { %6934 = shalt.err (!%p6931_p3)
}
0x17a3   : > { %s6935_s20 = scalar_lea.hbm %s8889_s25, 32  ;;  %s6939_s27 = scalar_lea.hbm %s8989_s28, 64 }
0x17a4   : > { %p6936_p4 = scmp.ne.s32.totalorder %s8889_s25, %s6935_s20  ;;  %p6940_p9 = scmp.lt.u32.totalorder %s8889_s25, %s8989_s28 }
0x17a5   : > { %p6941_p10 = scmp.lt.u32.totalorder %s6939_s27, %s6935_s20  ;;  %p6943_p12 = scmp.lt.u32.totalorder %s6935_s20, %s8889_s25 }
0x17a6   : > { %p6937_p7 = pnand %p6936_p4, %p7135_p5 }
0x17a7   : > { %p6942_p11 = por %p6941_p10, %p6940_p9 }
0x17a8   : > { %p6938_p8 = pneg %p6937_p7 }
0x17a9   : > { %p6944_p13 = por %p6943_p12, %p6942_p11 }
0x17ab   : > { %p6945_p0 = pnand %p6944_p13, %p6938_p8 }
0x17ad   : > { %6948 = shalt.err (!%p6945_p0)
}
0x17ae   : > { %6324 = dma.vmem_to_hbm [thread:$0]  (%p7135_p5), %s8891_s29, 32, %s8889_s25, %s5319_s21  }
0x17af PF: > { %s8990_s2 = sld [smem:[#allocation7_spill]]  ;;  %s8991_s30 = sld [smem:[#allocation5_spill]] }
0x17b5   : > { %p6330_p1 = scmp.ge.s32.totalorder %s8990_s2, 2  ;;  %s5344_s1 = sand.u32 1, %s8991_s30  }
0x17b6   : > { %s5345_s0 = scalar_lea.sflag [#allocation3], %s5344_s1 }
0x17b7   : > { %p6327_p2 = pnand %p6330_p1, %p7139_p6 }
0x17b9   : > { %6966 = dma.done.wait (!%p6327_p2), %s5345_s0, 32  }
0x17ba   : > { %6968 = vsyncadd (!%p6327_p2), %s5345_s0, 4294967264  ;;  %s8993_s24 = sld [smem:[#allocation8_spill]]  ;;  %s8994_s20 = sld [smem:[#allocation6_spill]] }
0x17bb   : > { %s8995_s23 = sld [smem:[#allocation9_spill]]  ;;  %s8996_s1 = smov %s6975_s22 }
0x17c0   : > { %p30_p3 = scmp.ge.s32.totalorder %s8993_s24, 4   ;;  %s8997_s22 = smov %s8994_s20 }
0x17c2   :  { %32 = sbr.rel (!%p30_p3) target bundleno = 10 (0xa), region = 150 }
0x17c9   :  { %5350 = vsyncpa [#allocation3], 1 }
0x17ca   :  { %5352 = vsyncpa [#allocation3 + $0x1], 1 }

</bundles_post_ra>
